<compile_context>
chip_gen: v7x
topology: tpu7x:2x2x1
jax: 0.10.0
libtpu: 0.0.40
codegen_flags: <defaults>
</compile_context>

<pallas_src>
import functools
import numpy as np

import jax
import jax.numpy as jnp
from jax.experimental import pallas as pl
from jax.experimental.pallas import tpu as pltpu

NUM_CLASSES = 21
CIN = 3


def _round_up(x, m):
    return (x + m - 1) // m * m


# ----------------------------------------------------------------------------
# Pallas kernel: tiled matmul + folded-BatchNorm affine + optional ReLU
#   Y = relu?((X @ W) * scale + bias),  f32 accumulator in VMEM scratch.
# ----------------------------------------------------------------------------
def _mm_affine_kernel(x_ref, w_ref, s_ref, b_ref, o_ref, acc_ref, *, apply_relu):
    k = pl.program_id(2)

    @pl.when(k == 0)
    def _():
        acc_ref[...] = jnp.zeros_like(acc_ref)

    acc_ref[...] += jnp.dot(x_ref[...], w_ref[...],
                            preferred_element_type=jnp.float32)

    @pl.when(k == pl.num_programs(2) - 1)
    def _():
        y = acc_ref[...] * s_ref[...] + b_ref[...]
        if apply_relu:
            y = jnp.maximum(y, 0.0)
        o_ref[...] = y.astype(o_ref.dtype)


def _pick_tiles(M, N, K):
    """Lane/sublane-aligned padded dims and tile sizes that divide them."""
    Mp = _round_up(M, 128)
    Np = _round_up(N, 128)
    Kp = _round_up(K, 128)

    def pick(dim, cap):
        if dim <= cap:
            return dim
        if dim % 256 == 0:
            return 256
        return 128  # dim is a multiple of 128

    tm = pick(Mp, 512)
    tk = pick(Kp, 512)
    tn = 256 if (Np % 256 == 0 and Np > 128) else 128
    return Mp, Np, Kp, tm, tn, tk


def mm_affine(a, w, scale, bias, relu, out_dtype=jnp.bfloat16):
    """Y = relu?((a @ w) * scale + bias).  a:[M,K]  w:[K,N]  scale/bias:[N]."""
    M, K = a.shape
    K2, N = w.shape
    assert K == K2
    Mp, Np, Kp, tm, tn, tk = _pick_tiles(M, N, K)

    # bf16 MXU inputs (zero padding keeps the result exact); f32 epilogue.
    a_p = jnp.zeros((Mp, Kp), jnp.bfloat16).at[:M, :K].set(a.astype(jnp.bfloat16))
    w_p = jnp.zeros((Kp, Np), jnp.bfloat16).at[:K, :N].set(w.astype(jnp.bfloat16))
    s_p = jnp.zeros((1, Np), jnp.float32).at[0, :N].set(scale.astype(jnp.float32))
    b_p = jnp.zeros((1, Np), jnp.float32).at[0, :N].set(bias.astype(jnp.float32))

    grid = (Mp // tm, Np // tn, Kp // tk)
    kernel = functools.partial(_mm_affine_kernel, apply_relu=relu)

    out_bytes = jnp.dtype(out_dtype).itemsize
    cost = pl.CostEstimate(
        flops=2 * Mp * Np * Kp,
        transcendentals=0,
        bytes_accessed=2 * (Mp * Kp + Kp * Np) + out_bytes * Mp * Np + 8 * Np,
    )

    y = pl.pallas_call(
        kernel,
        out_shape=jax.ShapeDtypeStruct((Mp, Np), out_dtype),
        grid=grid,
        in_specs=[
            pl.BlockSpec((tm, tk), lambda i, j, k: (i, k)),
            pl.BlockSpec((tk, tn), lambda i, j, k: (k, j)),
            pl.BlockSpec((1, tn), lambda i, j, k: (0, j)),
            pl.BlockSpec((1, tn), lambda i, j, k: (0, j)),
        ],
        out_specs=pl.BlockSpec((tm, tn), lambda i, j, k: (i, j)),
        scratch_shapes=[pltpu.VMEM((tm, tn), jnp.float32)],
        compiler_params=pltpu.CompilerParams(
            dimension_semantics=("parallel", "parallel", "arbitrary"),
            vmem_limit_bytes=32 * 1024 * 1024,
        ),
        cost_estimate=cost,
    )(a_p, w_p, s_p, b_p)
    return y[:M, :N]


# ----------------------------------------------------------------------------
# Conv = im2col (JAX glue, bf16) + Pallas fused matmul
# ----------------------------------------------------------------------------
def im2col(x, kh, kw, stride, dilation, padding):
    n, h, w, c = x.shape
    xp = jnp.pad(x, ((0, 0), (padding, padding), (padding, padding), (0, 0)))
    ho = (h + 2 * padding - dilation * (kh - 1) - 1) // stride + 1
    wo = (w + 2 * padding - dilation * (kw - 1) - 1) // stride + 1
    patches = []
    for i in range(kh):
        for j in range(kw):
            hs = i * dilation
            ws = j * dilation
            patches.append(
                xp[:, hs:hs + stride * (ho - 1) + 1:stride,
                      ws:ws + stride * (wo - 1) + 1:stride, :])
    cols = jnp.concatenate(patches, axis=-1)  # [N, Ho, Wo, kh*kw*C]
    return cols.reshape(n * ho * wo, kh * kw * c), (n, ho, wo)


def conv2d(x, w, scale, bias, stride=1, dilation=1, padding=0, relu=True,
           out_dtype=jnp.bfloat16):
    """x:[N,H,W,Cin], w:[kh,kw,Cin,Cout]; BN folded into scale/bias."""
    kh, kw, cin, cout = w.shape
    cols, (n, ho, wo) = im2col(x, kh, kw, stride, dilation, padding)
    wf = w.reshape(kh * kw * cin, cout)
    y = mm_affine(cols, wf, scale, bias, relu, out_dtype=out_dtype)
    return y.reshape(n, ho, wo, cout)


# ----------------------------------------------------------------------------
# Bilinear interpolation, align_corners=True, as ONE Pallas matmul per batch:
#   out[n] = kron(Ah, Aw) @ x[n].reshape(H*W, C)
# ----------------------------------------------------------------------------
def _bilinear_matrix_np(out_size, in_size):
    a = np.zeros((out_size, in_size), np.float32)
    for i in range(out_size):
        src = 0.0 if out_size == 1 else i * (in_size - 1) / (out_size - 1)
        i0 = int(np.floor(src))
        i1 = min(i0 + 1, in_size - 1)
        w1 = src - i0
        a[i, i0] += 1.0 - w1
        a[i, i1] += w1
    return a


def _bilinear_kernel(b_ref, x_ref, o_ref):
    o_ref[...] = jnp.dot(b_ref[...], x_ref[...].astype(jnp.float32),
                         preferred_element_type=jnp.float32).astype(o_ref.dtype)


def bilinear_upsample(x, hout, wout, out_dtype=None):
    n, h, w, c = x.shape
    out_dtype = out_dtype or x.dtype
    bmat = np.kron(_bilinear_matrix_np(hout, h), _bilinear_matrix_np(wout, w))
    hw, howo = h * w, hout * wout
    hwp = _round_up(hw, 128)
    cp = _round_up(c, 128)

    b_p = jnp.zeros((howo, hwp), jnp.float32).at[:, :hw].set(jnp.asarray(bmat))
    x_p = jnp.zeros((n, hwp, cp), x.dtype).at[:, :hw, :c].set(
        x.reshape(n, hw, c))

    y = pl.pallas_call(
        _bilinear_kernel,
        out_shape=jax.ShapeDtypeStruct((n, howo, cp), out_dtype),
        grid=(n,),
        in_specs=[
            pl.BlockSpec((howo, hwp), lambda b: (0, 0)),
            pl.BlockSpec((None, hwp, cp), lambda b: (b, 0, 0)),
        ],
        out_specs=pl.BlockSpec((None, howo, cp), lambda b: (b, 0, 0)),
        compiler_params=pltpu.CompilerParams(
            dimension_semantics=("parallel",),
            vmem_limit_bytes=32 * 1024 * 1024,
        ),
    )(b_p, x_p)
    return y[:, :, :c].reshape(n, hout, wout, c)


# ----------------------------------------------------------------------------
# Deterministic synthetic parameters (conv weight + folded BN affine)
# ----------------------------------------------------------------------------
def init_params(key):
    params = {}

    def conv_p(name, kh, kw, cin, cout):
        nonlocal key
        key, k1, k2, k3 = jax.random.split(key, 4)
        params[name] = dict(
            w=jax.random.normal(k1, (kh, kw, cin, cout), jnp.float32)
            * (1.0 / np.sqrt(kh * kw * cin)),
            scale=1.0 + 0.05 * jax.random.normal(k2, (cout,), jnp.float32),
            bias=0.05 * jax.random.normal(k3, (cout,), jnp.float32),
        )

    # backbone (output_stride = 16), channel counts scaled down
    conv_p("b1", 3, 3, CIN, 8)
    conv_p("b2", 3, 3, 8, 16)     # low-level features (stride 4)
    conv_p("b3", 3, 3, 16, 32)
    conv_p("b4", 3, 3, 32, 64)    # high-level features (stride 16)
    # ASPP
    conv_p("aspp1", 1, 1, 64, 16)
    conv_p("aspp2", 3, 3, 64, 16)
    conv_p("aspp3", 3, 3, 64, 16)
    conv_p("aspp4", 3, 3, 64, 16)
    conv_p("aspp_pool", 1, 1, 64, 16)
    conv_p("aspp_proj", 1, 1, 80, 32)
    # decoder
    conv_p("dec_low", 1, 1, 16, 8)
    conv_p("dec_c1", 3, 3, 40, 32)
    conv_p("dec_c2", 3, 3, 32, 32)
    conv_p("cls", 1, 1, 32, NUM_CLASSES)
    return params


# ----------------------------------------------------------------------------
# DeepLab forward (use_kinematic=False path): backbone -> ASPP -> decoder ->
# bilinear upsample to input spatial size (align_corners=True)
# ----------------------------------------------------------------------------
def deeplab_forward(params, x_nchw):
    n, _, h, w = x_nchw.shape
    x = jnp.transpose(x_nchw, (0, 2, 3, 1)).astype(jnp.bfloat16)  # NCHW -> NHWC

    def cv(name, t, **kw):
        p = params[name]
        return conv2d(t, p["w"], p["scale"], p["bias"], **kw)

    # backbone
    x1 = cv("b1", x, stride=2, padding=1)      # /2
    low = cv("b2", x1, stride=2, padding=1)    # /4  (low_level_feat)
    x3 = cv("b3", low, stride=2, padding=1)    # /8
    hi = cv("b4", x3, stride=2, padding=1)     # /16 (x)

    # ASPP (atrous rates scaled down to fit the tiny synthetic feature map)
    a1 = cv("aspp1", hi)
    a2 = cv("aspp2", hi, dilation=1, padding=1)
    a3 = cv("aspp3", hi, dilation=2, padding=2)
    a4 = cv("aspp4", hi, dilation=3, padding=3)
    gp = jnp.mean(hi.astype(jnp.float32), axis=(1, 2),
                  keepdims=True).astype(jnp.bfloat16)   # global avg pool (glue)
    gp = cv("aspp_pool", gp)
    gp = jnp.broadcast_to(gp, (n, hi.shape[1], hi.shape[2], gp.shape[-1]))
    aspp = jnp.concatenate([a1, a2, a3, a4, gp], axis=-1)
    aspp = cv("aspp_proj", aspp)
    # TODO(synk): ASPP/decoder Dropout omitted (inference semantics assumed).

    # decoder
    lowr = cv("dec_low", low)
    up = bilinear_upsample(aspp, low.shape[1], low.shape[2])
    d = jnp.concatenate([up, lowr], axis=-1)
    d = cv("dec_c1", d, padding=1)
    d = cv("dec_c2", d, padding=1)
    logits = cv("cls", d, relu=False, out_dtype=jnp.float32)

    # final bilinear upsample to input size, align_corners=True
    out = bilinear_upsample(logits, h, w, out_dtype=jnp.float32)
    return jnp.transpose(out, (0, 3, 1, 2))            # NHWC -> NCHW


if __name__ == "__main__":
    key = jax.random.PRNGKey(0)
    kp, kx = jax.random.split(key)
    params = init_params(kp)
    x = jax.random.normal(kx, (2, CIN, 32, 32), jnp.float32)  # NCHW input
    fwd = jax.jit(deeplab_forward)
    out = jax.block_until_ready(fwd(params, x))
    assert out.shape == (2, NUM_CLASSES, 32, 32), out.shape
    assert bool(jnp.all(jnp.isfinite(out)))
    print("KERNEL_OK")
</pallas_src>

<mosaic_0001>
module attributes {stable_mosaic.version = 11 : i64} {
  func.func @_mm_affine_kernel(%arg0: i32, %arg1: i32, %arg2: i32, %arg3: memref<512x128xbf16, #tpu.memory_space<vmem>>, %arg4: memref<128x128xbf16, #tpu.memory_space<vmem>>, %arg5: memref<1x128xf32, #tpu.memory_space<vmem>>, %arg6: memref<1x128xf32, #tpu.memory_space<vmem>>, %arg7: memref<512x128xbf16, #tpu.memory_space<vmem>>, %arg8: memref<512x128xf32, #tpu.memory_space<vmem>>) attributes {dimension_semantics = [#tpu.dimension_semantics<parallel>, #tpu.dimension_semantics<parallel>, #tpu.dimension_semantics<arbitrary>], iteration_bounds = array<i64: 1, 1, 1>, scalar_prefetch = 0 : i64, scratch_operands = 1 : i64, tpu.core_type = #tpu.core_type<tc>, window_params = [{transform_indices = @transform_0, window_bounds = array<i64: 512, 128>}, {transform_indices = @transform_1, window_bounds = array<i64: 128, 128>}, {transform_indices = @transform_2, window_bounds = array<i64: 1, 128>}, {transform_indices = @transform_3, window_bounds = array<i64: 1, 128>}, {transform_indices = @transform_4, window_bounds = array<i64: 512, 128>}]} {
    %c0_i32 = arith.constant 0 : i32
    %0 = arith.cmpi eq, %arg2, %c0_i32 : i32
    %1 = arith.extui %0 : i1 to i32
    %c0_i32_0 = arith.constant 0 : i32
    %2 = arith.cmpi ne, %1, %c0_i32_0 : i32
    scf.if %2 {
      %cst_10 = arith.constant 0.000000e+00 : f32
      %12 = vector.broadcast %cst_10 : f32 to vector<512x128xf32>
      %c0_11 = arith.constant 0 : index
      %c0_12 = arith.constant 0 : index
      %13 = vector.load %arg8[%c0_11, %c0_12] : memref<512x128xf32, #tpu.memory_space<vmem>>, vector<512x128xf32>
      tpu.vector_store %arg8[%c0_11, %c0_12], %12 {strides = array<i32>} : memref<512x128xf32, #tpu.memory_space<vmem>>, vector<512x128xf32>,
    } else {
    }
    %c0 = arith.constant 0 : index
    %c0_1 = arith.constant 0 : index
    %3 = vector.load %arg8[%c0, %c0_1] : memref<512x128xf32, #tpu.memory_space<vmem>>, vector<512x128xf32>
    %c0_2 = arith.constant 0 : index
    %c0_3 = arith.constant 0 : index
    %4 = vector.load %arg3[%c0_2, %c0_3] : memref<512x128xbf16, #tpu.memory_space<vmem>>, vector<512x128xbf16>
    %c0_4 = arith.constant 0 : index
    %c0_5 = arith.constant 0 : index
    %5 = vector.load %arg4[%c0_4, %c0_5] : memref<128x128xbf16, #tpu.memory_space<vmem>>, vector<128x128xbf16>
    %cst = arith.constant dense<0.000000e+00> : vector<512x128xf32>
    %6 = tpu.matmul %4, %5, %cst {dimension_numbers = #tpu.dot_dimension_numbers<[1], [0], [0], [1], [0, 0, 1, 1], [], []>} : vector<512x128xbf16>, vector<128x128xbf16>, vector<512x128xf32> -> vector<512x128xf32>
    %7 = arith.addf %3, %6 : vector<512x128xf32>
    %c0_6 = arith.constant 0 : index
    %c0_7 = arith.constant 0 : index
    %8 = vector.load %arg8[%c0_6, %c0_7] : memref<512x128xf32, #tpu.memory_space<vmem>>, vector<512x128xf32>
    tpu.vector_store %arg8[%c0_6, %c0_7], %7 {strides = array<i32>} : memref<512x128xf32, #tpu.memory_space<vmem>>, vector<512x128xf32>,
    %c0_i32_8 = arith.constant 0 : i32
    %9 = arith.cmpi eq, %arg2, %c0_i32_8 : i32
    %10 = arith.extui %9 : i1 to i32
    %c0_i32_9 = arith.constant 0 : i32
    %11 = arith.cmpi ne, %10, %c0_i32_9 : i32
    scf.if %11 {
      %c0_10 = arith.constant 0 : index
      %c0_11 = arith.constant 0 : index
      %12 = vector.load %arg8[%c0_10, %c0_11] : memref<512x128xf32, #tpu.memory_space<vmem>>, vector<512x128xf32>
      %c0_12 = arith.constant 0 : index
      %c0_13 = arith.constant 0 : index
      %13 = vector.load %arg5[%c0_12, %c0_13] : memref<1x128xf32, #tpu.memory_space<vmem>>, vector<1x128xf32>
      %14 = vector.broadcast %13 : vector<1x128xf32> to vector<512x128xf32>
      %15 = arith.mulf %12, %14 : vector<512x128xf32>
      %c0_14 = arith.constant 0 : index
      %c0_15 = arith.constant 0 : index
      %16 = vector.load %arg6[%c0_14, %c0_15] : memref<1x128xf32, #tpu.memory_space<vmem>>, vector<1x128xf32>
      %17 = vector.broadcast %16 : vector<1x128xf32> to vector<512x128xf32>
      %18 = arith.addf %15, %17 : vector<512x128xf32>
      %cst_16 = arith.constant 0.000000e+00 : f32
      %19 = vector.broadcast %cst_16 : f32 to vector<512x128xf32>
      %20 = arith.maximumf %18, %19 : vector<512x128xf32>
      %21 = arith.truncf %20 : vector<512x128xf32> to vector<512x128xbf16>
      %c0_17 = arith.constant 0 : index
      %c0_18 = arith.constant 0 : index
      %22 = vector.load %arg7[%c0_17, %c0_18] : memref<512x128xbf16, #tpu.memory_space<vmem>>, vector<512x128xbf16>
      tpu.vector_store %arg7[%c0_17, %c0_18], %21 {strides = array<i32>} : memref<512x128xbf16, #tpu.memory_space<vmem>>, vector<512x128xbf16>,
    } else {
    }
    return
  }
  func.func @transform_0(%arg0: i32, %arg1: i32, %arg2: i32) -> (i32, i32) {
    %c0_i32 = arith.constant 0 : i32
    return %arg0, %arg2 : i32, i32
  }
  func.func @transform_1(%arg0: i32, %arg1: i32, %arg2: i32) -> (i32, i32) {
    %c0_i32 = arith.constant 0 : i32
    return %arg2, %arg1 : i32, i32
  }
  func.func @transform_2(%arg0: i32, %arg1: i32, %arg2: i32) -> (i32, i32) {
    %c0_i32 = arith.constant 0 : i32
    %c0_i32_0 = arith.constant 0 : i32
    return %c0_i32, %arg1 : i32, i32
  }
  func.func @transform_3(%arg0: i32, %arg1: i32, %arg2: i32) -> (i32, i32) {
    %c0_i32 = arith.constant 0 : i32
    %c0_i32_0 = arith.constant 0 : i32
    return %c0_i32, %arg1 : i32, i32
  }
  func.func @transform_4(%arg0: i32, %arg1: i32, %arg2: i32) -> (i32, i32) {
    %c0_i32 = arith.constant 0 : i32
    return %arg0, %arg1 : i32, i32
  }
}

module attributes {stable_mosaic.version = 11 : i64} {
  func.func @_mm_affine_kernel(%arg0: i32, %arg1: i32, %arg2: i32, %arg3: memref<128x128xbf16, #tpu.memory_space<vmem>>, %arg4: memref<128x128xbf16, #tpu.memory_space<vmem>>, %arg5: memref<1x128xf32, #tpu.memory_space<vmem>>, %arg6: memref<1x128xf32, #tpu.memory_space<vmem>>, %arg7: memref<128x128xbf16, #tpu.memory_space<vmem>>, %arg8: memref<128x128xf32, #tpu.memory_space<vmem>>) attributes {dimension_semantics = [#tpu.dimension_semantics<parallel>, #tpu.dimension_semantics<parallel>, #tpu.dimension_semantics<arbitrary>], iteration_bounds = array<i64: 1, 1, 1>, scalar_prefetch = 0 : i64, scratch_operands = 1 : i64, tpu.core_type = #tpu.core_type<tc>, window_params = [{transform_indices = @transform_0, window_bounds = array<i64: 128, 128>}, {transform_indices = @transform_1, window_bounds = array<i64: 128, 128>}, {transform_indices = @transform_2, window_bounds = array<i64: 1, 128>}, {transform_indices = @transform_3, window_bounds = array<i64: 1, 128>}, {transform_indices = @transform_4, window_bounds = array<i64: 128, 128>}]} {
    %c0_i32 = arith.constant 0 : i32
    %0 = arith.cmpi eq, %arg2, %c0_i32 : i32
    %1 = arith.extui %0 : i1 to i32
    %c0_i32_0 = arith.constant 0 : i32
    %2 = arith.cmpi ne, %1, %c0_i32_0 : i32
    scf.if %2 {
      %cst_10 = arith.constant 0.000000e+00 : f32
      %12 = vector.broadcast %cst_10 : f32 to vector<128x128xf32>
      %c0_11 = arith.constant 0 : index
      %c0_12 = arith.constant 0 : index
      %13 = vector.load %arg8[%c0_11, %c0_12] : memref<128x128xf32, #tpu.memory_space<vmem>>, vector<128x128xf32>
      tpu.vector_store %arg8[%c0_11, %c0_12], %12 {strides = array<i32>} : memref<128x128xf32, #tpu.memory_space<vmem>>, vector<128x128xf32>,
    } else {
    }
    %c0 = arith.constant 0 : index
    %c0_1 = arith.constant 0 : index
    %3 = vector.load %arg8[%c0, %c0_1] : memref<128x128xf32, #tpu.memory_space<vmem>>, vector<128x128xf32>
    %c0_2 = arith.constant 0 : index
    %c0_3 = arith.constant 0 : index
    %4 = vector.load %arg3[%c0_2, %c0_3] : memref<128x128xbf16, #tpu.memory_space<vmem>>, vector<128x128xbf16>
    %c0_4 = arith.constant 0 : index
    %c0_5 = arith.constant 0 : index
    %5 = vector.load %arg4[%c0_4, %c0_5] : memref<128x128xbf16, #tpu.memory_space<vmem>>, vector<128x128xbf16>
    %cst = arith.constant dense<0.000000e+00> : vector<128x128xf32>
    %6 = tpu.matmul %4, %5, %cst {dimension_numbers = #tpu.dot_dimension_numbers<[1], [0], [0], [1], [0, 0, 1, 1], [], []>} : vector<128x128xbf16>, vector<128x128xbf16>, vector<128x128xf32> -> vector<128x128xf32>
    %7 = arith.addf %3, %6 : vector<128x128xf32>
    %c0_6 = arith.constant 0 : index
    %c0_7 = arith.constant 0 : index
    %8 = vector.load %arg8[%c0_6, %c0_7] : memref<128x128xf32, #tpu.memory_space<vmem>>, vector<128x128xf32>
    tpu.vector_store %arg8[%c0_6, %c0_7], %7 {strides = array<i32>} : memref<128x128xf32, #tpu.memory_space<vmem>>, vector<128x128xf32>,
    %c0_i32_8 = arith.constant 0 : i32
    %9 = arith.cmpi eq, %arg2, %c0_i32_8 : i32
    %10 = arith.extui %9 : i1 to i32
    %c0_i32_9 = arith.constant 0 : i32
    %11 = arith.cmpi ne, %10, %c0_i32_9 : i32
    scf.if %11 {
      %c0_10 = arith.constant 0 : index
      %c0_11 = arith.constant 0 : index
      %12 = vector.load %arg8[%c0_10, %c0_11] : memref<128x128xf32, #tpu.memory_space<vmem>>, vector<128x128xf32>
      %c0_12 = arith.constant 0 : index
      %c0_13 = arith.constant 0 : index
      %13 = vector.load %arg5[%c0_12, %c0_13] : memref<1x128xf32, #tpu.memory_space<vmem>>, vector<1x128xf32>
      %14 = vector.broadcast %13 : vector<1x128xf32> to vector<128x128xf32>
      %15 = arith.mulf %12, %14 : vector<128x128xf32>
      %c0_14 = arith.constant 0 : index
      %c0_15 = arith.constant 0 : index
      %16 = vector.load %arg6[%c0_14, %c0_15] : memref<1x128xf32, #tpu.memory_space<vmem>>, vector<1x128xf32>
      %17 = vector.broadcast %16 : vector<1x128xf32> to vector<128x128xf32>
      %18 = arith.addf %15, %17 : vector<128x128xf32>
      %cst_16 = arith.constant 0.000000e+00 : f32
      %19 = vector.broadcast %cst_16 : f32 to vector<128x128xf32>
      %20 = arith.maximumf %18, %19 : vector<128x128xf32>
      %21 = arith.truncf %20 : vector<128x128xf32> to vector<128x128xbf16>
      %c0_17 = arith.constant 0 : index
      %c0_18 = arith.constant 0 : index
      %22 = vector.load %arg7[%c0_17, %c0_18] : memref<128x128xbf16, #tpu.memory_space<vmem>>, vector<128x128xbf16>
      tpu.vector_store %arg7[%c0_17, %c0_18], %21 {strides = array<i32>} : memref<128x128xbf16, #tpu.memory_space<vmem>>, vector<128x128xbf16>,
    } else {
    }
    return
  }
  func.func @transform_0(%arg0: i32, %arg1: i32, %arg2: i32) -> (i32, i32) {
    %c0_i32 = arith.constant 0 : i32
    return %arg0, %arg2 : i32, i32
  }
  func.func @transform_1(%arg0: i32, %arg1: i32, %arg2: i32) -> (i32, i32) {
    %c0_i32 = arith.constant 0 : i32
    return %arg2, %arg1 : i32, i32
  }
  func.func @transform_2(%arg0: i32, %arg1: i32, %arg2: i32) -> (i32, i32) {
    %c0_i32 = arith.constant 0 : i32
    %c0_i32_0 = arith.constant 0 : i32
    return %c0_i32, %arg1 : i32, i32
  }
  func.func @transform_3(%arg0: i32, %arg1: i32, %arg2: i32) -> (i32, i32) {
    %c0_i32 = arith.constant 0 : i32
    %c0_i32_0 = arith.constant 0 : i32
    return %c0_i32, %arg1 : i32, i32
  }
  func.func @transform_4(%arg0: i32, %arg1: i32, %arg2: i32) -> (i32, i32) {
    %c0_i32 = arith.constant 0 : i32
    return %arg0, %arg1 : i32, i32
  }
}

module attributes {stable_mosaic.version = 11 : i64} {
  func.func @_mm_affine_kernel(%arg0: i32, %arg1: i32, %arg2: i32, %arg3: memref<128x256xbf16, #tpu.memory_space<vmem>>, %arg4: memref<256x128xbf16, #tpu.memory_space<vmem>>, %arg5: memref<1x128xf32, #tpu.memory_space<vmem>>, %arg6: memref<1x128xf32, #tpu.memory_space<vmem>>, %arg7: memref<128x128xbf16, #tpu.memory_space<vmem>>, %arg8: memref<128x128xf32, #tpu.memory_space<vmem>>) attributes {dimension_semantics = [#tpu.dimension_semantics<parallel>, #tpu.dimension_semantics<parallel>, #tpu.dimension_semantics<arbitrary>], iteration_bounds = array<i64: 1, 1, 1>, scalar_prefetch = 0 : i64, scratch_operands = 1 : i64, tpu.core_type = #tpu.core_type<tc>, window_params = [{transform_indices = @transform_0, window_bounds = array<i64: 128, 256>}, {transform_indices = @transform_1, window_bounds = array<i64: 256, 128>}, {transform_indices = @transform_2, window_bounds = array<i64: 1, 128>}, {transform_indices = @transform_3, window_bounds = array<i64: 1, 128>}, {transform_indices = @transform_4, window_bounds = array<i64: 128, 128>}]} {
    %c0_i32 = arith.constant 0 : i32
    %0 = arith.cmpi eq, %arg2, %c0_i32 : i32
    %1 = arith.extui %0 : i1 to i32
    %c0_i32_0 = arith.constant 0 : i32
    %2 = arith.cmpi ne, %1, %c0_i32_0 : i32
    scf.if %2 {
      %cst_10 = arith.constant 0.000000e+00 : f32
      %12 = vector.broadcast %cst_10 : f32 to vector<128x128xf32>
      %c0_11 = arith.constant 0 : index
      %c0_12 = arith.constant 0 : index
      %13 = vector.load %arg8[%c0_11, %c0_12] : memref<128x128xf32, #tpu.memory_space<vmem>>, vector<128x128xf32>
      tpu.vector_store %arg8[%c0_11, %c0_12], %12 {strides = array<i32>} : memref<128x128xf32, #tpu.memory_space<vmem>>, vector<128x128xf32>,
    } else {
    }
    %c0 = arith.constant 0 : index
    %c0_1 = arith.constant 0 : index
    %3 = vector.load %arg8[%c0, %c0_1] : memref<128x128xf32, #tpu.memory_space<vmem>>, vector<128x128xf32>
    %c0_2 = arith.constant 0 : index
    %c0_3 = arith.constant 0 : index
    %4 = vector.load %arg3[%c0_2, %c0_3] : memref<128x256xbf16, #tpu.memory_space<vmem>>, vector<128x256xbf16>
    %c0_4 = arith.constant 0 : index
    %c0_5 = arith.constant 0 : index
    %5 = vector.load %arg4[%c0_4, %c0_5] : memref<256x128xbf16, #tpu.memory_space<vmem>>, vector<256x128xbf16>
    %cst = arith.constant dense<0.000000e+00> : vector<128x128xf32>
    %6 = tpu.matmul %4, %5, %cst {dimension_numbers = #tpu.dot_dimension_numbers<[1], [0], [0], [1], [0, 0, 1, 1], [], []>} : vector<128x256xbf16>, vector<256x128xbf16>, vector<128x128xf32> -> vector<128x128xf32>
    %7 = arith.addf %3, %6 : vector<128x128xf32>
    %c0_6 = arith.constant 0 : index
    %c0_7 = arith.constant 0 : index
    %8 = vector.load %arg8[%c0_6, %c0_7] : memref<128x128xf32, #tpu.memory_space<vmem>>, vector<128x128xf32>
    tpu.vector_store %arg8[%c0_6, %c0_7], %7 {strides = array<i32>} : memref<128x128xf32, #tpu.memory_space<vmem>>, vector<128x128xf32>,
    %c0_i32_8 = arith.constant 0 : i32
    %9 = arith.cmpi eq, %arg2, %c0_i32_8 : i32
    %10 = arith.extui %9 : i1 to i32
    %c0_i32_9 = arith.constant 0 : i32
    %11 = arith.cmpi ne, %10, %c0_i32_9 : i32
    scf.if %11 {
      %c0_10 = arith.constant 0 : index
      %c0_11 = arith.constant 0 : index
      %12 = vector.load %arg8[%c0_10, %c0_11] : memref<128x128xf32, #tpu.memory_space<vmem>>, vector<128x128xf32>
      %c0_12 = arith.constant 0 : index
      %c0_13 = arith.constant 0 : index
      %13 = vector.load %arg5[%c0_12, %c0_13] : memref<1x128xf32, #tpu.memory_space<vmem>>, vector<1x128xf32>
      %14 = vector.broadcast %13 : vector<1x128xf32> to vector<128x128xf32>
      %15 = arith.mulf %12, %14 : vector<128x128xf32>
      %c0_14 = arith.constant 0 : index
      %c0_15 = arith.constant 0 : index
      %16 = vector.load %arg6[%c0_14, %c0_15] : memref<1x128xf32, #tpu.memory_space<vmem>>, vector<1x128xf32>
      %17 = vector.broadcast %16 : vector<1x128xf32> to vector<128x128xf32>
      %18 = arith.addf %15, %17 : vector<128x128xf32>
      %cst_16 = arith.constant 0.000000e+00 : f32
      %19 = vector.broadcast %cst_16 : f32 to vector<128x128xf32>
      %20 = arith.maximumf %18, %19 : vector<128x128xf32>
      %21 = arith.truncf %20 : vector<128x128xf32> to vector<128x128xbf16>
      %c0_17 = arith.constant 0 : index
      %c0_18 = arith.constant 0 : index
      %22 = vector.load %arg7[%c0_17, %c0_18] : memref<128x128xbf16, #tpu.memory_space<vmem>>, vector<128x128xbf16>
      tpu.vector_store %arg7[%c0_17, %c0_18], %21 {strides = array<i32>} : memref<128x128xbf16, #tpu.memory_space<vmem>>, vector<128x128xbf16>,
    } else {
    }
    return
  }
  func.func @transform_0(%arg0: i32, %arg1: i32, %arg2: i32) -> (i32, i32) {
    %c0_i32 = arith.constant 0 : i32
    return %arg0, %arg2 : i32, i32
  }
  func.func @transform_1(%arg0: i32, %arg1: i32, %arg2: i32) -> (i32, i32) {
    %c0_i32 = arith.constant 0 : i32
    return %arg2, %arg1 : i32, i32
  }
  func.func @transform_2(%arg0: i32, %arg1: i32, %arg2: i32) -> (i32, i32) {
    %c0_i32 = arith.constant 0 : i32
    %c0_i32_0 = arith.constant 0 : i32
    return %c0_i32, %arg1 : i32, i32
  }
  func.func @transform_3(%arg0: i32, %arg1: i32, %arg2: i32) -> (i32, i32) {
    %c0_i32 = arith.constant 0 : i32
    %c0_i32_0 = arith.constant 0 : i32
    return %c0_i32, %arg1 : i32, i32
  }
  func.func @transform_4(%arg0: i32, %arg1: i32, %arg2: i32) -> (i32, i32) {
    %c0_i32 = arith.constant 0 : i32
    return %arg0, %arg1 : i32, i32
  }
}

module attributes {stable_mosaic.version = 11 : i64} {
  func.func @_mm_affine_kernel(%arg0: i32, %arg1: i32, %arg2: i32, %arg3: memref<128x384xbf16, #tpu.memory_space<vmem>>, %arg4: memref<384x128xbf16, #tpu.memory_space<vmem>>, %arg5: memref<1x128xf32, #tpu.memory_space<vmem>>, %arg6: memref<1x128xf32, #tpu.memory_space<vmem>>, %arg7: memref<128x128xbf16, #tpu.memory_space<vmem>>, %arg8: memref<128x128xf32, #tpu.memory_space<vmem>>) attributes {dimension_semantics = [#tpu.dimension_semantics<parallel>, #tpu.dimension_semantics<parallel>, #tpu.dimension_semantics<arbitrary>], iteration_bounds = array<i64: 1, 1, 1>, scalar_prefetch = 0 : i64, scratch_operands = 1 : i64, tpu.core_type = #tpu.core_type<tc>, window_params = [{transform_indices = @transform_0, window_bounds = array<i64: 128, 384>}, {transform_indices = @transform_1, window_bounds = array<i64: 384, 128>}, {transform_indices = @transform_2, window_bounds = array<i64: 1, 128>}, {transform_indices = @transform_3, window_bounds = array<i64: 1, 128>}, {transform_indices = @transform_4, window_bounds = array<i64: 128, 128>}]} {
    %c0_i32 = arith.constant 0 : i32
    %0 = arith.cmpi eq, %arg2, %c0_i32 : i32
    %1 = arith.extui %0 : i1 to i32
    %c0_i32_0 = arith.constant 0 : i32
    %2 = arith.cmpi ne, %1, %c0_i32_0 : i32
    scf.if %2 {
      %cst_10 = arith.constant 0.000000e+00 : f32
      %12 = vector.broadcast %cst_10 : f32 to vector<128x128xf32>
      %c0_11 = arith.constant 0 : index
      %c0_12 = arith.constant 0 : index
      %13 = vector.load %arg8[%c0_11, %c0_12] : memref<128x128xf32, #tpu.memory_space<vmem>>, vector<128x128xf32>
      tpu.vector_store %arg8[%c0_11, %c0_12], %12 {strides = array<i32>} : memref<128x128xf32, #tpu.memory_space<vmem>>, vector<128x128xf32>,
    } else {
    }
    %c0 = arith.constant 0 : index
    %c0_1 = arith.constant 0 : index
    %3 = vector.load %arg8[%c0, %c0_1] : memref<128x128xf32, #tpu.memory_space<vmem>>, vector<128x128xf32>
    %c0_2 = arith.constant 0 : index
    %c0_3 = arith.constant 0 : index
    %4 = vector.load %arg3[%c0_2, %c0_3] : memref<128x384xbf16, #tpu.memory_space<vmem>>, vector<128x384xbf16>
    %c0_4 = arith.constant 0 : index
    %c0_5 = arith.constant 0 : index
    %5 = vector.load %arg4[%c0_4, %c0_5] : memref<384x128xbf16, #tpu.memory_space<vmem>>, vector<384x128xbf16>
    %cst = arith.constant dense<0.000000e+00> : vector<128x128xf32>
    %6 = tpu.matmul %4, %5, %cst {dimension_numbers = #tpu.dot_dimension_numbers<[1], [0], [0], [1], [0, 0, 1, 1], [], []>} : vector<128x384xbf16>, vector<384x128xbf16>, vector<128x128xf32> -> vector<128x128xf32>
    %7 = arith.addf %3, %6 : vector<128x128xf32>
    %c0_6 = arith.constant 0 : index
    %c0_7 = arith.constant 0 : index
    %8 = vector.load %arg8[%c0_6, %c0_7] : memref<128x128xf32, #tpu.memory_space<vmem>>, vector<128x128xf32>
    tpu.vector_store %arg8[%c0_6, %c0_7], %7 {strides = array<i32>} : memref<128x128xf32, #tpu.memory_space<vmem>>, vector<128x128xf32>,
    %c0_i32_8 = arith.constant 0 : i32
    %9 = arith.cmpi eq, %arg2, %c0_i32_8 : i32
    %10 = arith.extui %9 : i1 to i32
    %c0_i32_9 = arith.constant 0 : i32
    %11 = arith.cmpi ne, %10, %c0_i32_9 : i32
    scf.if %11 {
      %c0_10 = arith.constant 0 : index
      %c0_11 = arith.constant 0 : index
      %12 = vector.load %arg8[%c0_10, %c0_11] : memref<128x128xf32, #tpu.memory_space<vmem>>, vector<128x128xf32>
      %c0_12 = arith.constant 0 : index
      %c0_13 = arith.constant 0 : index
      %13 = vector.load %arg5[%c0_12, %c0_13] : memref<1x128xf32, #tpu.memory_space<vmem>>, vector<1x128xf32>
      %14 = vector.broadcast %13 : vector<1x128xf32> to vector<128x128xf32>
      %15 = arith.mulf %12, %14 : vector<128x128xf32>
      %c0_14 = arith.constant 0 : index
      %c0_15 = arith.constant 0 : index
      %16 = vector.load %arg6[%c0_14, %c0_15] : memref<1x128xf32, #tpu.memory_space<vmem>>, vector<1x128xf32>
      %17 = vector.broadcast %16 : vector<1x128xf32> to vector<128x128xf32>
      %18 = arith.addf %15, %17 : vector<128x128xf32>
      %cst_16 = arith.constant 0.000000e+00 : f32
      %19 = vector.broadcast %cst_16 : f32 to vector<128x128xf32>
      %20 = arith.maximumf %18, %19 : vector<128x128xf32>
      %21 = arith.truncf %20 : vector<128x128xf32> to vector<128x128xbf16>
      %c0_17 = arith.constant 0 : index
      %c0_18 = arith.constant 0 : index
      %22 = vector.load %arg7[%c0_17, %c0_18] : memref<128x128xbf16, #tpu.memory_space<vmem>>, vector<128x128xbf16>
      tpu.vector_store %arg7[%c0_17, %c0_18], %21 {strides = array<i32>} : memref<128x128xbf16, #tpu.memory_space<vmem>>, vector<128x128xbf16>,
    } else {
    }
    return
  }
  func.func @transform_0(%arg0: i32, %arg1: i32, %arg2: i32) -> (i32, i32) {
    %c0_i32 = arith.constant 0 : i32
    return %arg0, %arg2 : i32, i32
  }
  func.func @transform_1(%arg0: i32, %arg1: i32, %arg2: i32) -> (i32, i32) {
    %c0_i32 = arith.constant 0 : i32
    return %arg2, %arg1 : i32, i32
  }
  func.func @transform_2(%arg0: i32, %arg1: i32, %arg2: i32) -> (i32, i32) {
    %c0_i32 = arith.constant 0 : i32
    %c0_i32_0 = arith.constant 0 : i32
    return %c0_i32, %arg1 : i32, i32
  }
  func.func @transform_3(%arg0: i32, %arg1: i32, %arg2: i32) -> (i32, i32) {
    %c0_i32 = arith.constant 0 : i32
    %c0_i32_0 = arith.constant 0 : i32
    return %c0_i32, %arg1 : i32, i32
  }
  func.func @transform_4(%arg0: i32, %arg1: i32, %arg2: i32) -> (i32, i32) {
    %c0_i32 = arith.constant 0 : i32
    return %arg0, %arg1 : i32, i32
  }
}

module attributes {stable_mosaic.version = 11 : i64} {
  func.func @_mm_affine_kernel(%arg0: i32, %arg1: i32, %arg2: i32, %arg3: memref<128x128xbf16, #tpu.memory_space<vmem>>, %arg4: memref<128x128xbf16, #tpu.memory_space<vmem>>, %arg5: memref<1x128xf32, #tpu.memory_space<vmem>>, %arg6: memref<1x128xf32, #tpu.memory_space<vmem>>, %arg7: memref<128x128xbf16, #tpu.memory_space<vmem>>, %arg8: memref<128x128xf32, #tpu.memory_space<vmem>>) attributes {dimension_semantics = [#tpu.dimension_semantics<parallel>, #tpu.dimension_semantics<parallel>, #tpu.dimension_semantics<arbitrary>], iteration_bounds = array<i64: 1, 1, 5>, scalar_prefetch = 0 : i64, scratch_operands = 1 : i64, tpu.core_type = #tpu.core_type<tc>, window_params = [{transform_indices = @transform_0, window_bounds = array<i64: 128, 128>}, {transform_indices = @transform_1, window_bounds = array<i64: 128, 128>}, {transform_indices = @transform_2, window_bounds = array<i64: 1, 128>}, {transform_indices = @transform_3, window_bounds = array<i64: 1, 128>}, {transform_indices = @transform_4, window_bounds = array<i64: 128, 128>}]} {
    %c0_i32 = arith.constant 0 : i32
    %0 = arith.cmpi eq, %arg2, %c0_i32 : i32
    %1 = arith.extui %0 : i1 to i32
    %c0_i32_0 = arith.constant 0 : i32
    %2 = arith.cmpi ne, %1, %c0_i32_0 : i32
    scf.if %2 {
      %cst_9 = arith.constant 0.000000e+00 : f32
      %12 = vector.broadcast %cst_9 : f32 to vector<128x128xf32>
      %c0_10 = arith.constant 0 : index
      %c0_11 = arith.constant 0 : index
      %13 = vector.load %arg8[%c0_10, %c0_11] : memref<128x128xf32, #tpu.memory_space<vmem>>, vector<128x128xf32>
      tpu.vector_store %arg8[%c0_10, %c0_11], %12 {strides = array<i32>} : memref<128x128xf32, #tpu.memory_space<vmem>>, vector<128x128xf32>,
    } else {
    }
    %c0 = arith.constant 0 : index
    %c0_1 = arith.constant 0 : index
    %3 = vector.load %arg8[%c0, %c0_1] : memref<128x128xf32, #tpu.memory_space<vmem>>, vector<128x128xf32>
    %c0_2 = arith.constant 0 : index
    %c0_3 = arith.constant 0 : index
    %4 = vector.load %arg3[%c0_2, %c0_3] : memref<128x128xbf16, #tpu.memory_space<vmem>>, vector<128x128xbf16>
    %c0_4 = arith.constant 0 : index
    %c0_5 = arith.constant 0 : index
    %5 = vector.load %arg4[%c0_4, %c0_5] : memref<128x128xbf16, #tpu.memory_space<vmem>>, vector<128x128xbf16>
    %cst = arith.constant dense<0.000000e+00> : vector<128x128xf32>
    %6 = tpu.matmul %4, %5, %cst {dimension_numbers = #tpu.dot_dimension_numbers<[1], [0], [0], [1], [0, 0, 1, 1], [], []>} : vector<128x128xbf16>, vector<128x128xbf16>, vector<128x128xf32> -> vector<128x128xf32>
    %7 = arith.addf %3, %6 : vector<128x128xf32>
    %c0_6 = arith.constant 0 : index
    %c0_7 = arith.constant 0 : index
    %8 = vector.load %arg8[%c0_6, %c0_7] : memref<128x128xf32, #tpu.memory_space<vmem>>, vector<128x128xf32>
    tpu.vector_store %arg8[%c0_6, %c0_7], %7 {strides = array<i32>} : memref<128x128xf32, #tpu.memory_space<vmem>>, vector<128x128xf32>,
    %c4_i32 = arith.constant 4 : i32
    %9 = arith.cmpi eq, %arg2, %c4_i32 : i32
    %10 = arith.extui %9 : i1 to i32
    %c0_i32_8 = arith.constant 0 : i32
    %11 = arith.cmpi ne, %10, %c0_i32_8 : i32
    scf.if %11 {
      %c0_9 = arith.constant 0 : index
      %c0_10 = arith.constant 0 : index
      %12 = vector.load %arg8[%c0_9, %c0_10] : memref<128x128xf32, #tpu.memory_space<vmem>>, vector<128x128xf32>
      %c0_11 = arith.constant 0 : index
      %c0_12 = arith.constant 0 : index
      %13 = vector.load %arg5[%c0_11, %c0_12] : memref<1x128xf32, #tpu.memory_space<vmem>>, vector<1x128xf32>
      %14 = vector.broadcast %13 : vector<1x128xf32> to vector<128x128xf32>
      %15 = arith.mulf %12, %14 : vector<128x128xf32>
      %c0_13 = arith.constant 0 : index
      %c0_14 = arith.constant 0 : index
      %16 = vector.load %arg6[%c0_13, %c0_14] : memref<1x128xf32, #tpu.memory_space<vmem>>, vector<1x128xf32>
      %17 = vector.broadcast %16 : vector<1x128xf32> to vector<128x128xf32>
      %18 = arith.addf %15, %17 : vector<128x128xf32>
      %cst_15 = arith.constant 0.000000e+00 : f32
      %19 = vector.broadcast %cst_15 : f32 to vector<128x128xf32>
      %20 = arith.maximumf %18, %19 : vector<128x128xf32>
      %21 = arith.truncf %20 : vector<128x128xf32> to vector<128x128xbf16>
      %c0_16 = arith.constant 0 : index
      %c0_17 = arith.constant 0 : index
      %22 = vector.load %arg7[%c0_16, %c0_17] : memref<128x128xbf16, #tpu.memory_space<vmem>>, vector<128x128xbf16>
      tpu.vector_store %arg7[%c0_16, %c0_17], %21 {strides = array<i32>} : memref<128x128xbf16, #tpu.memory_space<vmem>>, vector<128x128xbf16>,
    } else {
    }
    return
  }
  func.func @transform_0(%arg0: i32, %arg1: i32, %arg2: i32) -> (i32, i32) {
    %c0_i32 = arith.constant 0 : i32
    return %arg0, %arg2 : i32, i32
  }
  func.func @transform_1(%arg0: i32, %arg1: i32, %arg2: i32) -> (i32, i32) {
    %c0_i32 = arith.constant 0 : i32
    return %arg2, %arg1 : i32, i32
  }
  func.func @transform_2(%arg0: i32, %arg1: i32, %arg2: i32) -> (i32, i32) {
    %c0_i32 = arith.constant 0 : i32
    %c0_i32_0 = arith.constant 0 : i32
    return %c0_i32, %arg1 : i32, i32
  }
  func.func @transform_3(%arg0: i32, %arg1: i32, %arg2: i32) -> (i32, i32) {
    %c0_i32 = arith.constant 0 : i32
    %c0_i32_0 = arith.constant 0 : i32
    return %c0_i32, %arg1 : i32, i32
  }
  func.func @transform_4(%arg0: i32, %arg1: i32, %arg2: i32) -> (i32, i32) {
    %c0_i32 = arith.constant 0 : i32
    return %arg0, %arg1 : i32, i32
  }
}

module attributes {stable_mosaic.version = 11 : i64} {
  func.func @_bilinear_kernel(%arg0: i32, %arg1: memref<64x128xf32, #tpu.memory_space<vmem>>, %arg2: memref<1x128x128xbf16, #tpu.memory_space<vmem>>, %arg3: memref<1x64x128xbf16, #tpu.memory_space<vmem>>) attributes {dimension_semantics = [#tpu.dimension_semantics<parallel>], iteration_bounds = array<i64: 2>, scalar_prefetch = 0 : i64, scratch_operands = 0 : i64, tpu.core_type = #tpu.core_type<tc>, window_params = [{pipeline_mode = #tpu.pipeline_mode<synchronous>, transform_indices = @transform_0, window_bounds = array<i64: 64, 128>}, {transform_indices = @transform_1, window_bounds = array<i64: 1, 128, 128>}, {transform_indices = @transform_2, window_bounds = array<i64: 1, 64, 128>}]} {
    %c0 = arith.constant 0 : index
    %c0_0 = arith.constant 0 : index
    %0 = vector.load %arg1[%c0, %c0_0] : memref<64x128xf32, #tpu.memory_space<vmem>>, vector<64x128xf32>
    %c0_1 = arith.constant 0 : index
    %c0_2 = arith.constant 0 : index
    %c0_3 = arith.constant 0 : index
    %1 = vector.load %arg2[%c0_1, %c0_2, %c0_3] : memref<1x128x128xbf16, #tpu.memory_space<vmem>>, vector<1x128x128xbf16>
    %2 = vector.shape_cast %1 : vector<1x128x128xbf16> to vector<128x128xbf16>
    %3 = arith.extf %2 : vector<128x128xbf16> to vector<128x128xf32>
    %cst = arith.constant dense<0.000000e+00> : vector<64x128xf32>
    %4 = tpu.matmul %0, %3, %cst {dimension_numbers = #tpu.dot_dimension_numbers<[1], [0], [0], [1], [0, 0, 1, 1], [], []>} : vector<64x128xf32>, vector<128x128xf32>, vector<64x128xf32> -> vector<64x128xf32>
    %5 = arith.truncf %4 : vector<64x128xf32> to vector<64x128xbf16>
    %c0_4 = arith.constant 0 : index
    %c0_5 = arith.constant 0 : index
    %c0_6 = arith.constant 0 : index
    %6 = vector.load %arg3[%c0_4, %c0_5, %c0_6] : memref<1x64x128xbf16, #tpu.memory_space<vmem>>, vector<1x64x128xbf16>
    %7 = vector.shape_cast %6 : vector<1x64x128xbf16> to vector<64x128xbf16>
    %8 = vector.shape_cast %5 : vector<64x128xbf16> to vector<1x64x128xbf16>
    tpu.vector_store %arg3[%c0_4, %c0_5, %c0_6], %8 {strides = array<i32>} : memref<1x64x128xbf16, #tpu.memory_space<vmem>>, vector<1x64x128xbf16>,
    return
  }
  func.func @transform_0(%arg0: i32) -> (i32, i32) {
    %c0_i32 = arith.constant 0 : i32
    %c0_i32_0 = arith.constant 0 : i32
    %c0_i32_1 = arith.constant 0 : i32
    return %c0_i32, %c0_i32_0 : i32, i32
  }
  func.func @transform_1(%arg0: i32) -> (i32, i32, i32) {
    %c0_i32 = arith.constant 0 : i32
    %c0_i32_0 = arith.constant 0 : i32
    %c0_i32_1 = arith.constant 0 : i32
    return %arg0, %c0_i32, %c0_i32_0 : i32, i32, i32
  }
  func.func @transform_2(%arg0: i32) -> (i32, i32, i32) {
    %c0_i32 = arith.constant 0 : i32
    %c0_i32_0 = arith.constant 0 : i32
    %c0_i32_1 = arith.constant 0 : i32
    return %arg0, %c0_i32, %c0_i32_0 : i32, i32, i32
  }
}

module attributes {stable_mosaic.version = 11 : i64} {
  func.func @_mm_affine_kernel(%arg0: i32, %arg1: i32, %arg2: i32, %arg3: memref<128x128xbf16, #tpu.memory_space<vmem>>, %arg4: memref<128x128xbf16, #tpu.memory_space<vmem>>, %arg5: memref<1x128xf32, #tpu.memory_space<vmem>>, %arg6: memref<1x128xf32, #tpu.memory_space<vmem>>, %arg7: memref<128x128xf32, #tpu.memory_space<vmem>>, %arg8: memref<128x128xf32, #tpu.memory_space<vmem>>) attributes {dimension_semantics = [#tpu.dimension_semantics<parallel>, #tpu.dimension_semantics<parallel>, #tpu.dimension_semantics<arbitrary>], iteration_bounds = array<i64: 1, 1, 1>, scalar_prefetch = 0 : i64, scratch_operands = 1 : i64, tpu.core_type = #tpu.core_type<tc>, window_params = [{transform_indices = @transform_0, window_bounds = array<i64: 128, 128>}, {transform_indices = @transform_1, window_bounds = array<i64: 128, 128>}, {transform_indices = @transform_2, window_bounds = array<i64: 1, 128>}, {transform_indices = @transform_3, window_bounds = array<i64: 1, 128>}, {transform_indices = @transform_4, window_bounds = array<i64: 128, 128>}]} {
    %c0_i32 = arith.constant 0 : i32
    %0 = arith.cmpi eq, %arg2, %c0_i32 : i32
    %1 = arith.extui %0 : i1 to i32
    %c0_i32_0 = arith.constant 0 : i32
    %2 = arith.cmpi ne, %1, %c0_i32_0 : i32
    scf.if %2 {
      %cst_10 = arith.constant 0.000000e+00 : f32
      %12 = vector.broadcast %cst_10 : f32 to vector<128x128xf32>
      %c0_11 = arith.constant 0 : index
      %c0_12 = arith.constant 0 : index
      %13 = vector.load %arg8[%c0_11, %c0_12] : memref<128x128xf32, #tpu.memory_space<vmem>>, vector<128x128xf32>
      tpu.vector_store %arg8[%c0_11, %c0_12], %12 {strides = array<i32>} : memref<128x128xf32, #tpu.memory_space<vmem>>, vector<128x128xf32>,
    } else {
    }
    %c0 = arith.constant 0 : index
    %c0_1 = arith.constant 0 : index
    %3 = vector.load %arg8[%c0, %c0_1] : memref<128x128xf32, #tpu.memory_space<vmem>>, vector<128x128xf32>
    %c0_2 = arith.constant 0 : index
    %c0_3 = arith.constant 0 : index
    %4 = vector.load %arg3[%c0_2, %c0_3] : memref<128x128xbf16, #tpu.memory_space<vmem>>, vector<128x128xbf16>
    %c0_4 = arith.constant 0 : index
    %c0_5 = arith.constant 0 : index
    %5 = vector.load %arg4[%c0_4, %c0_5] : memref<128x128xbf16, #tpu.memory_space<vmem>>, vector<128x128xbf16>
    %cst = arith.constant dense<0.000000e+00> : vector<128x128xf32>
    %6 = tpu.matmul %4, %5, %cst {dimension_numbers = #tpu.dot_dimension_numbers<[1], [0], [0], [1], [0, 0, 1, 1], [], []>} : vector<128x128xbf16>, vector<128x128xbf16>, vector<128x128xf32> -> vector<128x128xf32>
    %7 = arith.addf %3, %6 : vector<128x128xf32>
    %c0_6 = arith.constant 0 : index
    %c0_7 = arith.constant 0 : index
    %8 = vector.load %arg8[%c0_6, %c0_7] : memref<128x128xf32, #tpu.memory_space<vmem>>, vector<128x128xf32>
    tpu.vector_store %arg8[%c0_6, %c0_7], %7 {strides = array<i32>} : memref<128x128xf32, #tpu.memory_space<vmem>>, vector<128x128xf32>,
    %c0_i32_8 = arith.constant 0 : i32
    %9 = arith.cmpi eq, %arg2, %c0_i32_8 : i32
    %10 = arith.extui %9 : i1 to i32
    %c0_i32_9 = arith.constant 0 : i32
    %11 = arith.cmpi ne, %10, %c0_i32_9 : i32
    scf.if %11 {
      %c0_10 = arith.constant 0 : index
      %c0_11 = arith.constant 0 : index
      %12 = vector.load %arg8[%c0_10, %c0_11] : memref<128x128xf32, #tpu.memory_space<vmem>>, vector<128x128xf32>
      %c0_12 = arith.constant 0 : index
      %c0_13 = arith.constant 0 : index
      %13 = vector.load %arg5[%c0_12, %c0_13] : memref<1x128xf32, #tpu.memory_space<vmem>>, vector<1x128xf32>
      %14 = vector.broadcast %13 : vector<1x128xf32> to vector<128x128xf32>
      %15 = arith.mulf %12, %14 : vector<128x128xf32>
      %c0_14 = arith.constant 0 : index
      %c0_15 = arith.constant 0 : index
      %16 = vector.load %arg6[%c0_14, %c0_15] : memref<1x128xf32, #tpu.memory_space<vmem>>, vector<1x128xf32>
      %17 = vector.broadcast %16 : vector<1x128xf32> to vector<128x128xf32>
      %18 = arith.addf %15, %17 : vector<128x128xf32>
      %c0_16 = arith.constant 0 : index
      %c0_17 = arith.constant 0 : index
      %19 = vector.load %arg7[%c0_16, %c0_17] : memref<128x128xf32, #tpu.memory_space<vmem>>, vector<128x128xf32>
      tpu.vector_store %arg7[%c0_16, %c0_17], %18 {strides = array<i32>} : memref<128x128xf32, #tpu.memory_space<vmem>>, vector<128x128xf32>,
    } else {
    }
    return
  }
  func.func @transform_0(%arg0: i32, %arg1: i32, %arg2: i32) -> (i32, i32) {
    %c0_i32 = arith.constant 0 : i32
    return %arg0, %arg2 : i32, i32
  }
  func.func @transform_1(%arg0: i32, %arg1: i32, %arg2: i32) -> (i32, i32) {
    %c0_i32 = arith.constant 0 : i32
    return %arg2, %arg1 : i32, i32
  }
  func.func @transform_2(%arg0: i32, %arg1: i32, %arg2: i32) -> (i32, i32) {
    %c0_i32 = arith.constant 0 : i32
    %c0_i32_0 = arith.constant 0 : i32
    return %c0_i32, %arg1 : i32, i32
  }
  func.func @transform_3(%arg0: i32, %arg1: i32, %arg2: i32) -> (i32, i32) {
    %c0_i32 = arith.constant 0 : i32
    %c0_i32_0 = arith.constant 0 : i32
    return %c0_i32, %arg1 : i32, i32
  }
  func.func @transform_4(%arg0: i32, %arg1: i32, %arg2: i32) -> (i32, i32) {
    %c0_i32 = arith.constant 0 : i32
    return %arg0, %arg1 : i32, i32
  }
}

module attributes {stable_mosaic.version = 11 : i64} {
  func.func @_bilinear_kernel(%arg0: i32, %arg1: memref<1024x128xf32, #tpu.memory_space<vmem>>, %arg2: memref<1x128x128xf32, #tpu.memory_space<vmem>>, %arg3: memref<1x1024x128xf32, #tpu.memory_space<vmem>>) attributes {dimension_semantics = [#tpu.dimension_semantics<parallel>], iteration_bounds = array<i64: 2>, scalar_prefetch = 0 : i64, scratch_operands = 0 : i64, tpu.core_type = #tpu.core_type<tc>, window_params = [{pipeline_mode = #tpu.pipeline_mode<synchronous>, transform_indices = @transform_0, window_bounds = array<i64: 1024, 128>}, {transform_indices = @transform_1, window_bounds = array<i64: 1, 128, 128>}, {transform_indices = @transform_2, window_bounds = array<i64: 1, 1024, 128>}]} {
    %c0 = arith.constant 0 : index
    %c0_0 = arith.constant 0 : index
    %0 = vector.load %arg1[%c0, %c0_0] : memref<1024x128xf32, #tpu.memory_space<vmem>>, vector<1024x128xf32>
    %c0_1 = arith.constant 0 : index
    %c0_2 = arith.constant 0 : index
    %c0_3 = arith.constant 0 : index
    %1 = vector.load %arg2[%c0_1, %c0_2, %c0_3] : memref<1x128x128xf32, #tpu.memory_space<vmem>>, vector<1x128x128xf32>
    %2 = vector.shape_cast %1 : vector<1x128x128xf32> to vector<128x128xf32>
    %cst = arith.constant dense<0.000000e+00> : vector<1024x128xf32>
    %3 = tpu.matmul %0, %2, %cst {dimension_numbers = #tpu.dot_dimension_numbers<[1], [0], [0], [1], [0, 0, 1, 1], [], []>} : vector<1024x128xf32>, vector<128x128xf32>, vector<1024x128xf32> -> vector<1024x128xf32>
    %c0_4 = arith.constant 0 : index
    %c0_5 = arith.constant 0 : index
    %c0_6 = arith.constant 0 : index
    %4 = vector.load %arg3[%c0_4, %c0_5, %c0_6] : memref<1x1024x128xf32, #tpu.memory_space<vmem>>, vector<1x1024x128xf32>
    %5 = vector.shape_cast %4 : vector<1x1024x128xf32> to vector<1024x128xf32>
    %6 = vector.shape_cast %3 : vector<1024x128xf32> to vector<1x1024x128xf32>
    tpu.vector_store %arg3[%c0_4, %c0_5, %c0_6], %6 {strides = array<i32>} : memref<1x1024x128xf32, #tpu.memory_space<vmem>>, vector<1x1024x128xf32>,
    return
  }
  func.func @transform_0(%arg0: i32) -> (i32, i32) {
    %c0_i32 = arith.constant 0 : i32
    %c0_i32_0 = arith.constant 0 : i32
    %c0_i32_1 = arith.constant 0 : i32
    return %c0_i32, %c0_i32_0 : i32, i32
  }
  func.func @transform_1(%arg0: i32) -> (i32, i32, i32) {
    %c0_i32 = arith.constant 0 : i32
    %c0_i32_0 = arith.constant 0 : i32
    %c0_i32_1 = arith.constant 0 : i32
    return %arg0, %c0_i32, %c0_i32_0 : i32, i32, i32
  }
  func.func @transform_2(%arg0: i32) -> (i32, i32, i32) {
    %c0_i32 = arith.constant 0 : i32
    %c0_i32_0 = arith.constant 0 : i32
    %c0_i32_1 = arith.constant 0 : i32
    return %arg0, %c0_i32, %c0_i32_0 : i32, i32, i32
  }
}

</mosaic_0001>

<bundles_post_ra>
// kernel: deeplab_forward.16
= control target key start
LH: loop header
LB: loop body
LE: loop exit
PB: predicated region body
PF: predicated region fallthrough
CT: control target
= control target key end

     0   :  { %s2400_s1 = inlined_call_operand.vmem [shape: bf16[128,128], index: 1, kind: input, shape index: {}]   ;;  %s2401_s0 = inlined_call_operand.vmem [shape: bf16[512,128], index: 0, kind: input, shape index: {}]   ;;  %s2402_s2 = inlined_call_operand.vmem [shape: f32[1,128], index: 2, kind: input, shape index: {}]   ;;  %s2403_s3 = inlined_call_operand.vmem [shape: f32[1,128], index: 3, kind: input, shape index: {}]   ;;  %s2404_s4 = inlined_call_operand.vmem [shape: bf16[512,128], index: 4, kind: output, shape index: {}]  }
   0x1   :  { %v1981_v0 = vld [vmem:[%s2400_s1] sm:$0xff]   ;;  %v1982_v1 = vld [vmem:[%s2400_s1 + $0x8] sm:$0xff]   ;;  %v1983_v2 = vld [vmem:[%s2400_s1 + $0x10] sm:$0xff]  }
   0x2   :  { %1885 = vmatprep.subr.bf16.mxu0 %v1981_v0  ;;  %1965 = vmatprep.subr.bf16.mxu1 %v1981_v0  ;;  %v1984_v3 = vld [vmem:[%s2400_s1 + $0x18] sm:$0xff]   ;;  %v1989_v4 = vld [vmem:[%s2401_s0] sm:$0xff]   ;;  %v1986_v7 = vld [vmem:[%s2400_s1 + $0x28] sm:$0xff]  }
   0x3   :  { %1886 = vmatpush3.bf16.msra.mxu0 %v1981_v0  ;;  %1973 = vmatpush3.bf16.msra.mxu1 %v1981_v0  ;;  %v1990_v5 = vld [vmem:[%s2401_s0 + $0x80] sm:$0xff]   ;;  %v1987_v8 = vld [vmem:[%s2400_s1 + $0x30] sm:$0xff]   ;;  %v1988_v9 = vld [vmem:[%s2400_s1 + $0x38] sm:$0xff]  }
   0x4   :  { %1887 = vmatprep.subr.bf16.mxu0 %v1982_v1  ;;  %1966 = vmatprep.subr.bf16.mxu1 %v1982_v1  ;;  %v1985_v6 = vld [vmem:[%s2400_s1 + $0x20] sm:$0xff]   ;;  %v1991_v10 = vld [vmem:[%s2401_s0 + $0x8] sm:$0xff]   ;;  %v1993_v12 = vld [vmem:[%s2401_s0 + $0x10] sm:$0xff]  }
   0x5   :  { %1901 = vmatprep.mubr.bf16.mxu0 %v1989_v4  ;;  %1933 = vmatprep.mubr.bf16.mxu1 %v1990_v5  ;;  %v1992_v11 = vld [vmem:[%s2401_s0 + $0x88] sm:$0xff]   ;;  %v1994_v13 = vld [vmem:[%s2401_s0 + $0x90] sm:$0xff]   ;;  %v1995_v14 = vld [vmem:[%s2401_s0 + $0x18] sm:$0xff]  }
   0x6   :  { %v1996_v15 = vld [vmem:[%s2401_s0 + $0x98] sm:$0xff]   ;;  %v1997_v16 = vld [vmem:[%s2401_s0 + $0x20] sm:$0xff]   ;;  %v1999_v18 = vld [vmem:[%s2401_s0 + $0x28] sm:$0xff]  }
   0x7   :  { %1888 = vmatpush3.bf16.msra.mxu0 %v1982_v1  ;;  %1974 = vmatpush3.bf16.msra.mxu1 %v1982_v1  ;;  %v1998_v17 = vld [vmem:[%s2401_s0 + $0xa0] sm:$0xff]   ;;  %v2000_v19 = vld [vmem:[%s2401_s0 + $0xa8] sm:$0xff]   ;;  %v2001_v20 = vld [vmem:[%s2401_s0 + $0x30] sm:$0xff]  }
   0x8   :  { %1889 = vmatprep.subr.bf16.mxu0 %v1983_v2  ;;  %1967 = vmatprep.subr.bf16.mxu1 %v1983_v2  ;;  %v2002_v21 = vld [vmem:[%s2401_s0 + $0xb0] sm:$0xff]   ;;  %v2003_v22 = vld [vmem:[%s2401_s0 + $0x38] sm:$0xff]   ;;  %v2005_v24 = vld [vmem:[%s2401_s0 + $0x40] sm:$0xff]  }
   0x9   :  { %v2004_v23 = vld [vmem:[%s2401_s0 + $0xb8] sm:$0xff]   ;;  %v2006_v25 = vld [vmem:[%s2401_s0 + $0xc0] sm:$0xff]   ;;  %v2007_v26 = vld [vmem:[%s2401_s0 + $0x48] sm:$0xff]  }
   0xa   :  { %v2008_v27 = vld [vmem:[%s2401_s0 + $0xc8] sm:$0xff]   ;;  %v2009_v28 = vld [vmem:[%s2401_s0 + $0x50] sm:$0xff]   ;;  %v2011_v30 = vld [vmem:[%s2401_s0 + $0x58] sm:$0xff]  }
   0xb   :  { %1890 = vmatpush3.bf16.msra.mxu0 %v1983_v2  ;;  %1975 = vmatpush3.bf16.msra.mxu1 %v1983_v2  ;;  %v2010_v29 = vld [vmem:[%s2401_s0 + $0xd0] sm:$0xff]   ;;  %v2012_v31 = vld [vmem:[%s2401_s0 + $0xd8] sm:$0xff]   ;;  %v2013_v32 = vld [vmem:[%s2401_s0 + $0x60] sm:$0xff]  }
   0xc   :  { %1891 = vmatprep.subr.bf16.mxu0 %v1984_v3  ;;  %1968 = vmatprep.subr.bf16.mxu1 %v1984_v3  ;;  %v2014_v33 = vld [vmem:[%s2401_s0 + $0xe0] sm:$0xff]   ;;  %v2015_v34 = vld [vmem:[%s2401_s0 + $0x68] sm:$0xff]   ;;  %v2017_v36 = vld [vmem:[%s2401_s0 + $0x70] sm:$0xff]  }
   0xd   :  { %v2016_v35 = vld [vmem:[%s2401_s0 + $0xe8] sm:$0xff]   ;;  %v2018_v37 = vld [vmem:[%s2401_s0 + $0xf0] sm:$0xff]   ;;  %v2019_v38 = vld [vmem:[%s2401_s0 + $0x78] sm:$0xff]  }
   0xe   :  { %v2020_v39 = vld [vmem:[%s2401_s0 + $0xf8] sm:$0xff]   ;;  %v2169_v40 = vld [vmem:[%s2402_s2] ss:$0 sm:$0xff] }
   0xf   :  { %1892 = vmatpush3.bf16.msra.mxu0 %v1984_v3  ;;  %1976 = vmatpush3.bf16.msra.mxu1 %v1984_v3  ;;  %v2174_v42 = vld [vmem:[%s2403_s3] ss:$0 sm:$0xff] }
  0x10   :  { %1893 = vmatprep.subr.bf16.mxu0 %v1985_v6  ;;  %1969 = vmatprep.subr.bf16.mxu1 %v1985_v6 }
  0x13   :  { %1894 = vmatpush3.bf16.msra.mxu0 %v1985_v6  ;;  %1977 = vmatpush3.bf16.msra.mxu1 %v1985_v6 }
  0x14   :  { %1895 = vmatprep.subr.bf16.mxu0 %v1986_v7  ;;  %1970 = vmatprep.subr.bf16.mxu1 %v1986_v7 }
  0x17   :  { %1896 = vmatpush3.bf16.msra.mxu0 %v1986_v7  ;;  %1978 = vmatpush3.bf16.msra.mxu1 %v1986_v7 }
  0x18   :  { %1897 = vmatprep.subr.bf16.mxu0 %v1987_v8  ;;  %1971 = vmatprep.subr.bf16.mxu1 %v1987_v8 }
  0x1b   :  { %1898 = vmatpush3.bf16.msra.mxu0 %v1987_v8  ;;  %1979 = vmatpush3.bf16.msra.mxu1 %v1987_v8 }
  0x1c   :  { %1899 = vmatprep.subr.bf16.mxu0 %v1988_v9  ;;  %1972 = vmatprep.subr.bf16.mxu1 %v1988_v9 }
  0x1f   :  { %1900 = vmatpush3.bf16.msra.mxu0 %v1988_v9  ;;  %1980 = vmatpush3.bf16.msra.mxu1 %v1988_v9 }
  0x22   :  { %1902 = vmatmul.mubr.bf16.vlgmr.msra.gmra.mrb[0].mxu0 %v1991_v10  ;;  %1934 = vmatmul.mubr.bf16.vlgmr.msra.gmra.mrb[0].mxu1 %v1992_v11 }
  0x23   :  { %1905 = vmatprep.mubr.bf16.mxu0 %v1993_v12  ;;  %1937 = vmatprep.mubr.bf16.mxu1 %v1994_v13 }
  0x2a   :  { %1906 = vmatmul.mubr.bf16.gmra.mrb[4].mxu0 %v1995_v14  ;;  %1938 = vmatmul.mubr.bf16.gmra.mrb[4].mxu1 %v1996_v15 }
  0x2b   :  { %1909 = vmatprep.mubr.bf16.mxu0 %v1997_v16  ;;  %1941 = vmatprep.mubr.bf16.mxu1 %v1998_v17 }
  0x32   :  { %1910 = vmatmul.mubr.bf16.gmra.mrb[8].mxu0 %v1999_v18  ;;  %1942 = vmatmul.mubr.bf16.gmra.mrb[8].mxu1 %v2000_v19 }
  0x33   :  { %1913 = vmatprep.mubr.bf16.mxu0 %v2001_v20  ;;  %1945 = vmatprep.mubr.bf16.mxu1 %v2002_v21 }
  0x3a   :  { %1914 = vmatmul.mubr.bf16.gmra.mrb[12].mxu0 %v2003_v22  ;;  %1946 = vmatmul.mubr.bf16.gmra.mrb[12].mxu1 %v2004_v23 }
  0x3b   :  { %1917 = vmatprep.mubr.bf16.mxu0 %v2005_v24  ;;  %1949 = vmatprep.mubr.bf16.mxu1 %v2006_v25 }
  0x42   :  { %1918 = vmatmul.mubr.bf16.gmra.mrb[16].mxu0 %v2007_v26  ;;  %1950 = vmatmul.mubr.bf16.gmra.mrb[16].mxu1 %v2008_v27 }
  0x43   :  { %1921 = vmatprep.mubr.bf16.mxu0 %v2009_v28  ;;  %1953 = vmatprep.mubr.bf16.mxu1 %v2010_v29 }
  0x4a   :  { %1922 = vmatmul.mubr.bf16.gmra.mrb[20].mxu0 %v2011_v30  ;;  %1954 = vmatmul.mubr.bf16.gmra.mrb[20].mxu1 %v2012_v31 }
  0x4b   :  { %1925 = vmatprep.mubr.bf16.mxu0 %v2013_v32  ;;  %1957 = vmatprep.mubr.bf16.mxu1 %v2014_v33 }
  0x52   :  { %1926 = vmatmul.mubr.bf16.gmra.mrb[24].mxu0 %v2015_v34  ;;  %1958 = vmatmul.mubr.bf16.gmra.mrb[24].mxu1 %v2016_v35 }
  0x53   :  { %1929 = vmatprep.mubr.bf16.mxu0 %v2017_v36  ;;  %1961 = vmatprep.mubr.bf16.mxu1 %v2018_v37 }
  0x5a   :  { %1930 = vmatmul.mubr.bf16.gmra.mrb[28].mxu0 %v2019_v38  ;;  %1962 = vmatmul.mubr.bf16.gmra.mrb[28].mxu1 %v2020_v39 }
  0xf5   :  { %v1903_v41 = vpop.f32.mrb[0].mxu0  ;;  %v1935_v43 = vpop.f32.mrb[0].mxu1 }
  0xf6   :  { %v963_v44 = vmul.f32 %v1903_v41, %v2169_v40  ;;  %v995_v45 = vmul.f32 %v1935_v43, %v2169_v40  ;;  %v504_v46 = vpop.f32.mrb[1].mxu0  ;;  %v632_v47 = vpop.f32.mrb[1].mxu1 }
  0xf7   :  { %v961_v48 = vmul.f32 %v2169_v40, %v504_v46  ;;  %v993_v49 = vmul.f32 %v2169_v40, %v632_v47  ;;  %v1904_v50 = vpop.f32.mrb[2].mxu0  ;;  %v1936_v51 = vpop.f32.mrb[2].mxu1 }
  0xf8   :  { %v1034_v52 = vadd.f32 %v2174_v42, %v963_v44  ;;  %v1066_v53 = vadd.f32 %v2174_v42, %v995_v45  ;;  %v964_v54 = vmul.f32 %v1904_v50, %v2169_v40  ;;  %v996_v55 = vmul.f32 %v1936_v51, %v2169_v40  ;;  %v507_v56 = vpop.f32.mrb[3].mxu0  ;;  %v635_v57 = vpop.f32.mrb[3].mxu1 }
  0xf9   :  { %v1032_v58 = vadd.f32 %v2174_v42, %v961_v48  ;;  %v1064_v59 = vadd.f32 %v2174_v42, %v993_v49  ;;  %v962_v60 = vmul.f32 %v2169_v40, %v507_v56  ;;  %v994_v61 = vmul.f32 %v2169_v40, %v635_v57 }
  0xfa   :  { %v1035_v62 = vadd.f32 %v2174_v42, %v964_v54  ;;  %v1067_v63 = vadd.f32 %v2174_v42, %v996_v55  ;;  %v1098_v2 = vmax.f32 %v1034_v52, 0.0  ;;  %v1130_v3 = vmax.f32 %v1066_v53, 0.0 }
  0xfb   :  { %v1033_v0 = vadd.f32 %v2174_v42, %v962_v60  ;;  %v1065_v1 = vadd.f32 %v2174_v42, %v994_v61  ;;  %v1096_v6 = vmax.f32 %v1032_v58, 0.0  ;;  %v1128_v7 = vmax.f32 %v1064_v59, 0.0 }
  0xfc   :  { %v1099_v4 = vmax.f32 %v1035_v62, 0.0  ;;  %v1131_v5 = vmax.f32 %v1067_v63, 0.0 }
  0xfd   :  { %v1097_v8 = vmax.f32 %v1033_v0, 0.0  ;;  %v1129_v9 = vmax.f32 %v1065_v1, 0.0  ;;  %v1907_v10 = vpop.f32.mrb[4].mxu0  ;;  %v1939_v11 = vpop.f32.mrb[4].mxu1 }
  0xfe   :  { %v1662_v12 = vpack.c.bf16 %v1099_v4, %v1098_v2  ;;  %v1742_v13 = vpack.c.bf16 %v1131_v5, %v1130_v3  ;;  %v967_v14 = vmul.f32 %v1907_v10, %v2169_v40  ;;  %v999_v15 = vmul.f32 %v1939_v11, %v2169_v40  ;;  %v520_v16 = vpop.f32.mrb[5].mxu0  ;;  %v648_v17 = vpop.f32.mrb[5].mxu1 }
  0xff   :  { %v1657_v18 = vpack.c.bf16 %v1097_v8, %v1096_v6  ;;  %v1737_v19 = vpack.c.bf16 %v1129_v9, %v1128_v7  ;;  %v965_v20 = vmul.f32 %v2169_v40, %v520_v16  ;;  %v997_v21 = vmul.f32 %v2169_v40, %v648_v17  ;;  %v1908_v22 = vpop.f32.mrb[6].mxu0  ;;  %v1940_v23 = vpop.f32.mrb[6].mxu1 }
 0x100   :  { %1814 = vst [vmem:[%s2404_s4 + $0x8] sm:$0xff] %v1662_v12   ;;  %1830 = vst [vmem:[%s2404_s4 + $0x88] sm:$0xff] %v1742_v13   ;;  %v1038_v24 = vadd.f32 %v2174_v42, %v967_v14  ;;  %v1070_v25 = vadd.f32 %v2174_v42, %v999_v15  ;;  %v968_v26 = vmul.f32 %v1908_v22, %v2169_v40  ;;  %v523_v28 = vpop.f32.mrb[7].mxu0  ;;  %v651_v29 = vpop.f32.mrb[7].mxu1 }
 0x101   :  { %v1000_v27 = vmul.f32 %v1940_v23, %v2169_v40  ;;  %1658 = vst [vmem:[%s2404_s4] sm:$0xff] %v1657_v18   ;;  %1829 = vst [vmem:[%s2404_s4 + $0x80] sm:$0xff] %v1737_v19   ;;  %v1036_v30 = vadd.f32 %v2174_v42, %v965_v20  ;;  %v1068_v31 = vadd.f32 %v2174_v42, %v997_v21 }
 0x102   :  { %v966_v32 = vmul.f32 %v2169_v40, %v523_v28  ;;  %v998_v33 = vmul.f32 %v2169_v40, %v651_v29  ;;  %v1039_v34 = vadd.f32 %v2174_v42, %v968_v26  ;;  %v1102_v38 = vmax.f32 %v1038_v24, 0.0 }
 0x103   :  { %v1071_v35 = vadd.f32 %v2174_v42, %v1000_v27  ;;  %v1134_v39 = vmax.f32 %v1070_v25, 0.0  ;;  %v1100_v44 = vmax.f32 %v1036_v30, 0.0  ;;  %v1132_v45 = vmax.f32 %v1068_v31, 0.0 }
 0x104   :  { %v1037_v36 = vadd.f32 %v2174_v42, %v966_v32  ;;  %v1069_v37 = vadd.f32 %v2174_v42, %v998_v33  ;;  %v1103_v41 = vmax.f32 %v1039_v34, 0.0 }
 0x105   :  { %v1135_v43 = vmax.f32 %v1071_v35, 0.0  ;;  %v1911_v48 = vpop.f32.mrb[8].mxu0  ;;  %v1943_v49 = vpop.f32.mrb[8].mxu1 }
 0x106   :  { %v1101_v46 = vmax.f32 %v1037_v36, 0.0  ;;  %v1133_v47 = vmax.f32 %v1069_v37, 0.0  ;;  %v1672_v50 = vpack.c.bf16 %v1103_v41, %v1102_v38  ;;  %v971_v52 = vmul.f32 %v1911_v48, %v2169_v40  ;;  %v536_v54 = vpop.f32.mrb[9].mxu0  ;;  %v664_v55 = vpop.f32.mrb[9].mxu1 }
 0x107   :  { %v1752_v51 = vpack.c.bf16 %v1135_v43, %v1134_v39  ;;  %v1003_v53 = vmul.f32 %v1943_v49, %v2169_v40  ;;  %v969_v58 = vmul.f32 %v2169_v40, %v536_v54  ;;  %v1001_v59 = vmul.f32 %v2169_v40, %v664_v55  ;;  %v1912_v60 = vpop.f32.mrb[10].mxu0  ;;  %v1944_v61 = vpop.f32.mrb[10].mxu1 }
 0x108   :  { %v1667_v56 = vpack.c.bf16 %v1101_v46, %v1100_v44  ;;  %v1747_v57 = vpack.c.bf16 %v1133_v47, %v1132_v45  ;;  %1816 = vst [vmem:[%s2404_s4 + $0x18] sm:$0xff] %v1672_v50   ;;  %v1042_v62 = vadd.f32 %v2174_v42, %v971_v52  ;;  %v972_v0 = vmul.f32 %v1912_v60, %v2169_v40  ;;  %v539_v2 = vpop.f32.mrb[11].mxu0  ;;  %v667_v3 = vpop.f32.mrb[11].mxu1 }
 0x109   :  { %1832 = vst [vmem:[%s2404_s4 + $0x98] sm:$0xff] %v1752_v51   ;;  %v1074_v63 = vadd.f32 %v2174_v42, %v1003_v53  ;;  %v1004_v1 = vmul.f32 %v1944_v61, %v2169_v40  ;;  %v1040_v4 = vadd.f32 %v2174_v42, %v969_v58  ;;  %v1072_v5 = vadd.f32 %v2174_v42, %v1001_v59 }
 0x10a   :  { %1815 = vst [vmem:[%s2404_s4 + $0x10] sm:$0xff] %v1667_v56   ;;  %1831 = vst [vmem:[%s2404_s4 + $0x90] sm:$0xff] %v1747_v57   ;;  %v970_v6 = vmul.f32 %v2169_v40, %v539_v2  ;;  %v1002_v7 = vmul.f32 %v2169_v40, %v667_v3  ;;  %v1043_v8 = vadd.f32 %v2174_v42, %v972_v0  ;;  %v1106_v12 = vmax.f32 %v1042_v62, 0.0 }
 0x10b   :  { %v1075_v9 = vadd.f32 %v2174_v42, %v1004_v1  ;;  %v1138_v13 = vmax.f32 %v1074_v63, 0.0  ;;  %v1104_v16 = vmax.f32 %v1040_v4, 0.0  ;;  %v1136_v17 = vmax.f32 %v1072_v5, 0.0 }
 0x10c   :  { %v1041_v10 = vadd.f32 %v2174_v42, %v970_v6  ;;  %v1073_v11 = vadd.f32 %v2174_v42, %v1002_v7  ;;  %v1107_v14 = vmax.f32 %v1043_v8, 0.0 }
 0x10d   :  { %v1139_v15 = vmax.f32 %v1075_v9, 0.0  ;;  %v1915_v20 = vpop.f32.mrb[12].mxu0  ;;  %v1947_v21 = vpop.f32.mrb[12].mxu1 }
 0x10e   :  { %v1105_v18 = vmax.f32 %v1041_v10, 0.0  ;;  %v1137_v19 = vmax.f32 %v1073_v11, 0.0  ;;  %v1682_v22 = vpack.c.bf16 %v1107_v14, %v1106_v12  ;;  %v975_v24 = vmul.f32 %v1915_v20, %v2169_v40  ;;  %v552_v26 = vpop.f32.mrb[13].mxu0  ;;  %v680_v27 = vpop.f32.mrb[13].mxu1 }
 0x10f   :  { %v1762_v23 = vpack.c.bf16 %v1139_v15, %v1138_v13  ;;  %v1007_v25 = vmul.f32 %v1947_v21, %v2169_v40  ;;  %v973_v30 = vmul.f32 %v2169_v40, %v552_v26  ;;  %v1005_v31 = vmul.f32 %v2169_v40, %v680_v27  ;;  %v1916_v32 = vpop.f32.mrb[14].mxu0  ;;  %v1948_v33 = vpop.f32.mrb[14].mxu1 }
 0x110   :  { %v1677_v28 = vpack.c.bf16 %v1105_v18, %v1104_v16  ;;  %v1757_v29 = vpack.c.bf16 %v1137_v19, %v1136_v17  ;;  %1818 = vst [vmem:[%s2404_s4 + $0x28] sm:$0xff] %v1682_v22   ;;  %v1046_v34 = vadd.f32 %v2174_v42, %v975_v24  ;;  %v976_v36 = vmul.f32 %v1916_v32, %v2169_v40  ;;  %v555_v38 = vpop.f32.mrb[15].mxu0  ;;  %v683_v39 = vpop.f32.mrb[15].mxu1 }
 0x111   :  { %1834 = vst [vmem:[%s2404_s4 + $0xa8] sm:$0xff] %v1762_v23   ;;  %v1078_v35 = vadd.f32 %v2174_v42, %v1007_v25  ;;  %v1008_v37 = vmul.f32 %v1948_v33, %v2169_v40  ;;  %v1044_v41 = vadd.f32 %v2174_v42, %v973_v30  ;;  %v1076_v43 = vadd.f32 %v2174_v42, %v1005_v31 }
 0x112   :  { %1817 = vst [vmem:[%s2404_s4 + $0x20] sm:$0xff] %v1677_v28   ;;  %1833 = vst [vmem:[%s2404_s4 + $0xa0] sm:$0xff] %v1757_v29   ;;  %v974_v44 = vmul.f32 %v2169_v40, %v555_v38  ;;  %v1006_v45 = vmul.f32 %v2169_v40, %v683_v39  ;;  %v1047_v46 = vadd.f32 %v2174_v42, %v976_v36  ;;  %v1110_v50 = vmax.f32 %v1046_v34, 0.0 }
 0x113   :  { %v1079_v47 = vadd.f32 %v2174_v42, %v1008_v37  ;;  %v1142_v51 = vmax.f32 %v1078_v35, 0.0  ;;  %v1108_v54 = vmax.f32 %v1044_v41, 0.0  ;;  %v1140_v55 = vmax.f32 %v1076_v43, 0.0 }
 0x114   :  { %v1045_v48 = vadd.f32 %v2174_v42, %v974_v44  ;;  %v1077_v49 = vadd.f32 %v2174_v42, %v1006_v45  ;;  %v1111_v52 = vmax.f32 %v1047_v46, 0.0 }
 0x115   :  { %v1143_v53 = vmax.f32 %v1079_v47, 0.0  ;;  %v1919_v58 = vpop.f32.mrb[16].mxu0  ;;  %v1951_v59 = vpop.f32.mrb[16].mxu1 }
 0x116   :  { %v1109_v56 = vmax.f32 %v1045_v48, 0.0  ;;  %v1141_v57 = vmax.f32 %v1077_v49, 0.0  ;;  %v1692_v60 = vpack.c.bf16 %v1111_v52, %v1110_v50  ;;  %v979_v62 = vmul.f32 %v1919_v58, %v2169_v40  ;;  %v568_v0 = vpop.f32.mrb[17].mxu0  ;;  %v696_v1 = vpop.f32.mrb[17].mxu1 }
 0x117   :  { %v1772_v61 = vpack.c.bf16 %v1143_v53, %v1142_v51  ;;  %v1011_v63 = vmul.f32 %v1951_v59, %v2169_v40  ;;  %v977_v4 = vmul.f32 %v2169_v40, %v568_v0  ;;  %v1009_v5 = vmul.f32 %v2169_v40, %v696_v1  ;;  %v1920_v6 = vpop.f32.mrb[18].mxu0  ;;  %v1952_v7 = vpop.f32.mrb[18].mxu1 }
 0x118   :  { %v1687_v2 = vpack.c.bf16 %v1109_v56, %v1108_v54  ;;  %v1767_v3 = vpack.c.bf16 %v1141_v57, %v1140_v55  ;;  %1820 = vst [vmem:[%s2404_s4 + $0x38] sm:$0xff] %v1692_v60   ;;  %v1050_v8 = vadd.f32 %v2174_v42, %v979_v62  ;;  %v980_v10 = vmul.f32 %v1920_v6, %v2169_v40  ;;  %v571_v12 = vpop.f32.mrb[19].mxu0  ;;  %v699_v13 = vpop.f32.mrb[19].mxu1 }
 0x119   :  { %1836 = vst [vmem:[%s2404_s4 + $0xb8] sm:$0xff] %v1772_v61   ;;  %v1082_v9 = vadd.f32 %v2174_v42, %v1011_v63  ;;  %v1012_v11 = vmul.f32 %v1952_v7, %v2169_v40  ;;  %v1048_v14 = vadd.f32 %v2174_v42, %v977_v4  ;;  %v1080_v15 = vadd.f32 %v2174_v42, %v1009_v5 }
 0x11a   :  { %1819 = vst [vmem:[%s2404_s4 + $0x30] sm:$0xff] %v1687_v2   ;;  %1835 = vst [vmem:[%s2404_s4 + $0xb0] sm:$0xff] %v1767_v3   ;;  %v978_v16 = vmul.f32 %v2169_v40, %v571_v12  ;;  %v1010_v17 = vmul.f32 %v2169_v40, %v699_v13  ;;  %v1051_v18 = vadd.f32 %v2174_v42, %v980_v10  ;;  %v1114_v22 = vmax.f32 %v1050_v8, 0.0 }
 0x11b   :  { %v1083_v19 = vadd.f32 %v2174_v42, %v1012_v11  ;;  %v1146_v23 = vmax.f32 %v1082_v9, 0.0  ;;  %v1112_v26 = vmax.f32 %v1048_v14, 0.0  ;;  %v1144_v27 = vmax.f32 %v1080_v15, 0.0 }
 0x11c   :  { %v1049_v20 = vadd.f32 %v2174_v42, %v978_v16  ;;  %v1081_v21 = vadd.f32 %v2174_v42, %v1010_v17  ;;  %v1115_v24 = vmax.f32 %v1051_v18, 0.0 }
 0x11d   :  { %v1147_v25 = vmax.f32 %v1083_v19, 0.0  ;;  %v1923_v30 = vpop.f32.mrb[20].mxu0  ;;  %v1955_v31 = vpop.f32.mrb[20].mxu1 }
 0x11e   :  { %v1113_v28 = vmax.f32 %v1049_v20, 0.0  ;;  %v1145_v29 = vmax.f32 %v1081_v21, 0.0  ;;  %v1702_v32 = vpack.c.bf16 %v1115_v24, %v1114_v22  ;;  %v983_v34 = vmul.f32 %v1923_v30, %v2169_v40  ;;  %v584_v36 = vpop.f32.mrb[21].mxu0  ;;  %v712_v37 = vpop.f32.mrb[21].mxu1 }
 0x11f   :  { %v1782_v33 = vpack.c.bf16 %v1147_v25, %v1146_v23  ;;  %v1015_v35 = vmul.f32 %v1955_v31, %v2169_v40  ;;  %v981_v41 = vmul.f32 %v2169_v40, %v584_v36  ;;  %v1013_v43 = vmul.f32 %v2169_v40, %v712_v37  ;;  %v1924_v44 = vpop.f32.mrb[22].mxu0  ;;  %v1956_v45 = vpop.f32.mrb[22].mxu1 }
 0x120   :  { %v1697_v38 = vpack.c.bf16 %v1113_v28, %v1112_v26  ;;  %v1777_v39 = vpack.c.bf16 %v1145_v29, %v1144_v27  ;;  %1822 = vst [vmem:[%s2404_s4 + $0x48] sm:$0xff] %v1702_v32   ;;  %v1054_v46 = vadd.f32 %v2174_v42, %v983_v34  ;;  %v984_v48 = vmul.f32 %v1924_v44, %v2169_v40  ;;  %v587_v50 = vpop.f32.mrb[23].mxu0  ;;  %v715_v51 = vpop.f32.mrb[23].mxu1 }
 0x121   :  { %1838 = vst [vmem:[%s2404_s4 + $0xc8] sm:$0xff] %v1782_v33   ;;  %v1086_v47 = vadd.f32 %v2174_v42, %v1015_v35  ;;  %v1016_v49 = vmul.f32 %v1956_v45, %v2169_v40  ;;  %v1052_v52 = vadd.f32 %v2174_v42, %v981_v41  ;;  %v1084_v53 = vadd.f32 %v2174_v42, %v1013_v43 }
 0x122   :  { %1821 = vst [vmem:[%s2404_s4 + $0x40] sm:$0xff] %v1697_v38   ;;  %1837 = vst [vmem:[%s2404_s4 + $0xc0] sm:$0xff] %v1777_v39   ;;  %v982_v54 = vmul.f32 %v2169_v40, %v587_v50  ;;  %v1014_v55 = vmul.f32 %v2169_v40, %v715_v51  ;;  %v1055_v56 = vadd.f32 %v2174_v42, %v984_v48  ;;  %v1118_v60 = vmax.f32 %v1054_v46, 0.0 }
 0x123   :  { %v1087_v57 = vadd.f32 %v2174_v42, %v1016_v49  ;;  %v1150_v61 = vmax.f32 %v1086_v47, 0.0  ;;  %v1116_v0 = vmax.f32 %v1052_v52, 0.0  ;;  %v1148_v1 = vmax.f32 %v1084_v53, 0.0 }
 0x124   :  { %v1053_v58 = vadd.f32 %v2174_v42, %v982_v54  ;;  %v1085_v59 = vadd.f32 %v2174_v42, %v1014_v55  ;;  %v1119_v62 = vmax.f32 %v1055_v56, 0.0 }
 0x125   :  { %v1151_v63 = vmax.f32 %v1087_v57, 0.0  ;;  %v1927_v4 = vpop.f32.mrb[24].mxu0  ;;  %v1959_v5 = vpop.f32.mrb[24].mxu1 }
 0x126   :  { %v1117_v2 = vmax.f32 %v1053_v58, 0.0  ;;  %v1149_v3 = vmax.f32 %v1085_v59, 0.0  ;;  %v1712_v6 = vpack.c.bf16 %v1119_v62, %v1118_v60  ;;  %v987_v8 = vmul.f32 %v1927_v4, %v2169_v40  ;;  %v600_v10 = vpop.f32.mrb[25].mxu0  ;;  %v728_v11 = vpop.f32.mrb[25].mxu1 }
 0x127   :  { %v1792_v7 = vpack.c.bf16 %v1151_v63, %v1150_v61  ;;  %v1019_v9 = vmul.f32 %v1959_v5, %v2169_v40  ;;  %v985_v14 = vmul.f32 %v2169_v40, %v600_v10  ;;  %v1017_v15 = vmul.f32 %v2169_v40, %v728_v11  ;;  %v1928_v16 = vpop.f32.mrb[26].mxu0  ;;  %v1960_v17 = vpop.f32.mrb[26].mxu1 }
 0x128   :  { %v1707_v12 = vpack.c.bf16 %v1117_v2, %v1116_v0  ;;  %v1787_v13 = vpack.c.bf16 %v1149_v3, %v1148_v1  ;;  %1824 = vst [vmem:[%s2404_s4 + $0x58] sm:$0xff] %v1712_v6   ;;  %v1058_v18 = vadd.f32 %v2174_v42, %v987_v8  ;;  %v988_v20 = vmul.f32 %v1928_v16, %v2169_v40  ;;  %v603_v22 = vpop.f32.mrb[27].mxu0  ;;  %v731_v23 = vpop.f32.mrb[27].mxu1 }
 0x129   :  { %1840 = vst [vmem:[%s2404_s4 + $0xd8] sm:$0xff] %v1792_v7   ;;  %v1090_v19 = vadd.f32 %v2174_v42, %v1019_v9  ;;  %v1020_v21 = vmul.f32 %v1960_v17, %v2169_v40  ;;  %v1056_v24 = vadd.f32 %v2174_v42, %v985_v14  ;;  %v1088_v25 = vadd.f32 %v2174_v42, %v1017_v15 }
 0x12a   :  { %1823 = vst [vmem:[%s2404_s4 + $0x50] sm:$0xff] %v1707_v12   ;;  %1839 = vst [vmem:[%s2404_s4 + $0xd0] sm:$0xff] %v1787_v13   ;;  %v986_v26 = vmul.f32 %v2169_v40, %v603_v22  ;;  %v1018_v27 = vmul.f32 %v2169_v40, %v731_v23  ;;  %v1059_v28 = vadd.f32 %v2174_v42, %v988_v20  ;;  %v1122_v32 = vmax.f32 %v1058_v18, 0.0 }
 0x12b   :  { %v1091_v29 = vadd.f32 %v2174_v42, %v1020_v21  ;;  %v1154_v33 = vmax.f32 %v1090_v19, 0.0  ;;  %v1120_v36 = vmax.f32 %v1056_v24, 0.0  ;;  %v1152_v37 = vmax.f32 %v1088_v25, 0.0 }
 0x12c   :  { %v1057_v30 = vadd.f32 %v2174_v42, %v986_v26  ;;  %v1089_v31 = vadd.f32 %v2174_v42, %v1018_v27  ;;  %v1123_v34 = vmax.f32 %v1059_v28, 0.0 }
 0x12d   :  { %v1155_v35 = vmax.f32 %v1091_v29, 0.0  ;;  %v1931_v41 = vpop.f32.mrb[28].mxu0  ;;  %v1963_v43 = vpop.f32.mrb[28].mxu1 }
 0x12e   :  { %v1121_v38 = vmax.f32 %v1057_v30, 0.0  ;;  %v1153_v39 = vmax.f32 %v1089_v31, 0.0  ;;  %v1722_v44 = vpack.c.bf16 %v1123_v34, %v1122_v32  ;;  %v991_v46 = vmul.f32 %v1931_v41, %v2169_v40  ;;  %v616_v48 = vpop.f32.mrb[29].mxu0  ;;  %v744_v49 = vpop.f32.mrb[29].mxu1 }
 0x12f   :  { %v1802_v45 = vpack.c.bf16 %v1155_v35, %v1154_v33  ;;  %v1023_v47 = vmul.f32 %v1963_v43, %v2169_v40  ;;  %v989_v52 = vmul.f32 %v2169_v40, %v616_v48  ;;  %v1021_v53 = vmul.f32 %v2169_v40, %v744_v49  ;;  %v1932_v54 = vpop.f32.mrb[30].mxu0  ;;  %v1964_v55 = vpop.f32.mrb[30].mxu1 }
 0x130   :  { %v1717_v50 = vpack.c.bf16 %v1121_v38, %v1120_v36  ;;  %v1797_v51 = vpack.c.bf16 %v1153_v39, %v1152_v37  ;;  %1826 = vst [vmem:[%s2404_s4 + $0x68] sm:$0xff] %v1722_v44   ;;  %v1062_v56 = vadd.f32 %v2174_v42, %v991_v46  ;;  %v992_v58 = vmul.f32 %v1932_v54, %v2169_v40  ;;  %v619_v60 = vpop.f32.mrb[31].mxu0  ;;  %v747_v61 = vpop.f32.mrb[31].mxu1 }
 0x131   :  { %1842 = vst [vmem:[%s2404_s4 + $0xe8] sm:$0xff] %v1802_v45   ;;  %v1094_v57 = vadd.f32 %v2174_v42, %v1023_v47  ;;  %v1024_v59 = vmul.f32 %v1964_v55, %v2169_v40  ;;  %v1060_v62 = vadd.f32 %v2174_v42, %v989_v52  ;;  %v1092_v63 = vadd.f32 %v2174_v42, %v1021_v53 }
 0x132   :  { %1825 = vst [vmem:[%s2404_s4 + $0x60] sm:$0xff] %v1717_v50   ;;  %1841 = vst [vmem:[%s2404_s4 + $0xe0] sm:$0xff] %v1797_v51   ;;  %v990_v0 = vmul.f32 %v2169_v40, %v619_v60  ;;  %v1022_v1 = vmul.f32 %v2169_v40, %v747_v61  ;;  %v1063_v2 = vadd.f32 %v2174_v42, %v992_v58  ;;  %v1126_v6 = vmax.f32 %v1062_v56, 0.0 }
 0x133   :  { %v1095_v3 = vadd.f32 %v2174_v42, %v1024_v59  ;;  %v1158_v7 = vmax.f32 %v1094_v57, 0.0  ;;  %v1124_v10 = vmax.f32 %v1060_v62, 0.0  ;;  %v1156_v11 = vmax.f32 %v1092_v63, 0.0 }
 0x134   :  { %v1061_v4 = vadd.f32 %v2174_v42, %v990_v0  ;;  %v1093_v5 = vadd.f32 %v2174_v42, %v1022_v1  ;;  %v1127_v8 = vmax.f32 %v1063_v2, 0.0 }
 0x135   :  { %v1159_v9 = vmax.f32 %v1095_v3, 0.0 }
 0x136   :  { %v1125_v12 = vmax.f32 %v1061_v4, 0.0  ;;  %v1157_v13 = vmax.f32 %v1093_v5, 0.0  ;;  %v1732_v14 = vpack.c.bf16 %v1127_v8, %v1126_v6 }
 0x137   :  { %v1812_v15 = vpack.c.bf16 %v1159_v9, %v1158_v7 }
 0x138   :  { %v1727_v16 = vpack.c.bf16 %v1125_v12, %v1124_v10  ;;  %v1807_v40 = vpack.c.bf16 %v1157_v13, %v1156_v11  ;;  %1828 = vst [vmem:[%s2404_s4 + $0x78] sm:$0xff] %v1732_v14  }
 0x139   :  { %1844 = vst [vmem:[%s2404_s4 + $0xf8] sm:$0xff] %v1812_v15  }
 0x13a   :  { %1827 = vst [vmem:[%s2404_s4 + $0x70] sm:$0xff] %v1727_v16   ;;  %1843 = vst [vmem:[%s2404_s4 + $0xf0] sm:$0xff] %v1807_v40  }

// kernel: deeplab_forward.17
= control target key start
LH: loop header
LB: loop body
LE: loop exit
PB: predicated region body
PF: predicated region fallthrough
CT: control target
= control target key end

     0   :  { %s774_s1 = inlined_call_operand.vmem [shape: bf16[128,128], index: 1, kind: input, shape index: {}]   ;;  %s775_s0 = inlined_call_operand.vmem [shape: bf16[128,128], index: 0, kind: input, shape index: {}]   ;;  %s776_s2 = inlined_call_operand.vmem [shape: f32[1,128], index: 2, kind: input, shape index: {}]   ;;  %s777_s3 = inlined_call_operand.vmem [shape: f32[1,128], index: 3, kind: input, shape index: {}]   ;;  %s778_s4 = inlined_call_operand.vmem [shape: bf16[128,128], index: 4, kind: output, shape index: {}]  }
   0x1   :  { %v637_v0 = vld [vmem:[%s774_s1] sm:$0xff]   ;;  %v638_v1 = vld [vmem:[%s774_s1 + $0x8] sm:$0xff]   ;;  %v639_v2 = vld [vmem:[%s774_s1 + $0x10] sm:$0xff]  }
   0x2   :  { %589 = vmatprep.subr.bf16.mxu0 %v637_v0  ;;  %621 = vmatprep.subr.bf16.mxu1 %v637_v0  ;;  %v640_v3 = vld [vmem:[%s774_s1 + $0x18] sm:$0xff]   ;;  %v645_v4 = vld [vmem:[%s775_s0] sm:$0xff]   ;;  %v642_v7 = vld [vmem:[%s774_s1 + $0x28] sm:$0xff]  }
   0x3   :  { %590 = vmatpush3.bf16.msra.mxu0 %v637_v0  ;;  %629 = vmatpush3.bf16.msra.mxu1 %v637_v0  ;;  %v646_v5 = vld [vmem:[%s775_s0 + $0x20] sm:$0xff]   ;;  %v643_v8 = vld [vmem:[%s774_s1 + $0x30] sm:$0xff]   ;;  %v644_v9 = vld [vmem:[%s774_s1 + $0x38] sm:$0xff]  }
   0x4   :  { %591 = vmatprep.subr.bf16.mxu0 %v638_v1  ;;  %622 = vmatprep.subr.bf16.mxu1 %v638_v1  ;;  %v641_v6 = vld [vmem:[%s774_s1 + $0x20] sm:$0xff]   ;;  %v647_v10 = vld [vmem:[%s775_s0 + $0x8] sm:$0xff]   ;;  %v649_v12 = vld [vmem:[%s775_s0 + $0x10] sm:$0xff]  }
   0x5   :  { %605 = vmatprep.mubr.bf16.mxu0 %v645_v4  ;;  %613 = vmatprep.mubr.bf16.mxu1 %v646_v5  ;;  %v648_v11 = vld [vmem:[%s775_s0 + $0x28] sm:$0xff]   ;;  %v650_v13 = vld [vmem:[%s775_s0 + $0x30] sm:$0xff]   ;;  %v651_v14 = vld [vmem:[%s775_s0 + $0x18] sm:$0xff]  }
   0x6   :  { %v652_v15 = vld [vmem:[%s775_s0 + $0x38] sm:$0xff]   ;;  %v492_v16 = vld [vmem:[%s776_s2] ss:$0 sm:$0xff] }
   0x7   :  { %592 = vmatpush3.bf16.msra.mxu0 %v638_v1  ;;  %630 = vmatpush3.bf16.msra.mxu1 %v638_v1  ;;  %v732_v18 = vld [vmem:[%s777_s3] ss:$0 sm:$0xff] }
   0x8   :  { %593 = vmatprep.subr.bf16.mxu0 %v639_v2  ;;  %623 = vmatprep.subr.bf16.mxu1 %v639_v2 }
   0xb   :  { %594 = vmatpush3.bf16.msra.mxu0 %v639_v2  ;;  %631 = vmatpush3.bf16.msra.mxu1 %v639_v2 }
   0xc   :  { %595 = vmatprep.subr.bf16.mxu0 %v640_v3  ;;  %624 = vmatprep.subr.bf16.mxu1 %v640_v3 }
   0xf   :  { %596 = vmatpush3.bf16.msra.mxu0 %v640_v3  ;;  %632 = vmatpush3.bf16.msra.mxu1 %v640_v3 }
  0x10   :  { %597 = vmatprep.subr.bf16.mxu0 %v641_v6  ;;  %625 = vmatprep.subr.bf16.mxu1 %v641_v6 }
  0x13   :  { %598 = vmatpush3.bf16.msra.mxu0 %v641_v6  ;;  %633 = vmatpush3.bf16.msra.mxu1 %v641_v6 }
  0x14   :  { %599 = vmatprep.subr.bf16.mxu0 %v642_v7  ;;  %626 = vmatprep.subr.bf16.mxu1 %v642_v7 }
  0x17   :  { %600 = vmatpush3.bf16.msra.mxu0 %v642_v7  ;;  %634 = vmatpush3.bf16.msra.mxu1 %v642_v7 }
  0x18   :  { %601 = vmatprep.subr.bf16.mxu0 %v643_v8  ;;  %627 = vmatprep.subr.bf16.mxu1 %v643_v8 }
  0x1b   :  { %602 = vmatpush3.bf16.msra.mxu0 %v643_v8  ;;  %635 = vmatpush3.bf16.msra.mxu1 %v643_v8 }
  0x1c   :  { %603 = vmatprep.subr.bf16.mxu0 %v644_v9  ;;  %628 = vmatprep.subr.bf16.mxu1 %v644_v9 }
  0x1f   :  { %604 = vmatpush3.bf16.msra.mxu0 %v644_v9  ;;  %636 = vmatpush3.bf16.msra.mxu1 %v644_v9 }
  0x22   :  { %606 = vmatmul.mubr.bf16.vlgmr.msra.gmra.mrb[0].mxu0 %v647_v10  ;;  %614 = vmatmul.mubr.bf16.vlgmr.msra.gmra.mrb[0].mxu1 %v648_v11 }
  0x23   :  { %609 = vmatprep.mubr.bf16.mxu0 %v649_v12  ;;  %617 = vmatprep.mubr.bf16.mxu1 %v650_v13 }
  0x2a   :  { %610 = vmatmul.mubr.bf16.gmra.mrb[4].mxu0 %v651_v14  ;;  %618 = vmatmul.mubr.bf16.gmra.mrb[4].mxu1 %v652_v15 }
  0xf5   :  { %v607_v17 = vpop.f32.mrb[0].mxu0  ;;  %v615_v19 = vpop.f32.mrb[0].mxu1 }
  0xf6   :  { %v339_v20 = vmul.f32 %v607_v17, %v492_v16  ;;  %v347_v21 = vmul.f32 %v615_v19, %v492_v16  ;;  %v216_v22 = vpop.f32.mrb[1].mxu0  ;;  %v248_v23 = vpop.f32.mrb[1].mxu1 }
  0xf7   :  { %v337_v24 = vmul.f32 %v492_v16, %v216_v22  ;;  %v345_v25 = vmul.f32 %v492_v16, %v248_v23  ;;  %v608_v26 = vpop.f32.mrb[2].mxu0  ;;  %v616_v27 = vpop.f32.mrb[2].mxu1 }
  0xf8   :  { %v362_v28 = vadd.f32 %v732_v18, %v339_v20  ;;  %v370_v29 = vadd.f32 %v732_v18, %v347_v21  ;;  %v340_v30 = vmul.f32 %v608_v26, %v492_v16  ;;  %v348_v31 = vmul.f32 %v616_v27, %v492_v16  ;;  %v219_v32 = vpop.f32.mrb[3].mxu0  ;;  %v251_v33 = vpop.f32.mrb[3].mxu1 }
  0xf9   :  { %v360_v34 = vadd.f32 %v732_v18, %v337_v24  ;;  %v368_v35 = vadd.f32 %v732_v18, %v345_v25  ;;  %v338_v36 = vmul.f32 %v492_v16, %v219_v32  ;;  %v346_v37 = vmul.f32 %v492_v16, %v251_v33 }
  0xfa   :  { %v363_v38 = vadd.f32 %v732_v18, %v340_v30  ;;  %v371_v39 = vadd.f32 %v732_v18, %v348_v31  ;;  %v378_v42 = vmax.f32 %v362_v28, 0.0  ;;  %v386_v43 = vmax.f32 %v370_v29, 0.0 }
  0xfb   :  { %v361_v40 = vadd.f32 %v732_v18, %v338_v36  ;;  %v369_v41 = vadd.f32 %v732_v18, %v346_v37  ;;  %v376_v46 = vmax.f32 %v360_v34, 0.0  ;;  %v384_v47 = vmax.f32 %v368_v35, 0.0 }
  0xfc   :  { %v379_v44 = vmax.f32 %v363_v38, 0.0  ;;  %v387_v45 = vmax.f32 %v371_v39, 0.0 }
  0xfd   :  { %v377_v48 = vmax.f32 %v361_v40, 0.0  ;;  %v385_v49 = vmax.f32 %v369_v41, 0.0  ;;  %v611_v50 = vpop.f32.mrb[4].mxu0  ;;  %v619_v51 = vpop.f32.mrb[4].mxu1 }
  0xfe   :  { %v534_v52 = vpack.c.bf16 %v379_v44, %v378_v42  ;;  %v554_v53 = vpack.c.bf16 %v387_v45, %v386_v43  ;;  %v343_v54 = vmul.f32 %v611_v50, %v492_v16  ;;  %v351_v55 = vmul.f32 %v619_v51, %v492_v16  ;;  %v232_v56 = vpop.f32.mrb[5].mxu0  ;;  %v264_v57 = vpop.f32.mrb[5].mxu1 }
  0xff   :  { %v529_v58 = vpack.c.bf16 %v377_v48, %v376_v46  ;;  %v549_v59 = vpack.c.bf16 %v385_v49, %v384_v47  ;;  %v341_v60 = vmul.f32 %v492_v16, %v232_v56  ;;  %v349_v61 = vmul.f32 %v492_v16, %v264_v57  ;;  %v612_v62 = vpop.f32.mrb[6].mxu0  ;;  %v620_v63 = vpop.f32.mrb[6].mxu1 }
 0x100   :  { %566 = vst [vmem:[%s778_s4 + $0x8] sm:$0xff] %v534_v52   ;;  %570 = vst [vmem:[%s778_s4 + $0x28] sm:$0xff] %v554_v53   ;;  %v366_v0 = vadd.f32 %v732_v18, %v343_v54  ;;  %v374_v1 = vadd.f32 %v732_v18, %v351_v55  ;;  %v344_v2 = vmul.f32 %v612_v62, %v492_v16  ;;  %v235_v4 = vpop.f32.mrb[7].mxu0  ;;  %v267_v5 = vpop.f32.mrb[7].mxu1 }
 0x101   :  { %v352_v3 = vmul.f32 %v620_v63, %v492_v16  ;;  %530 = vst [vmem:[%s778_s4] sm:$0xff] %v529_v58   ;;  %569 = vst [vmem:[%s778_s4 + $0x20] sm:$0xff] %v549_v59   ;;  %v364_v6 = vadd.f32 %v732_v18, %v341_v60  ;;  %v372_v7 = vadd.f32 %v732_v18, %v349_v61 }
 0x102   :  { %v342_v8 = vmul.f32 %v492_v16, %v235_v4  ;;  %v350_v9 = vmul.f32 %v492_v16, %v267_v5  ;;  %v367_v10 = vadd.f32 %v732_v18, %v344_v2  ;;  %v382_v14 = vmax.f32 %v366_v0, 0.0 }
 0x103   :  { %v375_v11 = vadd.f32 %v732_v18, %v352_v3  ;;  %v390_v15 = vmax.f32 %v374_v1, 0.0  ;;  %v380_v20 = vmax.f32 %v364_v6, 0.0  ;;  %v388_v21 = vmax.f32 %v372_v7, 0.0 }
 0x104   :  { %v365_v12 = vadd.f32 %v732_v18, %v342_v8  ;;  %v373_v13 = vadd.f32 %v732_v18, %v350_v9  ;;  %v383_v17 = vmax.f32 %v367_v10, 0.0 }
 0x105   :  { %v391_v19 = vmax.f32 %v375_v11, 0.0 }
 0x106   :  { %v381_v22 = vmax.f32 %v365_v12, 0.0  ;;  %v389_v23 = vmax.f32 %v373_v13, 0.0  ;;  %v544_v24 = vpack.c.bf16 %v383_v17, %v382_v14 }
 0x107   :  { %v564_v25 = vpack.c.bf16 %v391_v19, %v390_v15 }
 0x108   :  { %v539_v26 = vpack.c.bf16 %v381_v22, %v380_v20  ;;  %v559_v16 = vpack.c.bf16 %v389_v23, %v388_v21  ;;  %568 = vst [vmem:[%s778_s4 + $0x18] sm:$0xff] %v544_v24  }
 0x109   :  { %572 = vst [vmem:[%s778_s4 + $0x38] sm:$0xff] %v564_v25  }
 0x10a   :  { %567 = vst [vmem:[%s778_s4 + $0x10] sm:$0xff] %v539_v26   ;;  %571 = vst [vmem:[%s778_s4 + $0x30] sm:$0xff] %v559_v16  }

// kernel: deeplab_forward.18
= control target key start
LH: loop header
LB: loop body
LE: loop exit
PB: predicated region body
PF: predicated region fallthrough
CT: control target
= control target key end

     0   :  { %s992_s1 = inlined_call_operand.vmem [shape: bf16[256,128], index: 1, kind: input, shape index: {}]   ;;  %s993_s0 = inlined_call_operand.vmem [shape: bf16[128,256], index: 0, kind: input, shape index: {}]   ;;  %s994_s2 = inlined_call_operand.vmem [shape: f32[1,128], index: 2, kind: input, shape index: {}]   ;;  %s995_s3 = inlined_call_operand.vmem [shape: f32[1,128], index: 3, kind: input, shape index: {}]   ;;  %s996_s4 = inlined_call_operand.vmem [shape: bf16[128,128], index: 4, kind: output, shape index: {}]  }
   0x1   :  { %v765_v0 = vld [vmem:[%s992_s1 + $0x40] sm:$0xff]   ;;  %v767_v2 = vld [vmem:[%s992_s1 + $0x48] sm:$0xff]   ;;  %v769_v4 = vld [vmem:[%s992_s1 + $0x50] sm:$0xff]  }
   0x2   :  { %v766_v1 = vld [vmem:[%s992_s1] sm:$0xff]   ;;  %685 = vmatprep.subr.bf16.mxu0 %v765_v0  ;;  %749 = vmatprep.subr.bf16.mxu1 %v765_v0  ;;  %v768_v3 = vld [vmem:[%s992_s1 + $0x8] sm:$0xff]   ;;  %v770_v5 = vld [vmem:[%s992_s1 + $0x10] sm:$0xff]  }
   0x3   :  { %686 = vmatpush3.bf16.msra.mxu0 %v766_v1  ;;  %757 = vmatpush3.bf16.msra.mxu1 %v766_v1  ;;  %v771_v6 = vld [vmem:[%s992_s1 + $0x58] sm:$0xff]   ;;  %v773_v8 = vld [vmem:[%s992_s1 + $0x60] sm:$0xff]   ;;  %v775_v10 = vld [vmem:[%s992_s1 + $0x68] sm:$0xff]  }
   0x4   :  { %687 = vmatprep.subr.bf16.mxu0 %v767_v2  ;;  %750 = vmatprep.subr.bf16.mxu1 %v767_v2  ;;  %v772_v7 = vld [vmem:[%s992_s1 + $0x18] sm:$0xff]   ;;  %v774_v9 = vld [vmem:[%s992_s1 + $0x20] sm:$0xff]   ;;  %v776_v13 = vld [vmem:[%s992_s1 + $0x28] sm:$0xff]  }
   0x5   :  { %v783_v11 = vld [vmem:[%s993_s0 + $0x4] ss:$8 sps:$4 sm:$0xff]   ;;  %v777_v14 = vld [vmem:[%s992_s1 + $0x70] sm:$0xff]   ;;  %v779_v16 = vld [vmem:[%s992_s1 + $0x78] sm:$0xff]  }
   0x6   :  { %v786_v12 = vld [vmem:[%s993_s0 + $0x44] ss:$8 sps:$4 sm:$0xff]   ;;  %310 = vmatprep.mubr.bf16.mxu0 %v783_v11  ;;  %v778_v15 = vld [vmem:[%s992_s1 + $0x30] sm:$0xff]   ;;  %v780_v17 = vld [vmem:[%s992_s1 + $0x38] sm:$0xff]  }
   0x7   :  { %688 = vmatpush3.bf16.msra.mxu0 %v768_v3  ;;  %758 = vmatpush3.bf16.msra.mxu1 %v768_v3  ;;  %v781_v18 = vld [vmem:[%s993_s0] ss:$8 sps:$4 sm:$0xff]   ;;  %v787_v20 = vld [vmem:[%s993_s0 + $0x14] ss:$8 sps:$4 sm:$0xff]   ;;  %v791_v22 = vld [vmem:[%s993_s0 + $0x10] ss:$8 sps:$4 sm:$0xff]  }
   0x8   :  { %689 = vmatprep.subr.bf16.mxu0 %v769_v4  ;;  %751 = vmatprep.subr.bf16.mxu1 %v769_v4  ;;  %v784_v19 = vld [vmem:[%s993_s0 + $0x40] ss:$8 sps:$4 sm:$0xff]   ;;  %v789_v21 = vld [vmem:[%s993_s0 + $0x54] ss:$8 sps:$4 sm:$0xff]   ;;  %v792_v23 = vld [vmem:[%s993_s0 + $0x50] ss:$8 sps:$4 sm:$0xff]  }
   0x9   :  { %342 = vmatprep.mubr.bf16.mxu1 %v786_v12  ;;  %v793_v24 = vld [vmem:[%s993_s0 + $0x24] ss:$8 sps:$4 sm:$0xff]   ;;  %v797_v26 = vld [vmem:[%s993_s0 + $0x20] ss:$8 sps:$4 sm:$0xff]   ;;  %v799_v28 = vld [vmem:[%s993_s0 + $0x34] ss:$8 sps:$4 sm:$0xff]  }
   0xa   :  { %v795_v25 = vld [vmem:[%s993_s0 + $0x64] ss:$8 sps:$4 sm:$0xff]   ;;  %v798_v27 = vld [vmem:[%s993_s0 + $0x60] ss:$8 sps:$4 sm:$0xff]   ;;  %v801_v29 = vld [vmem:[%s993_s0 + $0x74] ss:$8 sps:$4 sm:$0xff]  }
   0xb   :  { %690 = vmatpush3.bf16.msra.mxu0 %v770_v5  ;;  %759 = vmatpush3.bf16.msra.mxu1 %v770_v5  ;;  %v803_v30 = vld [vmem:[%s993_s0 + $0x30] ss:$8 sps:$4 sm:$0xff]   ;;  %v929_v35 = vld [vmem:[%s994_s2] ss:$0 sm:$0xff] }
   0xc   :  { %691 = vmatprep.subr.bf16.mxu0 %v771_v6  ;;  %752 = vmatprep.subr.bf16.mxu1 %v771_v6  ;;  %v804_v31 = vld [vmem:[%s993_s0 + $0x70] ss:$8 sps:$4 sm:$0xff]   ;;  %v934_v41 = vld [vmem:[%s995_s3] ss:$0 sm:$0xff] }
   0xf   :  { %692 = vmatpush3.bf16.msra.mxu0 %v772_v7  ;;  %760 = vmatpush3.bf16.msra.mxu1 %v772_v7 }
  0x10   :  { %693 = vmatprep.subr.bf16.mxu0 %v773_v8  ;;  %753 = vmatprep.subr.bf16.mxu1 %v773_v8 }
  0x13   :  { %694 = vmatpush3.bf16.msra.mxu0 %v774_v9  ;;  %761 = vmatpush3.bf16.msra.mxu1 %v774_v9 }
  0x14   :  { %695 = vmatprep.subr.bf16.mxu0 %v775_v10  ;;  %754 = vmatprep.subr.bf16.mxu1 %v775_v10 }
  0x17   :  { %696 = vmatpush3.bf16.msra.mxu0 %v776_v13  ;;  %762 = vmatpush3.bf16.msra.mxu1 %v776_v13 }
  0x18   :  { %697 = vmatprep.subr.bf16.mxu0 %v777_v14  ;;  %755 = vmatprep.subr.bf16.mxu1 %v777_v14 }
  0x1b   :  { %698 = vmatpush3.bf16.msra.mxu0 %v778_v15  ;;  %763 = vmatpush3.bf16.msra.mxu1 %v778_v15 }
  0x1c   :  { %699 = vmatprep.subr.bf16.mxu0 %v779_v16  ;;  %756 = vmatprep.subr.bf16.mxu1 %v779_v16 }
  0x1f   :  { %700 = vmatpush3.bf16.msra.mxu0 %v780_v17  ;;  %764 = vmatpush3.bf16.msra.mxu1 %v780_v17 }
  0x22   :  { %311 = vmatmul.mubr.bf16.vlgmr.msra.gmra.mrb[0].mxu0 %v781_v18  ;;  %343 = vmatmul.mubr.bf16.vlgmr.msra.gmra.mrb[0].mxu1 %v784_v19 }
  0x23   :  { %318 = vmatprep.mubr.bf16.mxu0 %v787_v20  ;;  %350 = vmatprep.mubr.bf16.mxu1 %v789_v21 }
  0x2a   :  { %319 = vmatmul.mubr.bf16.gmra.mrb[4].mxu0 %v791_v22  ;;  %351 = vmatmul.mubr.bf16.gmra.mrb[4].mxu1 %v792_v23 }
  0x2b   :  { %326 = vmatprep.mubr.bf16.mxu0 %v793_v24  ;;  %358 = vmatprep.mubr.bf16.mxu1 %v795_v25 }
  0x32   :  { %327 = vmatmul.mubr.bf16.gmra.mrb[8].mxu0 %v797_v26  ;;  %359 = vmatmul.mubr.bf16.gmra.mrb[8].mxu1 %v798_v27 }
  0x33   :  { %334 = vmatprep.mubr.bf16.mxu0 %v799_v28  ;;  %366 = vmatprep.mubr.bf16.mxu1 %v801_v29 }
  0x3a   :  { %335 = vmatmul.mubr.bf16.gmra.mrb[12].mxu0 %v803_v30  ;;  %367 = vmatmul.mubr.bf16.gmra.mrb[12].mxu1 %v804_v31 }
  0xf5   :  { %v701_v32 = vpop.f32.mrb[0].mxu0  ;;  %v725_v33 = vpop.f32.mrb[0].mxu1 }
  0xf6   :  { %v702_v34 = vpop.f32.mrb[1].mxu0  ;;  %v726_v36 = vpop.f32.mrb[1].mxu1 }
  0xf7   :  { %v703_v37 = vadd.f32 %v702_v34, %v701_v32  ;;  %v727_v38 = vadd.f32 %v726_v36, %v725_v33  ;;  %v704_v39 = vpop.f32.mrb[2].mxu0  ;;  %v728_v40 = vpop.f32.mrb[2].mxu1 }
  0xf8   :  { %v705_v42 = vpop.f32.mrb[3].mxu0  ;;  %v729_v43 = vpop.f32.mrb[3].mxu1 }
  0xf9   :  { %v433_v44 = vmul.f32 %v703_v37, %v929_v35  ;;  %v441_v45 = vmul.f32 %v727_v38, %v929_v35  ;;  %v706_v46 = vadd.f32 %v705_v42, %v704_v39  ;;  %v730_v47 = vadd.f32 %v729_v43, %v728_v40 }
  0xfb   :  { %v456_v48 = vadd.f32 %v934_v41, %v433_v44  ;;  %v464_v49 = vadd.f32 %v934_v41, %v441_v45  ;;  %v434_v50 = vmul.f32 %v706_v46, %v929_v35  ;;  %v442_v51 = vmul.f32 %v730_v47, %v929_v35 }
  0xfd   :  { %v457_v52 = vadd.f32 %v934_v41, %v434_v50  ;;  %v465_v53 = vadd.f32 %v934_v41, %v442_v51  ;;  %v707_v54 = vpop.f32.mrb[4].mxu0  ;;  %v731_v55 = vpop.f32.mrb[4].mxu1  ;;  %v472_v56 = vmax.f32 %v456_v48, 0.0  ;;  %v480_v57 = vmax.f32 %v464_v49, 0.0 }
  0xfe   :  { %v708_v58 = vpop.f32.mrb[5].mxu0  ;;  %v732_v59 = vpop.f32.mrb[5].mxu1 }
  0xff   :  { %v473_v60 = vmax.f32 %v457_v52, 0.0  ;;  %v481_v61 = vmax.f32 %v465_v53, 0.0  ;;  %v709_v62 = vadd.f32 %v708_v58, %v707_v54  ;;  %v733_v63 = vadd.f32 %v732_v59, %v731_v55  ;;  %v710_v0 = vpop.f32.mrb[6].mxu0  ;;  %v734_v1 = vpop.f32.mrb[6].mxu1 }
 0x100   :  { %v711_v2 = vpop.f32.mrb[7].mxu0  ;;  %v735_v3 = vpop.f32.mrb[7].mxu1 }
 0x101   :  { %v641_v4 = vpack.c.bf16 %v473_v60, %v472_v56  ;;  %v661_v5 = vpack.c.bf16 %v481_v61, %v480_v57  ;;  %v435_v6 = vmul.f32 %v709_v62, %v929_v35  ;;  %v443_v7 = vmul.f32 %v733_v63, %v929_v35 }
 0x102   :  { %v712_v8 = vadd.f32 %v711_v2, %v710_v0  ;;  %v736_v9 = vadd.f32 %v735_v3, %v734_v1 }
 0x103   :  { %642 = vst [vmem:[%s996_s4] sm:$0xff] %v641_v4   ;;  %681 = vst [vmem:[%s996_s4 + $0x20] sm:$0xff] %v661_v5   ;;  %v458_v10 = vadd.f32 %v934_v41, %v435_v6  ;;  %v466_v11 = vadd.f32 %v934_v41, %v443_v7 }
 0x104   :  { %v436_v12 = vmul.f32 %v712_v8, %v929_v35  ;;  %v444_v13 = vmul.f32 %v736_v9, %v929_v35 }
 0x105   :  { %v713_v14 = vpop.f32.mrb[8].mxu0  ;;  %v737_v15 = vpop.f32.mrb[8].mxu1  ;;  %v474_v24 = vmax.f32 %v458_v10, 0.0  ;;  %v482_v25 = vmax.f32 %v466_v11, 0.0 }
 0x106   :  { %v459_v16 = vadd.f32 %v934_v41, %v436_v12  ;;  %v467_v17 = vadd.f32 %v934_v41, %v444_v13  ;;  %v714_v18 = vpop.f32.mrb[9].mxu0  ;;  %v738_v19 = vpop.f32.mrb[9].mxu1 }
 0x107   :  { %v715_v20 = vadd.f32 %v714_v18, %v713_v14  ;;  %v739_v21 = vadd.f32 %v738_v19, %v737_v15  ;;  %v716_v22 = vpop.f32.mrb[10].mxu0  ;;  %v740_v23 = vpop.f32.mrb[10].mxu1 }
 0x108   :  { %v475_v26 = vmax.f32 %v459_v16, 0.0  ;;  %v483_v27 = vmax.f32 %v467_v17, 0.0  ;;  %v717_v28 = vpop.f32.mrb[11].mxu0  ;;  %v741_v29 = vpop.f32.mrb[11].mxu1 }
 0x109   :  { %v437_v30 = vmul.f32 %v715_v20, %v929_v35  ;;  %v445_v31 = vmul.f32 %v739_v21, %v929_v35  ;;  %v718_v32 = vadd.f32 %v717_v28, %v716_v22  ;;  %v742_v33 = vadd.f32 %v741_v29, %v740_v23 }
 0x10a   :  { %v646_v34 = vpack.c.bf16 %v475_v26, %v474_v24  ;;  %v666_v36 = vpack.c.bf16 %v483_v27, %v482_v25 }
 0x10b   :  { %v460_v37 = vadd.f32 %v934_v41, %v437_v30  ;;  %v468_v38 = vadd.f32 %v934_v41, %v445_v31  ;;  %v438_v39 = vmul.f32 %v718_v32, %v929_v35  ;;  %v446_v40 = vmul.f32 %v742_v33, %v929_v35 }
 0x10c   :  { %678 = vst [vmem:[%s996_s4 + $0x8] sm:$0xff] %v646_v34   ;;  %682 = vst [vmem:[%s996_s4 + $0x28] sm:$0xff] %v666_v36  }
 0x10d   :  { %v461_v42 = vadd.f32 %v934_v41, %v438_v39  ;;  %v469_v43 = vadd.f32 %v934_v41, %v446_v40  ;;  %v719_v44 = vpop.f32.mrb[12].mxu0  ;;  %v743_v45 = vpop.f32.mrb[12].mxu1  ;;  %v476_v46 = vmax.f32 %v460_v37, 0.0  ;;  %v484_v47 = vmax.f32 %v468_v38, 0.0 }
 0x10e   :  { %v720_v48 = vpop.f32.mrb[13].mxu0  ;;  %v744_v49 = vpop.f32.mrb[13].mxu1 }
 0x10f   :  { %v477_v50 = vmax.f32 %v461_v42, 0.0  ;;  %v485_v51 = vmax.f32 %v469_v43, 0.0  ;;  %v721_v52 = vadd.f32 %v720_v48, %v719_v44  ;;  %v745_v53 = vadd.f32 %v744_v49, %v743_v45  ;;  %v722_v54 = vpop.f32.mrb[14].mxu0  ;;  %v746_v55 = vpop.f32.mrb[14].mxu1 }
 0x110   :  { %v723_v56 = vpop.f32.mrb[15].mxu0  ;;  %v747_v57 = vpop.f32.mrb[15].mxu1 }
 0x111   :  { %v651_v58 = vpack.c.bf16 %v477_v50, %v476_v46  ;;  %v671_v59 = vpack.c.bf16 %v485_v51, %v484_v47  ;;  %v439_v60 = vmul.f32 %v721_v52, %v929_v35  ;;  %v447_v61 = vmul.f32 %v745_v53, %v929_v35 }
 0x112   :  { %v724_v62 = vadd.f32 %v723_v56, %v722_v54  ;;  %v748_v63 = vadd.f32 %v747_v57, %v746_v55 }
 0x113   :  { %679 = vst [vmem:[%s996_s4 + $0x10] sm:$0xff] %v651_v58   ;;  %683 = vst [vmem:[%s996_s4 + $0x30] sm:$0xff] %v671_v59   ;;  %v462_v0 = vadd.f32 %v934_v41, %v439_v60  ;;  %v470_v1 = vadd.f32 %v934_v41, %v447_v61 }
 0x114   :  { %v440_v2 = vmul.f32 %v724_v62, %v929_v35  ;;  %v448_v3 = vmul.f32 %v748_v63, %v929_v35 }
 0x115   :  { %v478_v6 = vmax.f32 %v462_v0, 0.0  ;;  %v486_v7 = vmax.f32 %v470_v1, 0.0 }
 0x116   :  { %v463_v4 = vadd.f32 %v934_v41, %v440_v2  ;;  %v471_v5 = vadd.f32 %v934_v41, %v448_v3 }
 0x118   :  { %v479_v8 = vmax.f32 %v463_v4, 0.0  ;;  %v487_v9 = vmax.f32 %v471_v5, 0.0 }
 0x11a   :  { %v656_v10 = vpack.c.bf16 %v479_v8, %v478_v6  ;;  %v676_v11 = vpack.c.bf16 %v487_v9, %v486_v7 }
 0x11c   :  { %680 = vst [vmem:[%s996_s4 + $0x18] sm:$0xff] %v656_v10   ;;  %684 = vst [vmem:[%s996_s4 + $0x38] sm:$0xff] %v676_v11  }

// kernel: deeplab_forward.19
= control target key start
LH: loop header
LB: loop body
LE: loop exit
PB: predicated region body
PF: predicated region fallthrough
CT: control target
= control target key end

     0   :  { %s1335_s1 = inlined_call_operand.vmem [shape: bf16[384,128], index: 1, kind: input, shape index: {}]   ;;  %s1336_s0 = inlined_call_operand.vmem [shape: bf16[128,384], index: 0, kind: input, shape index: {}]   ;;  %s1337_s2 = inlined_call_operand.vmem [shape: f32[1,128], index: 2, kind: input, shape index: {}]   ;;  %s1338_s3 = inlined_call_operand.vmem [shape: f32[1,128], index: 3, kind: input, shape index: {}]   ;;  %s1339_s4 = inlined_call_operand.vmem [shape: bf16[128,128], index: 4, kind: output, shape index: {}]  }
   0x1   :  { %v1038_v0 = vld [vmem:[%s1335_s1 + $0x40] sm:$0xff]   ;;  %v1041_v3 = vld [vmem:[%s1335_s1 + $0x48] sm:$0xff]   ;;  %v1044_v6 = vld [vmem:[%s1335_s1 + $0x50] sm:$0xff]  }
   0x2   :  { %v1039_v1 = vld [vmem:[%s1335_s1] sm:$0xff]   ;;  %926 = vmatprep.subr.bf16.mxu0 %v1038_v0  ;;  %v1042_v4 = vld [vmem:[%s1335_s1 + $0x8] sm:$0xff]   ;;  %v1045_v7 = vld [vmem:[%s1335_s1 + $0x10] sm:$0xff]  }
   0x3   :  { %v1040_v2 = vld [vmem:[%s1335_s1 + $0x80] sm:$0xff]   ;;  %927 = vmatpush3.bf16.msra.mxu0 %v1039_v1  ;;  %v1043_v5 = vld [vmem:[%s1335_s1 + $0x88] sm:$0xff]   ;;  %v1046_v8 = vld [vmem:[%s1335_s1 + $0x90] sm:$0xff]  }
   0x4   :  { %1006 = vmatprep.subr.bf16.mxu1 %v1040_v2  ;;  %928 = vmatprep.subr.bf16.mxu0 %v1041_v3  ;;  %v1047_v9 = vld [vmem:[%s1335_s1 + $0x58] sm:$0xff]   ;;  %v1050_v12 = vld [vmem:[%s1335_s1 + $0x60] sm:$0xff]   ;;  %v1053_v15 = vld [vmem:[%s1335_s1 + $0x68] sm:$0xff]  }
   0x5   :  { %1007 = vmatpush3.bf16.msra.mxu1 %v1040_v2  ;;  %v1048_v10 = vld [vmem:[%s1335_s1 + $0x18] sm:$0xff]   ;;  %v1052_v13 = vld [vmem:[%s1335_s1 + $0xa0] sm:$0xff]   ;;  %v1055_v16 = vld [vmem:[%s1335_s1 + $0xa8] sm:$0xff]  }
   0x6   :  { %1008 = vmatprep.subr.bf16.mxu1 %v1043_v5  ;;  %v1049_v11 = vld [vmem:[%s1335_s1 + $0x98] sm:$0xff]   ;;  %v1051_v14 = vld [vmem:[%s1335_s1 + $0x20] sm:$0xff]   ;;  %v1054_v17 = vld [vmem:[%s1335_s1 + $0x28] sm:$0xff]  }
   0x7   :  { %929 = vmatpush3.bf16.msra.mxu0 %v1042_v4  ;;  %v1056_v18 = vld [vmem:[%s1335_s1 + $0x70] sm:$0xff]   ;;  %v1059_v21 = vld [vmem:[%s1335_s1 + $0x78] sm:$0xff]   ;;  %v1062_v26 = vld [vmem:[%s1336_s0] ss:$12 sps:$4 sm:$0xff]  }
   0x8   :  { %930 = vmatprep.subr.bf16.mxu0 %v1044_v6  ;;  %v1057_v19 = vld [vmem:[%s1335_s1 + $0x30] sm:$0xff]   ;;  %v1061_v22 = vld [vmem:[%s1335_s1 + $0xb8] sm:$0xff]   ;;  %v1066_v28 = vld [vmem:[%s1336_s0 + $0x20] ss:$12 sps:$4 sm:$0xff]  }
   0x9   :  { %1009 = vmatpush3.bf16.msra.mxu1 %v1043_v5  ;;  %v1058_v20 = vld [vmem:[%s1335_s1 + $0xb0] sm:$0xff]   ;;  %v1060_v25 = vld [vmem:[%s1335_s1 + $0x38] sm:$0xff]   ;;  %v1082_v36 = vld [vmem:[%s1336_s0 + $0x80] ss:$12 sps:$4 sm:$0xff]  }
   0xa   :  { %1010 = vmatprep.subr.bf16.mxu1 %v1046_v8  ;;  %v1064_v23 = vld [vmem:[%s1336_s0 + $0x4] ss:$12 sps:$4 sm:$0xff]   ;;  %v1065_v24 = vld [vmem:[%s1336_s0 + $0x8] ss:$12 sps:$4 sm:$0xff]   ;;  %v1075_v35 = vld [vmem:[%s1336_s0 + $0x4c] ss:$12 sps:$4 sm:$0xff]  }
   0xb   :  { %931 = vmatpush3.bf16.msra.mxu0 %v1045_v7  ;;  %438 = vmatprep.mubr.bf16.mxu0 %v1064_v23  ;;  %v1067_v27 = vld [vmem:[%s1336_s0 + $0x1c] ss:$12 sps:$4 sm:$0xff]   ;;  %v1073_v29 = vld [vmem:[%s1336_s0 + $0x38] ss:$12 sps:$4 sm:$0xff]   ;;  %v1070_v31 = vld [vmem:[%s1336_s0 + $0x34] ss:$12 sps:$4 sm:$0xff]  }
   0xc   :  { %932 = vmatprep.subr.bf16.mxu0 %v1047_v9  ;;  %1022 = vmatprep.mubr.bf16.mxu1 %v1065_v24  ;;  %v1069_v30 = vld [vmem:[%s1336_s0 + $0x18] ss:$12 sps:$4 sm:$0xff]   ;;  %v1074_v32 = vld [vmem:[%s1336_s0 + $0x50] ss:$12 sps:$4 sm:$0xff]   ;;  %v1081_v33 = vld [vmem:[%s1336_s0 + $0x68] ss:$12 sps:$4 sm:$0xff]  }
   0xd   :  { %1011 = vmatpush3.bf16.msra.mxu1 %v1046_v8  ;;  %v1072_v34 = vld [vmem:[%s1336_s0 + $0x30] ss:$12 sps:$4 sm:$0xff]   ;;  %v1089_v37 = vld [vmem:[%s1336_s0 + $0x98] ss:$12 sps:$4 sm:$0xff]   ;;  %v1077_v38 = vld [vmem:[%s1336_s0 + $0x48] ss:$12 sps:$4 sm:$0xff]  }
   0xe   :  { %1012 = vmatprep.subr.bf16.mxu1 %v1049_v11  ;;  %v1078_v39 = vld [vmem:[%s1336_s0 + $0x64] ss:$12 sps:$4 sm:$0xff]   ;;  %v1080_v41 = vld [vmem:[%s1336_s0 + $0x60] ss:$12 sps:$4 sm:$0xff]   ;;  %v1083_v42 = vld [vmem:[%s1336_s0 + $0x7c] ss:$12 sps:$4 sm:$0xff]  }
   0xf   :  { %933 = vmatpush3.bf16.msra.mxu0 %v1048_v10  ;;  %v1090_v40 = vld [vmem:[%s1336_s0 + $0xb0] ss:$12 sps:$4 sm:$0xff]   ;;  %v1085_v43 = vld [vmem:[%s1336_s0 + $0x78] ss:$12 sps:$4 sm:$0xff]   ;;  %v1086_v44 = vld [vmem:[%s1336_s0 + $0x94] ss:$12 sps:$4 sm:$0xff]  }
  0x10   :  { %934 = vmatprep.subr.bf16.mxu0 %v1050_v12  ;;  %v1088_v45 = vld [vmem:[%s1336_s0 + $0x90] ss:$12 sps:$4 sm:$0xff]   ;;  %v1091_v46 = vld [vmem:[%s1336_s0 + $0xac] ss:$12 sps:$4 sm:$0xff]   ;;  %v1093_v47 = vld [vmem:[%s1336_s0 + $0xa8] ss:$12 sps:$4 sm:$0xff]  }
  0x11   :  { %1013 = vmatpush3.bf16.msra.mxu1 %v1049_v11  ;;  %v1266_v55 = vld [vmem:[%s1337_s2] ss:$0 sm:$0xff] }
  0x12   :  { %1014 = vmatprep.subr.bf16.mxu1 %v1052_v13  ;;  %v1271_v59 = vld [vmem:[%s1338_s3] ss:$0 sm:$0xff] }
  0x13   :  { %935 = vmatpush3.bf16.msra.mxu0 %v1051_v14 }
  0x14   :  { %936 = vmatprep.subr.bf16.mxu0 %v1053_v15 }
  0x15   :  { %1015 = vmatpush3.bf16.msra.mxu1 %v1052_v13 }
  0x16   :  { %1016 = vmatprep.subr.bf16.mxu1 %v1055_v16 }
  0x17   :  { %937 = vmatpush3.bf16.msra.mxu0 %v1054_v17 }
  0x18   :  { %938 = vmatprep.subr.bf16.mxu0 %v1056_v18 }
  0x19   :  { %1017 = vmatpush3.bf16.msra.mxu1 %v1055_v16 }
  0x1a   :  { %1018 = vmatprep.subr.bf16.mxu1 %v1058_v20 }
  0x1b   :  { %939 = vmatpush3.bf16.msra.mxu0 %v1057_v19 }
  0x1c   :  { %940 = vmatprep.subr.bf16.mxu0 %v1059_v21 }
  0x1d   :  { %1019 = vmatpush3.bf16.msra.mxu1 %v1058_v20 }
  0x1e   :  { %1020 = vmatprep.subr.bf16.mxu1 %v1061_v22 }
  0x1f   :  { %941 = vmatpush3.bf16.msra.mxu0 %v1060_v25 }
  0x21   :  { %1021 = vmatpush3.bf16.msra.mxu1 %v1061_v22 }
  0x22   :  { %439 = vmatmul.mubr.bf16.vlgmr.msra.gmra.mrb[0].mxu0 %v1062_v26 }
  0x23   :  { %446 = vmatprep.mubr.bf16.mxu0 %v1067_v27 }
  0x24   :  { %1023 = vmatmul.mubr.bf16.vlgmr.msra.gmra.mrb[0].mxu1 %v1066_v28 }
  0x25   :  { %1026 = vmatprep.mubr.bf16.mxu1 %v1073_v29 }
  0x2a   :  { %447 = vmatmul.mubr.bf16.gmra.mrb[4].mxu0 %v1069_v30 }
  0x2b   :  { %454 = vmatprep.mubr.bf16.mxu0 %v1070_v31 }
  0x2c   :  { %1027 = vmatmul.mubr.bf16.gmra.mrb[4].mxu1 %v1074_v32 }
  0x2d   :  { %1030 = vmatprep.mubr.bf16.mxu1 %v1081_v33 }
  0x32   :  { %455 = vmatmul.mubr.bf16.gmra.mrb[8].mxu0 %v1072_v34 }
  0x33   :  { %462 = vmatprep.mubr.bf16.mxu0 %v1075_v35 }
  0x34   :  { %1031 = vmatmul.mubr.bf16.gmra.mrb[8].mxu1 %v1082_v36 }
  0x35   :  { %1034 = vmatprep.mubr.bf16.mxu1 %v1089_v37 }
  0x3a   :  { %463 = vmatmul.mubr.bf16.gmra.mrb[12].mxu0 %v1077_v38 }
  0x3b   :  { %470 = vmatprep.mubr.bf16.mxu0 %v1078_v39 }
  0x3c   :  { %1035 = vmatmul.mubr.bf16.gmra.mrb[12].mxu1 %v1090_v40 }
  0x42   :  { %471 = vmatmul.mubr.bf16.gmra.mrb[16].mxu0 %v1080_v41 }
  0x43   :  { %478 = vmatprep.mubr.bf16.mxu0 %v1083_v42 }
  0x4a   :  { %479 = vmatmul.mubr.bf16.gmra.mrb[20].mxu0 %v1085_v43 }
  0x4b   :  { %486 = vmatprep.mubr.bf16.mxu0 %v1086_v44 }
  0x52   :  { %487 = vmatmul.mubr.bf16.gmra.mrb[24].mxu0 %v1088_v45 }
  0x53   :  { %494 = vmatprep.mubr.bf16.mxu0 %v1091_v46 }
  0x5a   :  { %495 = vmatmul.mubr.bf16.gmra.mrb[28].mxu0 %v1093_v47 }
  0xf5   :  { %v942_v48 = vpop.f32.mrb[0].mxu0 }
  0xf6   :  { %v943_v49 = vpop.f32.mrb[1].mxu0 }
  0xf7   :  { %v944_v50 = vadd.f32 %v943_v49, %v942_v48  ;;  %v945_v51 = vpop.f32.mrb[2].mxu0  ;;  %v1024_v52 = vpop.f32.mrb[0].mxu1 }
  0xf8   :  { %v946_v53 = vpop.f32.mrb[3].mxu0  ;;  %v537_v54 = vpop.f32.mrb[1].mxu1 }
  0xf9   :  { %v947_v56 = vadd.f32 %v946_v53, %v945_v51  ;;  %v538_v57 = vadd.f32 %v944_v50, %v537_v54  ;;  %v1025_v58 = vpop.f32.mrb[2].mxu1 }
  0xfa   :  { %v540_v60 = vpop.f32.mrb[3].mxu1 }
  0xfb   :  { %v658_v61 = vmul.f32 %v1266_v55, %v538_v57  ;;  %v541_v62 = vadd.f32 %v947_v56, %v540_v60 }
  0xfd   :  { %v681_v63 = vadd.f32 %v1271_v59, %v658_v61  ;;  %v659_v0 = vmul.f32 %v1266_v55, %v541_v62  ;;  %v948_v1 = vpop.f32.mrb[4].mxu0 }
  0xfe   :  { %v949_v2 = vpop.f32.mrb[5].mxu0 }
  0xff   :  { %v682_v3 = vadd.f32 %v1271_v59, %v659_v0  ;;  %v950_v4 = vadd.f32 %v949_v2, %v948_v1  ;;  %v951_v5 = vpop.f32.mrb[6].mxu0  ;;  %v1028_v6 = vpop.f32.mrb[4].mxu1  ;;  %v697_v9 = vmax.f32 %v681_v63, 0.0 }
 0x100   :  { %v952_v7 = vpop.f32.mrb[7].mxu0  ;;  %v553_v8 = vpop.f32.mrb[5].mxu1 }
 0x101   :  { %v698_v10 = vmax.f32 %v682_v3, 0.0  ;;  %v546_v11 = vadd.f32 %v1024_v52, %v950_v4  ;;  %v953_v12 = vadd.f32 %v952_v7, %v951_v5  ;;  %v1029_v13 = vpop.f32.mrb[6].mxu1 }
 0x102   :  { %v556_v14 = vpop.f32.mrb[7].mxu1 }
 0x103   :  { %v882_v15 = vpack.c.bf16 %v698_v10, %v697_v9  ;;  %v660_v16 = vmul.f32 %v1266_v55, %v546_v11  ;;  %v549_v17 = vadd.f32 %v1025_v58, %v953_v12 }
 0x105   :  { %883 = vst [vmem:[%s1339_s4] sm:$0xff] %v882_v15   ;;  %v683_v18 = vadd.f32 %v1271_v59, %v660_v16  ;;  %v661_v19 = vmul.f32 %v1266_v55, %v549_v17  ;;  %v954_v20 = vpop.f32.mrb[8].mxu0 }
 0x106   :  { %v955_v21 = vpop.f32.mrb[9].mxu0 }
 0x107   :  { %v684_v22 = vadd.f32 %v1271_v59, %v661_v19  ;;  %v956_v23 = vadd.f32 %v955_v21, %v954_v20  ;;  %v957_v24 = vpop.f32.mrb[10].mxu0  ;;  %v1032_v25 = vpop.f32.mrb[8].mxu1  ;;  %v699_v28 = vmax.f32 %v683_v18, 0.0 }
 0x108   :  { %v958_v26 = vpop.f32.mrb[11].mxu0  ;;  %v569_v27 = vpop.f32.mrb[9].mxu1 }
 0x109   :  { %v700_v29 = vmax.f32 %v684_v22, 0.0  ;;  %v959_v30 = vadd.f32 %v958_v26, %v957_v24  ;;  %v554_v31 = vadd.f32 %v956_v23, %v553_v8  ;;  %v1033_v32 = vpop.f32.mrb[10].mxu1 }
 0x10a   :  { %v572_v33 = vpop.f32.mrb[11].mxu1 }
 0x10b   :  { %v887_v34 = vpack.c.bf16 %v700_v29, %v699_v28  ;;  %v662_v35 = vmul.f32 %v1266_v55, %v554_v31  ;;  %v557_v36 = vadd.f32 %v959_v30, %v556_v14 }
 0x10d   :  { %919 = vst [vmem:[%s1339_s4 + $0x8] sm:$0xff] %v887_v34   ;;  %v685_v37 = vadd.f32 %v1271_v59, %v662_v35  ;;  %v663_v38 = vmul.f32 %v1266_v55, %v557_v36  ;;  %v960_v39 = vpop.f32.mrb[12].mxu0 }
 0x10e   :  { %v961_v40 = vpop.f32.mrb[13].mxu0 }
 0x10f   :  { %v686_v41 = vadd.f32 %v1271_v59, %v663_v38  ;;  %v962_v42 = vadd.f32 %v961_v40, %v960_v39  ;;  %v963_v43 = vpop.f32.mrb[14].mxu0  ;;  %v1291_v44 = vpop.f32.mrb[12].mxu1  ;;  %v701_v47 = vmax.f32 %v685_v37, 0.0 }
 0x110   :  { %v964_v45 = vpop.f32.mrb[15].mxu0  ;;  %v585_v46 = vpop.f32.mrb[13].mxu1 }
 0x111   :  { %v702_v48 = vmax.f32 %v686_v41, 0.0  ;;  %v562_v49 = vadd.f32 %v1028_v6, %v962_v42  ;;  %v965_v50 = vadd.f32 %v964_v45, %v963_v43  ;;  %v1293_v51 = vpop.f32.mrb[14].mxu1 }
 0x112   :  { %v588_v52 = vpop.f32.mrb[15].mxu1 }
 0x113   :  { %v892_v53 = vpack.c.bf16 %v702_v48, %v701_v47  ;;  %v664_v54 = vmul.f32 %v1266_v55, %v562_v49  ;;  %v565_v56 = vadd.f32 %v1029_v13, %v965_v50 }
 0x115   :  { %920 = vst [vmem:[%s1339_s4 + $0x10] sm:$0xff] %v892_v53   ;;  %v687_v57 = vadd.f32 %v1271_v59, %v664_v54  ;;  %v665_v58 = vmul.f32 %v1266_v55, %v565_v56  ;;  %v966_v60 = vpop.f32.mrb[16].mxu0 }
 0x116   :  { %v967_v61 = vpop.f32.mrb[17].mxu0 }
 0x117   :  { %v688_v62 = vadd.f32 %v1271_v59, %v665_v58  ;;  %v968_v63 = vadd.f32 %v967_v61, %v966_v60  ;;  %v969_v0 = vpop.f32.mrb[18].mxu0  ;;  %v703_v2 = vmax.f32 %v687_v57, 0.0 }
 0x118   :  { %v970_v1 = vpop.f32.mrb[19].mxu0 }
 0x119   :  { %v704_v3 = vmax.f32 %v688_v62, 0.0  ;;  %v971_v4 = vadd.f32 %v970_v1, %v969_v0  ;;  %v570_v5 = vadd.f32 %v968_v63, %v569_v27 }
 0x11b   :  { %v897_v6 = vpack.c.bf16 %v704_v3, %v703_v2  ;;  %v666_v7 = vmul.f32 %v1266_v55, %v570_v5  ;;  %v573_v8 = vadd.f32 %v971_v4, %v572_v33 }
 0x11d   :  { %921 = vst [vmem:[%s1339_s4 + $0x18] sm:$0xff] %v897_v6   ;;  %v689_v9 = vadd.f32 %v1271_v59, %v666_v7  ;;  %v667_v10 = vmul.f32 %v1266_v55, %v573_v8  ;;  %v972_v11 = vpop.f32.mrb[20].mxu0 }
 0x11e   :  { %v973_v12 = vpop.f32.mrb[21].mxu0 }
 0x11f   :  { %v690_v13 = vadd.f32 %v1271_v59, %v667_v10  ;;  %v974_v14 = vadd.f32 %v973_v12, %v972_v11  ;;  %v975_v15 = vpop.f32.mrb[22].mxu0  ;;  %v705_v17 = vmax.f32 %v689_v9, 0.0 }
 0x120   :  { %v976_v16 = vpop.f32.mrb[23].mxu0 }
 0x121   :  { %v706_v18 = vmax.f32 %v690_v13, 0.0  ;;  %v578_v19 = vadd.f32 %v1032_v25, %v974_v14  ;;  %v977_v20 = vadd.f32 %v976_v16, %v975_v15 }
 0x123   :  { %v902_v21 = vpack.c.bf16 %v706_v18, %v705_v17  ;;  %v668_v22 = vmul.f32 %v1266_v55, %v578_v19  ;;  %v581_v23 = vadd.f32 %v1033_v32, %v977_v20 }
 0x125   :  { %922 = vst [vmem:[%s1339_s4 + $0x20] sm:$0xff] %v902_v21   ;;  %v691_v24 = vadd.f32 %v1271_v59, %v668_v22  ;;  %v669_v26 = vmul.f32 %v1266_v55, %v581_v23  ;;  %v978_v27 = vpop.f32.mrb[24].mxu0 }
 0x126   :  { %v979_v28 = vpop.f32.mrb[25].mxu0 }
 0x127   :  { %v692_v29 = vadd.f32 %v1271_v59, %v669_v26  ;;  %v980_v30 = vadd.f32 %v979_v28, %v978_v27  ;;  %v981_v31 = vpop.f32.mrb[26].mxu0  ;;  %v707_v33 = vmax.f32 %v691_v24, 0.0 }
 0x128   :  { %v982_v25 = vpop.f32.mrb[27].mxu0 }
 0x129   :  { %v708_v34 = vmax.f32 %v692_v29, 0.0  ;;  %v983_v35 = vadd.f32 %v982_v25, %v981_v31  ;;  %v586_v36 = vadd.f32 %v980_v30, %v585_v46 }
 0x12b   :  { %v907_v32 = vpack.c.bf16 %v708_v34, %v707_v33  ;;  %v670_v37 = vmul.f32 %v1266_v55, %v586_v36  ;;  %v589_v38 = vadd.f32 %v983_v35, %v588_v52 }
 0x12d   :  { %923 = vst [vmem:[%s1339_s4 + $0x28] sm:$0xff] %v907_v32   ;;  %v693_v39 = vadd.f32 %v1271_v59, %v670_v37  ;;  %v671_v40 = vmul.f32 %v1266_v55, %v589_v38  ;;  %v984_v41 = vpop.f32.mrb[28].mxu0 }
 0x12e   :  { %v985_v42 = vpop.f32.mrb[29].mxu0 }
 0x12f   :  { %v694_v43 = vadd.f32 %v1271_v59, %v671_v40  ;;  %v986_v45 = vadd.f32 %v985_v42, %v984_v41  ;;  %v987_v47 = vpop.f32.mrb[30].mxu0  ;;  %v709_v46 = vmax.f32 %v693_v39, 0.0 }
 0x130   :  { %v988_v48 = vpop.f32.mrb[31].mxu0 }
 0x131   :  { %v710_v49 = vmax.f32 %v694_v43, 0.0  ;;  %v594_v50 = vadd.f32 %v1291_v44, %v986_v45  ;;  %v989_v52 = vadd.f32 %v988_v48, %v987_v47 }
 0x133   :  { %v912_v53 = vpack.c.bf16 %v710_v49, %v709_v46  ;;  %v672_v54 = vmul.f32 %v1266_v55, %v594_v50  ;;  %v597_v56 = vadd.f32 %v1293_v51, %v989_v52 }
 0x135   :  { %924 = vst [vmem:[%s1339_s4 + $0x30] sm:$0xff] %v912_v53   ;;  %v695_v57 = vadd.f32 %v1271_v59, %v672_v54  ;;  %v673_v58 = vmul.f32 %v1266_v55, %v597_v56 }
 0x137   :  { %v696_v60 = vadd.f32 %v1271_v59, %v673_v58  ;;  %v711_v61 = vmax.f32 %v695_v57, 0.0 }
 0x139   :  { %v712_v62 = vmax.f32 %v696_v60, 0.0 }
 0x13b   :  { %v917_v63 = vpack.c.bf16 %v712_v62, %v711_v61 }
 0x13d   :  { %925 = vst [vmem:[%s1339_s4 + $0x38] sm:$0xff] %v917_v63  }

// kernel: deeplab_forward.21
= control target key start
LH: loop header
LB: loop body
LE: loop exit
PB: predicated region body
PF: predicated region fallthrough
CT: control target
= control target key end

     0   :  { %s1273_s15 = smov 0   ;;  %s1275_s16 = smov 0   ;;  %s1444_s0 = inlined_call_operand.vmem [shape: bf16[128,640], index: 0, kind: input, shape index: {}]   ;;  %s1445_s1 = inlined_call_operand.vmem [shape: bf16[640,128], index: 1, kind: input, shape index: {}]   ;;  %s1446_s2 = inlined_call_operand.vmem [shape: f32[1,128], index: 2, kind: input, shape index: {}]   ;;  %s1447_s3 = inlined_call_operand.vmem [shape: f32[1,128], index: 3, kind: input, shape index: {}]   ;;  %s1448_s4 = inlined_call_operand.vmem [shape: bf16[128,128], index: 4, kind: output, shape index: {}]  }
   0x1   :  { %s1277_s17 = smov 0   ;;  %s1279_s18 = smov 0  }
   0x2   :  { %s1281_s19 = smov 0  }
   0x3 LB: > { %s26_s20 = sadd.s32 1, %s1241_s18  ;;  %p49_p1 = scmp.ne.s32.totalorder %s1233_s16, %s1229_s15  ;;  %s1245_s19 = sphi %s1281_s19, %s14_s19   ;;  %s1241_s18 = sphi %s1279_s18, %s1452_s18   ;;  %s1237_s17 = sphi %s1277_s17, %s1451_s17   ;;  %s1233_s16 = sphi %s1275_s16, %s1450_s16   ;;  %s1229_s15 = sphi %s1273_s15, %s1449_s15  }
   0x4   : > { %p27_p0 = scmp.ge.s32.totalorder %s26_s20, 5  ;;  %p50_p2 = scmp.eq.s32.totalorder %s1245_s19, 0 }
   0x5   : > { %s42_s22 = sadd.s32 1, %s1233_s16  ;;  %p976_p5 = scmp.ge.s32.totalorder %s1245_s19, 5 }
   0x6   : > { %s1454_s20 = smov (%p27_p0, %s26_s20), 0  ;;  %p51_p3 = por %p50_p2, %p49_p1 }
   0x7   : > { %s38_s21 = ssub.s32 %s1241_s18, %s1454_s20  ;;  %195 = sbr.rel (%p976_p5) target bundleno = 28 (0x1c), region = 24 }
   0x8   : > { %p40_p4 = scmp.eq.s32.totalorder %s38_s21, 0 }
   0xa   : > { %s1308_s23 = scalar_select %p40_p4, %s1233_s16, %s42_s22  }
   0xe   : > { %198 = sbr.rel (!%p51_p3) target bundleno = 28 (0x1c), region = 28  ;;  %s200_s24 = sand.u32 (%p51_p3), 1, %s1233_s16  }
   0xf   : > { %s978_s25 = sshll.u32 (%p51_p3), %s1241_s18, 2  ;;  %s977_s26 = sshll.u32 (%p51_p3), %s200_s24, 6 }
  0x10   : > { %s1316_s29 = scalar_lea.vmem (%p51_p3), %s1444_s0, %s978_s25  ;;  %s202_s30 = scalar_lea.vmem (%p51_p3), [#allocation3], %s977_s26 }
  0x11   : > { %v223_v0 = vld [vmem:[%s1316_s29] sm:$0xf] (%p51_p3)  ;;  %v225_v1 = vld [vmem:[%s1316_s29 + $0x14] sm:$0xf] (%p51_p3)  ;;  %v227_v2 = vld [vmem:[%s1316_s29 + $0x28] sm:$0xf] (%p51_p3) }
  0x12   : > { %224 = vst [vmem:[%s202_s30] sm:$0xf] (%p51_p3), %v223_v0  ;;  %226 = vst [vmem:[%s202_s30 + $0x4] sm:$0xf] (%p51_p3), %v225_v1  ;;  %v229_v3 = vld [vmem:[%s1316_s29 + $0x3c] sm:$0xf] (%p51_p3) }
  0x13   : > { %v231_v4 = vld [vmem:[%s1316_s29 + $0x50] sm:$0xf] (%p51_p3)  ;;  %228 = vst [vmem:[%s202_s30 + $0x8] sm:$0xf] (%p51_p3), %v227_v2  ;;  %230 = vst [vmem:[%s202_s30 + $0xc] sm:$0xf] (%p51_p3), %v229_v3 }
  0x14   : > { %232 = vst [vmem:[%s202_s30 + $0x10] sm:$0xf] (%p51_p3), %v231_v4  ;;  %v233_v5 = vld [vmem:[%s1316_s29 + $0x64] sm:$0xf] (%p51_p3)  ;;  %v235_v6 = vld [vmem:[%s1316_s29 + $0x78] sm:$0xf] (%p51_p3) }
  0x15   : > { %v237_v7 = vld [vmem:[%s1316_s29 + $0x8c] sm:$0xf]  ;;  %234 = vst [vmem:[%s202_s30 + $0x14] sm:$0xf] %v233_v5  ;;  %236 = vst [vmem:[%s202_s30 + $0x18] sm:$0xf] %v235_v6 }
  0x16   : > { %238 = vst [vmem:[%s202_s30 + $0x1c] sm:$0xf] %v237_v7  ;;  %v239_v8 = vld [vmem:[%s1316_s29 + $0xa0] sm:$0xf]  ;;  %v241_v9 = vld [vmem:[%s1316_s29 + $0xb4] sm:$0xf] }
  0x17   : > { %v243_v10 = vld [vmem:[%s1316_s29 + $0xc8] sm:$0xf]  ;;  %240 = vst [vmem:[%s202_s30 + $0x20] sm:$0xf] %v239_v8  ;;  %242 = vst [vmem:[%s202_s30 + $0x24] sm:$0xf] %v241_v9 }
  0x18   : > { %244 = vst [vmem:[%s202_s30 + $0x28] sm:$0xf] %v243_v10  ;;  %v245_v11 = vld [vmem:[%s1316_s29 + $0xdc] sm:$0xf]  ;;  %v247_v12 = vld [vmem:[%s1316_s29 + $0xf0] sm:$0xf] }
  0x19   : > { %v249_v13 = vld [vmem:[%s1316_s29 + $0x104] sm:$0xf]  ;;  %246 = vst [vmem:[%s202_s30 + $0x2c] sm:$0xf] %v245_v11  ;;  %248 = vst [vmem:[%s202_s30 + $0x30] sm:$0xf] %v247_v12 }
  0x1a   : > { %250 = vst [vmem:[%s202_s30 + $0x34] sm:$0xf] %v249_v13  ;;  %v251_v14 = vld [vmem:[%s1316_s29 + $0x118] sm:$0xf]  ;;  %v253_v15 = vld [vmem:[%s1316_s29 + $0x12c] sm:$0xf] }
  0x1b   : > { %252 = vst [vmem:[%s202_s30 + $0x38] sm:$0xf] %v251_v14  ;;  %254 = vst [vmem:[%s202_s30 + $0x3c] sm:$0xf] %v253_v15 }
  0x1c PF: > { %p979_p6 = scmp.ge.s32.totalorder %s1245_s19, 1  ;;  %p320_p7 = scmp.lt.s32.totalorder %s1245_s19, 6 }
  0x1e   : > { %p321_p8 = pnand %p979_p6, %p320_p7 }
  0x1f   : > { %s327_s5 = sand.u32 (!%p321_p8), 1, %s1229_s15   ;;  %s981_s6 = sshll.u32 (!%p321_p8), %s1237_s17, 4 }
  0x20   : > { %324 = sbr.rel (%p321_p8) target bundleno = 325 (0x145), region = 73  ;;  %s980_s7 = sshll.u32 (!%p321_p8), %s327_s5, 6 }
  0x21   : > { %p371_p9 = scmp.lt.s32.totalorder (!%p321_p8), %s981_s6, 79  ;;  %s1343_s12 = scalar_lea.vmem (!%p321_p8), [#allocation3], %s980_s7 }
  0x22   : > { %p983_p10 = scmp.ne.s32.totalorder (!%p321_p8), %s1237_s17, 0 }
  0x27   : > { %s1456_s6 = smov (!%p371_p9, %s981_s6), 79  ;;  %398 = sbr.rel (%p983_p10) target bundleno = 49 (0x31), region = 81 }
  0x28   : > { %s982_s8 = sshll.u32 %s1456_s6, 2  ;;  %v1247_v16 = vmov (!%p983_p10), 0.0  }
  0x29   : > { %s1341_s11 = scalar_lea.vmem %s1445_s1, %s982_s8  ;;  %399 = vst [vmem:[#allocation2] sm:$0xff] (!%p983_p10), %v1247_v16  ;;  %400 = vst [vmem:[#allocation2 + $0x8] sm:$0xff] (!%p983_p10), %v1247_v16 }
  0x2a   : > { %401 = vst [vmem:[#allocation2 + $0x10] sm:$0xff] (!%p983_p10), %v1247_v16  ;;  %402 = vst [vmem:[#allocation2 + $0x18] sm:$0xff] (!%p983_p10), %v1247_v16 }
  0x2b   : > { %403 = vst [vmem:[#allocation2 + $0x20] sm:$0xff] (!%p983_p10), %v1247_v16  ;;  %404 = vst [vmem:[#allocation2 + $0x28] sm:$0xff] (!%p983_p10), %v1247_v16 }
  0x2c   : > { %405 = vst [vmem:[#allocation2 + $0x30] sm:$0xff] (!%p983_p10), %v1247_v16  ;;  %406 = vst [vmem:[#allocation2 + $0x38] sm:$0xff] (!%p983_p10), %v1247_v16 }
  0x2d   : > { %407 = vst [vmem:[#allocation2 + $0x40] sm:$0xff] (!%p983_p10), %v1247_v16  ;;  %408 = vst [vmem:[#allocation2 + $0x48] sm:$0xff] (!%p983_p10), %v1247_v16 }
  0x2e   : > { %409 = vst [vmem:[#allocation2 + $0x50] sm:$0xff] %v1247_v16  ;;  %410 = vst [vmem:[#allocation2 + $0x58] sm:$0xff] %v1247_v16 }
  0x2f   : > { %411 = vst [vmem:[#allocation2 + $0x60] sm:$0xff] %v1247_v16  ;;  %412 = vst [vmem:[#allocation2 + $0x68] sm:$0xff] %v1247_v16 }
  0x30   : > { %413 = vst [vmem:[#allocation2 + $0x70] sm:$0xff] %v1247_v16  ;;  %414 = vst [vmem:[#allocation2 + $0x78] sm:$0xff] %v1247_v16 }
  0x31 PF: > { %v1191_v17 = vld [vmem:[%s1341_s11] sm:$0xff]   ;;  %v1192_v18 = vld [vmem:[%s1341_s11 + $0x8] sm:$0xff]   ;;  %v1193_v19 = vld [vmem:[%s1341_s11 + $0x10] sm:$0xff]   ;;  %p1000_p11 = scmp.ne.s32.totalorder %s1237_s17, 4 }
  0x32   : > { %1102 = vmatprep.subr.bf16.mxu0 %v1191_v17  ;;  %1134 = vmatprep.subr.bf16.mxu1 %v1191_v17  ;;  %v1194_v20 = vld [vmem:[%s1341_s11 + $0x18] sm:$0xff]   ;;  %v1199_v21 = vld [vmem:[%s1343_s12] sm:$0xff]   ;;  %v1196_v24 = vld [vmem:[%s1341_s11 + $0x28] sm:$0xff]  }
  0x33   : > { %1103 = vmatpush3.bf16.msra.mxu0 %v1191_v17  ;;  %1142 = vmatpush3.bf16.msra.mxu1 %v1191_v17  ;;  %v1200_v22 = vld [vmem:[%s1343_s12 + $0x20] sm:$0xff]   ;;  %v1197_v25 = vld [vmem:[%s1341_s11 + $0x30] sm:$0xff]   ;;  %v1198_v26 = vld [vmem:[%s1341_s11 + $0x38] sm:$0xff]  }
  0x34   : > { %1104 = vmatprep.subr.bf16.mxu0 %v1192_v18  ;;  %1135 = vmatprep.subr.bf16.mxu1 %v1192_v18  ;;  %v1195_v23 = vld [vmem:[%s1341_s11 + $0x20] sm:$0xff]   ;;  %v1201_v27 = vld [vmem:[%s1343_s12 + $0x8] sm:$0xff]   ;;  %v1203_v29 = vld [vmem:[%s1343_s12 + $0x10] sm:$0xff]  }
  0x35   : > { %1118 = vmatprep.mubr.bf16.mxu0 %v1199_v21  ;;  %1126 = vmatprep.mubr.bf16.mxu1 %v1200_v22  ;;  %v1202_v28 = vld [vmem:[%s1343_s12 + $0x28] sm:$0xff]   ;;  %v1204_v30 = vld [vmem:[%s1343_s12 + $0x30] sm:$0xff]   ;;  %v1205_v31 = vld [vmem:[%s1343_s12 + $0x18] sm:$0xff]  }
  0x36   : > { %v1206_v32 = vld [vmem:[%s1343_s12 + $0x38] sm:$0xff]   ;;  %v417_v33 = vld [vmem:[#allocation2 + $0x10] sm:$0xff]  ;;  %v415_v35 = vld [vmem:[#allocation2] sm:$0xff] }
  0x37   : > { %1105 = vmatpush3.bf16.msra.mxu0 %v1192_v18  ;;  %1143 = vmatpush3.bf16.msra.mxu1 %v1192_v18  ;;  %v425_v34 = vld [vmem:[#allocation2 + $0x50] sm:$0xff]  ;;  %v423_v36 = vld [vmem:[#allocation2 + $0x40] sm:$0xff]  ;;  %v418_v39 = vld [vmem:[#allocation2 + $0x18] sm:$0xff] }
  0x38   : > { %1106 = vmatprep.subr.bf16.mxu0 %v1193_v19  ;;  %1136 = vmatprep.subr.bf16.mxu1 %v1193_v19  ;;  %v426_v40 = vld [vmem:[#allocation2 + $0x58] sm:$0xff]  ;;  %v416_v45 = vld [vmem:[#allocation2 + $0x8] sm:$0xff]  ;;  %v421_v57 = vld [vmem:[#allocation2 + $0x30] sm:$0xff] }
  0x39   : > { %v424_v46 = vld [vmem:[#allocation2 + $0x48] sm:$0xff]  ;;  %v429_v58 = vld [vmem:[#allocation2 + $0x70] sm:$0xff]  ;;  %v419_v59 = vld [vmem:[#allocation2 + $0x20] sm:$0xff] }
  0x3a   : > { %v427_v60 = vld [vmem:[#allocation2 + $0x60] sm:$0xff]  ;;  %v422_v63 = vld [vmem:[#allocation2 + $0x38] sm:$0xff]  ;;  %v420_v5 = vld [vmem:[#allocation2 + $0x28] sm:$0xff] }
  0x3b   : > { %1107 = vmatpush3.bf16.msra.mxu0 %v1193_v19  ;;  %1144 = vmatpush3.bf16.msra.mxu1 %v1193_v19  ;;  %v430_v0 = vld [vmem:[#allocation2 + $0x78] sm:$0xff]  ;;  %v428_v6 = vld [vmem:[#allocation2 + $0x68] sm:$0xff]  ;;  %v1366_v19 = vld [vmem:[%s1446_s2] ss:$0 sm:$0xff] (!%p1000_p11) }
  0x3c   : > { %1108 = vmatprep.subr.bf16.mxu0 %v1194_v20  ;;  %1137 = vmatprep.subr.bf16.mxu1 %v1194_v20  ;;  %v1373_v22 = vld [vmem:[%s1447_s3] ss:$0 sm:$0xff] (!%p1000_p11) }
  0x3f   : > { %1109 = vmatpush3.bf16.msra.mxu0 %v1194_v20  ;;  %1145 = vmatpush3.bf16.msra.mxu1 %v1194_v20 }
  0x40   : > { %1110 = vmatprep.subr.bf16.mxu0 %v1195_v23  ;;  %1138 = vmatprep.subr.bf16.mxu1 %v1195_v23 }
  0x43   : > { %1111 = vmatpush3.bf16.msra.mxu0 %v1195_v23  ;;  %1146 = vmatpush3.bf16.msra.mxu1 %v1195_v23 }
  0x44   : > { %1112 = vmatprep.subr.bf16.mxu0 %v1196_v24  ;;  %1139 = vmatprep.subr.bf16.mxu1 %v1196_v24 }
  0x47   : > { %1113 = vmatpush3.bf16.msra.mxu0 %v1196_v24  ;;  %1147 = vmatpush3.bf16.msra.mxu1 %v1196_v24 }
  0x48   : > { %1114 = vmatprep.subr.bf16.mxu0 %v1197_v25  ;;  %1140 = vmatprep.subr.bf16.mxu1 %v1197_v25 }
  0x4b   : > { %1115 = vmatpush3.bf16.msra.mxu0 %v1197_v25  ;;  %1148 = vmatpush3.bf16.msra.mxu1 %v1197_v25 }
  0x4c   : > { %1116 = vmatprep.subr.bf16.mxu0 %v1198_v26  ;;  %1141 = vmatprep.subr.bf16.mxu1 %v1198_v26 }
  0x4f   : > { %1117 = vmatpush3.bf16.msra.mxu0 %v1198_v26  ;;  %1149 = vmatpush3.bf16.msra.mxu1 %v1198_v26 }
  0x52   : > { %1119 = vmatmul.mubr.bf16.vlgmr.msra.gmra.mrb[0].mxu0 %v1201_v27  ;;  %1127 = vmatmul.mubr.bf16.vlgmr.msra.gmra.mrb[0].mxu1 %v1202_v28 }
  0x53   : > { %1122 = vmatprep.mubr.bf16.mxu0 %v1203_v29  ;;  %1130 = vmatprep.mubr.bf16.mxu1 %v1204_v30 }
  0x5a   : > { %1123 = vmatmul.mubr.bf16.gmra.mrb[4].mxu0 %v1205_v31  ;;  %1131 = vmatmul.mubr.bf16.gmra.mrb[4].mxu1 %v1206_v32 }
 0x125   : > { %v1120_v37 = vpop.f32.mrb[0].mxu0  ;;  %v1128_v38 = vpop.f32.mrb[0].mxu1 }
 0x126   : > { %v658_v41 = vadd.f32 %v1120_v37, %v417_v33  ;;  %v666_v42 = vadd.f32 %v1128_v38, %v425_v34  ;;  %v593_v43 = vpop.f32.mrb[1].mxu0  ;;  %v625_v44 = vpop.f32.mrb[1].mxu1 }
 0x127   : > { %v656_v47 = vadd.f32 %v593_v43, %v415_v35  ;;  %v664_v48 = vadd.f32 %v625_v44, %v423_v36  ;;  %v1121_v49 = vpop.f32.mrb[2].mxu0  ;;  %v1129_v50 = vpop.f32.mrb[2].mxu1 }
 0x128   : > { %674 = vst [vmem:[#allocation2 + $0x10] sm:$0xff] %v658_v41  ;;  %682 = vst [vmem:[#allocation2 + $0x50] sm:$0xff] %v666_v42  ;;  %v659_v51 = vadd.f32 %v1121_v49, %v418_v39  ;;  %v667_v52 = vadd.f32 %v1129_v50, %v426_v40  ;;  %v596_v53 = vpop.f32.mrb[3].mxu0  ;;  %v628_v54 = vpop.f32.mrb[3].mxu1 }
 0x129   : > { %672 = vst [vmem:[#allocation2] sm:$0xff] %v656_v47  ;;  %680 = vst [vmem:[#allocation2 + $0x40] sm:$0xff] %v664_v48  ;;  %v657_v55 = vadd.f32 %v596_v53, %v416_v45  ;;  %v665_v56 = vadd.f32 %v628_v54, %v424_v46 }
 0x12a   : > { %675 = vst [vmem:[#allocation2 + $0x18] sm:$0xff] %v659_v51  ;;  %683 = vst [vmem:[#allocation2 + $0x58] sm:$0xff] %v667_v52 }
 0x12b   : > { %673 = vst [vmem:[#allocation2 + $0x8] sm:$0xff] %v657_v55  ;;  %681 = vst [vmem:[#allocation2 + $0x48] sm:$0xff] %v665_v56 }
 0x12d   : > { %v1124_v61 = vpop.f32.mrb[4].mxu0  ;;  %v1132_v62 = vpop.f32.mrb[4].mxu1  ;;  %691 = sbr.rel (%p1000_p11) target bundleno = 325 (0x145), region = 85 }
 0x12e   : > { %v662_v1 = vadd.f32 %v1124_v61, %v421_v57  ;;  %v670_v2 = vadd.f32 %v1132_v62, %v429_v58  ;;  %v609_v3 = vpop.f32.mrb[5].mxu0  ;;  %v641_v4 = vpop.f32.mrb[5].mxu1 }
 0x12f   : > { %v660_v7 = vadd.f32 %v609_v3, %v419_v59  ;;  %v668_v8 = vadd.f32 %v641_v4, %v427_v60  ;;  %v1125_v9 = vpop.f32.mrb[6].mxu0  ;;  %v1133_v10 = vpop.f32.mrb[6].mxu1  ;;  %v694_v23 = vld [vmem:[#allocation2 + $0x10] sm:$0xff] (!%p1000_p11) }
 0x130   : > { %678 = vst [vmem:[#allocation2 + $0x30] sm:$0xff] %v662_v1  ;;  %686 = vst [vmem:[#allocation2 + $0x70] sm:$0xff] %v670_v2  ;;  %v663_v11 = vadd.f32 %v1125_v9, %v422_v63  ;;  %v671_v12 = vadd.f32 %v1133_v10, %v430_v0  ;;  %v612_v13 = vpop.f32.mrb[7].mxu0  ;;  %v644_v14 = vpop.f32.mrb[7].mxu1  ;;  %v692_v17 = vld [vmem:[#allocation2] sm:$0xff] (!%p1000_p11)  ;;  %v717_v25 = vmul.f32 (!%p1000_p11), %v1366_v19, %v694_v23  ;;  %v702_v49 = vld [vmem:[#allocation2 + $0x50] sm:$0xff] (!%p1000_p11) }
 0x131   : > { %676 = vst [vmem:[#allocation2 + $0x20] sm:$0xff] %v660_v7  ;;  %684 = vst [vmem:[#allocation2 + $0x60] sm:$0xff] %v668_v8  ;;  %v661_v15 = vadd.f32 %v612_v13, %v420_v5  ;;  %v669_v16 = vadd.f32 %v644_v14, %v428_v6  ;;  %v715_v20 = vmul.f32 (!%p1000_p11), %v1366_v19, %v692_v17  ;;  %v695_v24 = vld [vmem:[#allocation2 + $0x18] sm:$0xff] (!%p1000_p11)  ;;  %v700_v39 = vld [vmem:[#allocation2 + $0x40] sm:$0xff] (!%p1000_p11) }
 0x132   : > { %679 = vst [vmem:[#allocation2 + $0x38] sm:$0xff] %v663_v11  ;;  %687 = vst [vmem:[#allocation2 + $0x78] sm:$0xff] %v671_v12  ;;  %v693_v18 = vld [vmem:[#allocation2 + $0x8] sm:$0xff] (!%p1000_p11)  ;;  %v718_v26 = vmul.f32 (!%p1000_p11), %v1366_v19, %v695_v24  ;;  %v740_v35 = vadd.f32 (!%p1000_p11), %v1373_v22, %v717_v25  ;;  %v703_v50 = vld [vmem:[#allocation2 + $0x58] sm:$0xff] (!%p1000_p11)  ;;  %v723_v54 = vmul.f32 (!%p1000_p11), %v1366_v19, %v700_v39 }
 0x133   : > { %677 = vst [vmem:[#allocation2 + $0x28] sm:$0xff] %v661_v15  ;;  %685 = vst [vmem:[#allocation2 + $0x68] sm:$0xff] %v669_v16  ;;  %v716_v21 = vmul.f32 (!%p1000_p11), %v1366_v19, %v693_v18  ;;  %v738_v30 = vadd.f32 (!%p1000_p11), %v1373_v22, %v715_v20  ;;  %v701_v44 = vld [vmem:[#allocation2 + $0x48] sm:$0xff] (!%p1000_p11)  ;;  %v725_v0 = vmul.f32 (!%p1000_p11), %v1366_v19, %v702_v49 }
 0x134   : > { %v741_v36 = vadd.f32 %v1373_v22, %v718_v26  ;;  %v756_v45 = vmax.f32 %v740_v35, 0.0  ;;  %v724_v60 = vmul.f32 %v1366_v19, %v701_v44  ;;  %v746_v63 = vadd.f32 %v1373_v22, %v723_v54 }
 0x135   : > { %v739_v31 = vadd.f32 %v1373_v22, %v716_v21  ;;  %v754_v40 = vmax.f32 %v738_v30, 0.0  ;;  %v726_v1 = vmul.f32 %v1366_v19, %v703_v50  ;;  %v748_v8 = vadd.f32 %v1373_v22, %v725_v0 }
 0x136   : > { %v757_v46 = vmax.f32 %v741_v36, 0.0  ;;  %v747_v4 = vadd.f32 %v1373_v22, %v724_v60  ;;  %v762_v7 = vmax.f32 %v746_v63, 0.0 }
 0x137   : > { %v698_v29 = vld [vmem:[#allocation2 + $0x30] sm:$0xff]  ;;  %v755_v41 = vmax.f32 %v739_v31, 0.0  ;;  %v749_v9 = vadd.f32 %v1373_v22, %v726_v1  ;;  %v764_v15 = vmax.f32 %v748_v8, 0.0 }
 0x138   : > { %v696_v27 = vld [vmem:[#allocation2 + $0x20] sm:$0xff]  ;;  %v721_v37 = vmul.f32 %v1366_v19, %v698_v29  ;;  %v1047_v57 = vpack.c.bf16 %v757_v46, %v756_v45  ;;  %v706_v61 = vld [vmem:[#allocation2 + $0x70] sm:$0xff]  ;;  %v763_v11 = vmax.f32 %v747_v4, 0.0 }
 0x139   : > { %v719_v32 = vmul.f32 %v1366_v19, %v696_v27  ;;  %v699_v34 = vld [vmem:[#allocation2 + $0x38] sm:$0xff]  ;;  %v1042_v51 = vpack.c.bf16 %v755_v41, %v754_v40  ;;  %v704_v55 = vld [vmem:[#allocation2 + $0x60] sm:$0xff]  ;;  %v729_v10 = vmul.f32 %v1366_v19, %v706_v61  ;;  %v765_v16 = vmax.f32 %v749_v9, 0.0 }
 0x13a   : > { %v697_v28 = vld [vmem:[#allocation2 + $0x28] sm:$0xff]  ;;  %v722_v38 = vmul.f32 %v1366_v19, %v699_v34  ;;  %v744_v47 = vadd.f32 %v1373_v22, %v721_v37  ;;  %v707_v2 = vld [vmem:[#allocation2 + $0x78] sm:$0xff]  ;;  %1079 = vst [vmem:[%s1448_s4 + $0x8] sm:$0xff] %v1047_v57   ;;  %v727_v5 = vmul.f32 %v1366_v19, %v704_v55  ;;  %v1062_v18 = vpack.c.bf16 %v763_v11, %v762_v7 }
 0x13b   : > { %v720_v33 = vmul.f32 %v1366_v19, %v697_v28  ;;  %v742_v42 = vadd.f32 %v1373_v22, %v719_v32  ;;  %v705_v56 = vld [vmem:[#allocation2 + $0x68] sm:$0xff]  ;;  %1043 = vst [vmem:[%s1448_s4] sm:$0xff] %v1042_v51   ;;  %v730_v14 = vmul.f32 %v1366_v19, %v707_v2  ;;  %v752_v17 = vadd.f32 %v1373_v22, %v729_v10 }
 0x13c   : > { %v745_v48 = vadd.f32 %v1373_v22, %v722_v38  ;;  %v760_v58 = vmax.f32 %v744_v47, 0.0  ;;  %v728_v6 = vmul.f32 %v1366_v19, %v705_v56  ;;  %v750_v12 = vadd.f32 %v1373_v22, %v727_v5  ;;  %1082 = vst [vmem:[%s1448_s4 + $0x20] sm:$0xff] %v1062_v18  }
 0x13d   : > { %v743_v43 = vadd.f32 %v1373_v22, %v720_v33  ;;  %v758_v52 = vmax.f32 %v742_v42, 0.0  ;;  %v753_v23 = vadd.f32 %v1373_v22, %v730_v14  ;;  %v1067_v24 = vpack.c.bf16 %v765_v16, %v764_v15 }
 0x13e   : > { %v761_v59 = vmax.f32 %v745_v48, 0.0  ;;  %v751_v13 = vadd.f32 %v1373_v22, %v728_v6  ;;  %v766_v20 = vmax.f32 %v750_v12, 0.0  ;;  %v768_v25 = vmax.f32 %v752_v17, 0.0 }
 0x13f   : > { %v759_v53 = vmax.f32 %v743_v43, 0.0  ;;  %v769_v27 = vmax.f32 %v753_v23, 0.0  ;;  %1083 = vst [vmem:[%s1448_s4 + $0x28] sm:$0xff] %v1067_v24  }
 0x140   : > { %v1057_v3 = vpack.c.bf16 %v761_v59, %v760_v58  ;;  %v767_v21 = vmax.f32 %v751_v13, 0.0 }
 0x141   : > { %v1052_v62 = vpack.c.bf16 %v759_v53, %v758_v52  ;;  %v1077_v19 = vpack.c.bf16 %v769_v27, %v768_v25 }
 0x142   : > { %1081 = vst [vmem:[%s1448_s4 + $0x18] sm:$0xff] %v1057_v3   ;;  %v1072_v26 = vpack.c.bf16 %v767_v21, %v766_v20 }
 0x143   : > { %1080 = vst [vmem:[%s1448_s4 + $0x10] sm:$0xff] %v1052_v62   ;;  %1085 = vst [vmem:[%s1448_s4 + $0x38] sm:$0xff] %v1077_v19  }
 0x144   : > { %1084 = vst [vmem:[%s1448_s4 + $0x30] sm:$0xff] %v1072_v26  }
 0x145 PF: > { %s14_s19 = sadd.s32 1, %s1245_s19   ;;  %s1449_s15 = smov %s1233_s16 }
 0x146   : > { %p11_p12 = scmp.ge.s32.totalorder %s14_s19, 7   ;;  %s1450_s16 = smov %s1308_s23 }
 0x147   : > { %s1451_s17 = smov %s1241_s18  ;;  %s1452_s18 = smov %s1454_s20 }
 0x148   :  { %13 = sbr.rel (!%p11_p12) target bundleno = 3 (0x3), region = 129 }

// kernel: deeplab_forward.27
= control target key start
LH: loop header
LB: loop body
LE: loop exit
PB: predicated region body
PF: predicated region fallthrough
CT: control target
= control target key end

     0   :  { %s622_s9 = smov 0   ;;  %s677_s0 = inlined_call_operand.vmem [shape: f32[64,128], index: 0, kind: input, shape index: {}]   ;;  %s678_s1 = inlined_call_operand.vmem [shape: bf16[2,128,128], index: 1, kind: input, shape index: {}]   ;;  %s679_s2 = inlined_call_operand.vmem [shape: bf16[2,64,128], index: 2, kind: output, shape index: {}]  }
   0x1 LB: > { %s384_s10 = sadd.s32 4294967295, %s605_s9   ;;  %p388_p0 = scmp.ge.s32.totalorder %s605_s9, 1  ;;  %s605_s9 = sphi %s622_s9, %s12_s9  }
   0x2   : > { %p112_p1 = scmp.lt.s32.totalorder %s605_s9, 3 }
   0x4   : > { %p113_p2 = pnand %p388_p0, %p112_p1 }
   0x5   : > { %p134_p3 = scmp.lt.s32.totalorder (!%p113_p2), %s384_s10, 1  ;;  %v144_v0 = vld [vmem:[%s677_s0] sm:$0xff] (!%p113_p2)  ;;  %v145_v10 = vld [vmem:[%s677_s0 + $0x8] sm:$0xff] (!%p113_p2)  ;;  %v146_v12 = vld [vmem:[%s677_s0 + $0x10] sm:$0xff] (!%p113_p2) }
   0x6   : > { %116 = sbr.rel (%p113_p2) target bundleno = 269 (0x10d), region = 28  ;;  %v148_v1 = vld [vmem:[%s677_s0 + $0x20] sm:$0xff] (!%p113_p2)  ;;  %531 = vmatprep.mubr.f32.mxu0 (!%p113_p2), %v144_v0  ;;  %v149_v11 = vld [vmem:[%s677_s0 + $0x28] sm:$0xff] (!%p113_p2)  ;;  %v150_v13 = vld [vmem:[%s677_s0 + $0x30] sm:$0xff] (!%p113_p2) }
   0x7   : > { %537 = vmatprep.mubr.f32.mxu1 (!%p113_p2), %v148_v1  ;;  %v147_v14 = vld [vmem:[%s677_s0 + $0x18] sm:$0xff] (!%p113_p2) }
   0x8   : > { %v151_v15 = vld [vmem:[%s677_s0 + $0x38] sm:$0xff] (!%p113_p2) }
   0xd   : > { %s681_s10 = smov (!%p134_p3, %s384_s10), 1 }
   0xe   : > { %s403_s15 = sshll.u32 %s681_s10, 6  ;;  %s404_s3 = sshll.u32 %s681_s10, 5 }
   0xf   : > { %s642_s18 = scalar_lea.vmem %s678_s1, %s403_s15  ;;  %s143_s6 = scalar_lea.vmem %s679_s2, %s404_s3 }
  0x10   : > { %v414_v2 = vld [vmem:[%s642_s18] sm:$0xff]   ;;  %v465_v3 = vld [vmem:[%s642_s18 + $0x8] sm:$0xff]   ;;  %v466_v4 = vld [vmem:[%s642_s18 + $0x10] sm:$0xff]  }
  0x11   : > { %544 = vmatprep.subr.bf16.mxu0 %v414_v2  ;;  %575 = vmatprep.subr.bf16.mxu1 %v414_v2  ;;  %v467_v5 = vld [vmem:[%s642_s18 + $0x18] sm:$0xff]   ;;  %v468_v6 = vld [vmem:[%s642_s18 + $0x20] sm:$0xff]   ;;  %v469_v7 = vld [vmem:[%s642_s18 + $0x28] sm:$0xff]  }
  0x12   : > { %546 = vmatpush3.bf16.msra.mxu0 %v414_v2  ;;  %583 = vmatpush3.bf16.msra.mxu1 %v414_v2  ;;  %v470_v8 = vld [vmem:[%s642_s18 + $0x30] sm:$0xff]   ;;  %v471_v9 = vld [vmem:[%s642_s18 + $0x38] sm:$0xff]  }
  0x13   : > { %548 = vmatprep.subr.bf16.mxu0 %v465_v3  ;;  %576 = vmatprep.subr.bf16.mxu1 %v465_v3 }
  0x16   : > { %550 = vmatpush3.bf16.msra.mxu0 %v465_v3  ;;  %584 = vmatpush3.bf16.msra.mxu1 %v465_v3 }
  0x17   : > { %552 = vmatprep.subr.bf16.mxu0 %v466_v4  ;;  %577 = vmatprep.subr.bf16.mxu1 %v466_v4 }
  0x1a   : > { %554 = vmatpush3.bf16.msra.mxu0 %v466_v4  ;;  %585 = vmatpush3.bf16.msra.mxu1 %v466_v4 }
  0x1b   : > { %556 = vmatprep.subr.bf16.mxu0 %v467_v5  ;;  %578 = vmatprep.subr.bf16.mxu1 %v467_v5 }
  0x1e   : > { %558 = vmatpush3.bf16.msra.mxu0 %v467_v5  ;;  %586 = vmatpush3.bf16.msra.mxu1 %v467_v5 }
  0x1f   : > { %560 = vmatprep.subr.bf16.mxu0 %v468_v6  ;;  %579 = vmatprep.subr.bf16.mxu1 %v468_v6 }
  0x22   : > { %562 = vmatpush3.bf16.msra.mxu0 %v468_v6  ;;  %587 = vmatpush3.bf16.msra.mxu1 %v468_v6 }
  0x23   : > { %564 = vmatprep.subr.bf16.mxu0 %v469_v7  ;;  %580 = vmatprep.subr.bf16.mxu1 %v469_v7 }
  0x26   : > { %566 = vmatpush3.bf16.msra.mxu0 %v469_v7  ;;  %588 = vmatpush3.bf16.msra.mxu1 %v469_v7 }
  0x27   : > { %568 = vmatprep.subr.bf16.mxu0 %v470_v8  ;;  %581 = vmatprep.subr.bf16.mxu1 %v470_v8 }
  0x2a   : > { %570 = vmatpush3.bf16.msra.mxu0 %v470_v8  ;;  %589 = vmatpush3.bf16.msra.mxu1 %v470_v8 }
  0x2b   : > { %572 = vmatprep.subr.bf16.mxu0 %v471_v9  ;;  %582 = vmatprep.subr.bf16.mxu1 %v471_v9 }
  0x2e   : > { %574 = vmatpush3.bf16.msra.mxu0 %v471_v9  ;;  %590 = vmatpush3.bf16.msra.mxu1 %v471_v9 }
  0x31   : > { %532 = vmatmul.mubr.f32.vlgmr.msra.gmra.mrb[0].mxu0 %v145_v10  ;;  %538 = vmatmul.mubr.f32.vlgmr.msra.gmra.mrb[0].mxu1 %v149_v11 }
  0x32   : > { %534 = vmatprep.mubr.f32.mxu0 %v146_v12  ;;  %540 = vmatprep.mubr.f32.mxu1 %v150_v13 }
  0x35   : > { %535 = vmatmul.mubr.f32.gmra.mrb[2].mxu0 %v147_v14  ;;  %541 = vmatmul.mubr.f32.gmra.mrb[2].mxu1 %v151_v15 }
 0x104   : > { %v533_v16 = vpop.f32.mrb[0].mxu0  ;;  %v539_v17 = vpop.f32.mrb[0].mxu1 }
 0x105   : > { %v250_v18 = vpop.f32.mrb[1].mxu0  ;;  %v270_v19 = vpop.f32.mrb[1].mxu1 }
 0x106   : > { %v448_v20 = vpack.c.bf16 %v533_v16, %v250_v18  ;;  %v458_v21 = vpack.c.bf16 %v539_v17, %v270_v19 }
 0x108   : > { %449 = vst [vmem:[%s143_s6] sm:$0xff] %v448_v20   ;;  %473 = vst [vmem:[%s143_s6 + $0x10] sm:$0xff] %v458_v21   ;;  %v536_v22 = vpop.f32.mrb[2].mxu0  ;;  %v542_v23 = vpop.f32.mrb[2].mxu1 }
 0x109   : > { %v260_v24 = vpop.f32.mrb[3].mxu0  ;;  %v280_v25 = vpop.f32.mrb[3].mxu1 }
 0x10a   : > { %v453_v26 = vpack.c.bf16 %v536_v22, %v260_v24  ;;  %v463_v27 = vpack.c.bf16 %v542_v23, %v280_v25 }
 0x10c   : > { %472 = vst [vmem:[%s143_s6 + $0x8] sm:$0xff] %v453_v26   ;;  %474 = vst [vmem:[%s143_s6 + $0x18] sm:$0xff] %v463_v27  }
 0x10d PF: > { %s12_s9 = sadd.s32 1, %s605_s9  }
 0x10e   : > { %p9_p4 = scmp.ge.s32.totalorder %s12_s9, 4  }
 0x110   :  { %11 = sbr.rel (!%p9_p4) target bundleno = 1 (0x1), region = 58 }

// kernel: deeplab_forward.30
= control target key start
LH: loop header
LB: loop body
LE: loop exit
PB: predicated region body
PF: predicated region fallthrough
CT: control target
= control target key end

     0   :  { %s621_s1 = inlined_call_operand.vmem [shape: bf16[128,128], index: 1, kind: input, shape index: {}]   ;;  %s622_s0 = inlined_call_operand.vmem [shape: bf16[128,128], index: 0, kind: input, shape index: {}]   ;;  %s623_s2 = inlined_call_operand.vmem [shape: f32[1,128], index: 2, kind: input, shape index: {}]   ;;  %s624_s3 = inlined_call_operand.vmem [shape: f32[1,128], index: 3, kind: input, shape index: {}]   ;;  %s625_s4 = inlined_call_operand.vmem [shape: f32[128,128], index: 4, kind: output, shape index: {}]  }
   0x1   :  { %v478_v0 = vld [vmem:[%s621_s1] sm:$0xff]   ;;  %v479_v1 = vld [vmem:[%s621_s1 + $0x8] sm:$0xff]   ;;  %v480_v2 = vld [vmem:[%s621_s1 + $0x10] sm:$0xff]  }
   0x2   :  { %430 = vmatprep.subr.bf16.mxu0 %v478_v0  ;;  %462 = vmatprep.subr.bf16.mxu1 %v478_v0  ;;  %v481_v3 = vld [vmem:[%s621_s1 + $0x18] sm:$0xff]   ;;  %v486_v4 = vld [vmem:[%s622_s0] sm:$0xff]   ;;  %v483_v7 = vld [vmem:[%s621_s1 + $0x28] sm:$0xff]  }
   0x3   :  { %431 = vmatpush3.bf16.msra.mxu0 %v478_v0  ;;  %470 = vmatpush3.bf16.msra.mxu1 %v478_v0  ;;  %v487_v5 = vld [vmem:[%s622_s0 + $0x20] sm:$0xff]   ;;  %v484_v8 = vld [vmem:[%s621_s1 + $0x30] sm:$0xff]   ;;  %v485_v9 = vld [vmem:[%s621_s1 + $0x38] sm:$0xff]  }
   0x4   :  { %432 = vmatprep.subr.bf16.mxu0 %v479_v1  ;;  %463 = vmatprep.subr.bf16.mxu1 %v479_v1  ;;  %v482_v6 = vld [vmem:[%s621_s1 + $0x20] sm:$0xff]   ;;  %v488_v10 = vld [vmem:[%s622_s0 + $0x8] sm:$0xff]   ;;  %v490_v12 = vld [vmem:[%s622_s0 + $0x10] sm:$0xff]  }
   0x5   :  { %446 = vmatprep.mubr.bf16.mxu0 %v486_v4  ;;  %454 = vmatprep.mubr.bf16.mxu1 %v487_v5  ;;  %v489_v11 = vld [vmem:[%s622_s0 + $0x28] sm:$0xff]   ;;  %v491_v13 = vld [vmem:[%s622_s0 + $0x30] sm:$0xff]   ;;  %v492_v14 = vld [vmem:[%s622_s0 + $0x18] sm:$0xff]  }
   0x6   :  { %v493_v15 = vld [vmem:[%s622_s0 + $0x38] sm:$0xff]   ;;  %v412_v16 = vld [vmem:[%s623_s2] ss:$0 sm:$0xff] }
   0x7   :  { %433 = vmatpush3.bf16.msra.mxu0 %v479_v1  ;;  %471 = vmatpush3.bf16.msra.mxu1 %v479_v1  ;;  %v413_v18 = vld [vmem:[%s624_s3] ss:$0 sm:$0xff] }
   0x8   :  { %434 = vmatprep.subr.bf16.mxu0 %v480_v2  ;;  %464 = vmatprep.subr.bf16.mxu1 %v480_v2 }
   0xb   :  { %435 = vmatpush3.bf16.msra.mxu0 %v480_v2  ;;  %472 = vmatpush3.bf16.msra.mxu1 %v480_v2 }
   0xc   :  { %436 = vmatprep.subr.bf16.mxu0 %v481_v3  ;;  %465 = vmatprep.subr.bf16.mxu1 %v481_v3 }
   0xf   :  { %437 = vmatpush3.bf16.msra.mxu0 %v481_v3  ;;  %473 = vmatpush3.bf16.msra.mxu1 %v481_v3 }
  0x10   :  { %438 = vmatprep.subr.bf16.mxu0 %v482_v6  ;;  %466 = vmatprep.subr.bf16.mxu1 %v482_v6 }
  0x13   :  { %439 = vmatpush3.bf16.msra.mxu0 %v482_v6  ;;  %474 = vmatpush3.bf16.msra.mxu1 %v482_v6 }
  0x14   :  { %440 = vmatprep.subr.bf16.mxu0 %v483_v7  ;;  %467 = vmatprep.subr.bf16.mxu1 %v483_v7 }
  0x17   :  { %441 = vmatpush3.bf16.msra.mxu0 %v483_v7  ;;  %475 = vmatpush3.bf16.msra.mxu1 %v483_v7 }
  0x18   :  { %442 = vmatprep.subr.bf16.mxu0 %v484_v8  ;;  %468 = vmatprep.subr.bf16.mxu1 %v484_v8 }
  0x1b   :  { %443 = vmatpush3.bf16.msra.mxu0 %v484_v8  ;;  %476 = vmatpush3.bf16.msra.mxu1 %v484_v8 }
  0x1c   :  { %444 = vmatprep.subr.bf16.mxu0 %v485_v9  ;;  %469 = vmatprep.subr.bf16.mxu1 %v485_v9 }
  0x1f   :  { %445 = vmatpush3.bf16.msra.mxu0 %v485_v9  ;;  %477 = vmatpush3.bf16.msra.mxu1 %v485_v9 }
  0x22   :  { %447 = vmatmul.mubr.bf16.vlgmr.msra.gmra.mrb[0].mxu0 %v488_v10  ;;  %455 = vmatmul.mubr.bf16.vlgmr.msra.gmra.mrb[0].mxu1 %v489_v11 }
  0x23   :  { %450 = vmatprep.mubr.bf16.mxu0 %v490_v12  ;;  %458 = vmatprep.mubr.bf16.mxu1 %v491_v13 }
  0x2a   :  { %451 = vmatmul.mubr.bf16.gmra.mrb[4].mxu0 %v492_v14  ;;  %459 = vmatmul.mubr.bf16.gmra.mrb[4].mxu1 %v493_v15 }
  0xf5   :  { %v448_v17 = vpop.f32.mrb[0].mxu0  ;;  %v456_v19 = vpop.f32.mrb[0].mxu1 }
  0xf6   :  { %v339_v20 = vmul.f32 %v448_v17, %v412_v16  ;;  %v347_v21 = vmul.f32 %v456_v19, %v412_v16  ;;  %v216_v22 = vpop.f32.mrb[1].mxu0  ;;  %v248_v23 = vpop.f32.mrb[1].mxu1 }
  0xf7   :  { %v337_v24 = vmul.f32 %v412_v16, %v216_v22  ;;  %v345_v25 = vmul.f32 %v412_v16, %v248_v23  ;;  %v449_v26 = vpop.f32.mrb[2].mxu0  ;;  %v457_v27 = vpop.f32.mrb[2].mxu1 }
  0xf8   :  { %v362_v28 = vadd.f32 %v413_v18, %v339_v20  ;;  %v370_v29 = vadd.f32 %v413_v18, %v347_v21  ;;  %v340_v30 = vmul.f32 %v449_v26, %v412_v16  ;;  %v348_v31 = vmul.f32 %v457_v27, %v412_v16  ;;  %v219_v32 = vpop.f32.mrb[3].mxu0  ;;  %v251_v33 = vpop.f32.mrb[3].mxu1 }
  0xf9   :  { %v360_v34 = vadd.f32 %v413_v18, %v337_v24  ;;  %v368_v35 = vadd.f32 %v413_v18, %v345_v25  ;;  %v338_v36 = vmul.f32 %v412_v16, %v219_v32  ;;  %v346_v37 = vmul.f32 %v412_v16, %v251_v33 }
  0xfa   :  { %378 = vst [vmem:[%s625_s4 + $0x10] sm:$0xff] %v362_v28  ;;  %386 = vst [vmem:[%s625_s4 + $0x50] sm:$0xff] %v370_v29  ;;  %v363_v38 = vadd.f32 %v413_v18, %v340_v30  ;;  %v371_v39 = vadd.f32 %v413_v18, %v348_v31 }
  0xfb   :  { %376 = vst [vmem:[%s625_s4] sm:$0xff] %v360_v34  ;;  %384 = vst [vmem:[%s625_s4 + $0x40] sm:$0xff] %v368_v35  ;;  %v361_v40 = vadd.f32 %v413_v18, %v338_v36  ;;  %v369_v41 = vadd.f32 %v413_v18, %v346_v37 }
  0xfc   :  { %379 = vst [vmem:[%s625_s4 + $0x18] sm:$0xff] %v363_v38  ;;  %387 = vst [vmem:[%s625_s4 + $0x58] sm:$0xff] %v371_v39 }
  0xfd   :  { %377 = vst [vmem:[%s625_s4 + $0x8] sm:$0xff] %v361_v40  ;;  %385 = vst [vmem:[%s625_s4 + $0x48] sm:$0xff] %v369_v41  ;;  %v452_v42 = vpop.f32.mrb[4].mxu0  ;;  %v460_v43 = vpop.f32.mrb[4].mxu1 }
  0xfe   :  { %v343_v44 = vmul.f32 %v452_v42, %v412_v16  ;;  %v351_v45 = vmul.f32 %v460_v43, %v412_v16  ;;  %v232_v46 = vpop.f32.mrb[5].mxu0  ;;  %v264_v47 = vpop.f32.mrb[5].mxu1 }
  0xff   :  { %v341_v48 = vmul.f32 %v412_v16, %v232_v46  ;;  %v349_v49 = vmul.f32 %v412_v16, %v264_v47  ;;  %v453_v50 = vpop.f32.mrb[6].mxu0  ;;  %v461_v51 = vpop.f32.mrb[6].mxu1 }
 0x100   :  { %v366_v52 = vadd.f32 %v413_v18, %v343_v44  ;;  %v374_v53 = vadd.f32 %v413_v18, %v351_v45  ;;  %v344_v54 = vmul.f32 %v453_v50, %v412_v16  ;;  %v352_v55 = vmul.f32 %v461_v51, %v412_v16  ;;  %v235_v56 = vpop.f32.mrb[7].mxu0  ;;  %v267_v57 = vpop.f32.mrb[7].mxu1 }
 0x101   :  { %v364_v58 = vadd.f32 %v413_v18, %v341_v48  ;;  %v372_v59 = vadd.f32 %v413_v18, %v349_v49  ;;  %v342_v60 = vmul.f32 %v412_v16, %v235_v56  ;;  %v350_v61 = vmul.f32 %v412_v16, %v267_v57 }
 0x102   :  { %382 = vst [vmem:[%s625_s4 + $0x30] sm:$0xff] %v366_v52  ;;  %390 = vst [vmem:[%s625_s4 + $0x70] sm:$0xff] %v374_v53  ;;  %v367_v62 = vadd.f32 %v413_v18, %v344_v54  ;;  %v375_v63 = vadd.f32 %v413_v18, %v352_v55 }
 0x103   :  { %380 = vst [vmem:[%s625_s4 + $0x20] sm:$0xff] %v364_v58  ;;  %388 = vst [vmem:[%s625_s4 + $0x60] sm:$0xff] %v372_v59  ;;  %v365_v0 = vadd.f32 %v413_v18, %v342_v60  ;;  %v373_v1 = vadd.f32 %v413_v18, %v350_v61 }
 0x104   :  { %383 = vst [vmem:[%s625_s4 + $0x38] sm:$0xff] %v367_v62  ;;  %391 = vst [vmem:[%s625_s4 + $0x78] sm:$0xff] %v375_v63 }
 0x105   :  { %381 = vst [vmem:[%s625_s4 + $0x28] sm:$0xff] %v365_v0  ;;  %389 = vst [vmem:[%s625_s4 + $0x68] sm:$0xff] %v373_v1 }

// kernel: deeplab_forward.31
= control target key start
LH: loop header
LB: loop body
LE: loop exit
PB: predicated region body
PF: predicated region fallthrough
CT: control target
= control target key end

     0   :  { %s1636_s9 = smov 0   ;;  %s2189_s0 = inlined_call_operand.vmem [shape: f32[1024,128], index: 0, kind: input, shape index: {}]   ;;  %s2190_s1 = inlined_call_operand.vmem [shape: f32[2,128,128], index: 1, kind: input, shape index: {}]   ;;  %s2191_s2 = inlined_call_operand.vmem [shape: f32[2,1024,128], index: 2, kind: output, shape index: {}]  }
   0x1 LB: > { %s1176_s10 = sadd.s32 4294967295, %s1619_s9   ;;  %p1180_p0 = scmp.ge.s32.totalorder %s1619_s9, 1  ;;  %s1619_s9 = sphi %s1636_s9, %s12_s9  }
   0x2   : > { %p112_p1 = scmp.lt.s32.totalorder %s1619_s9, 3 }
   0x4   : > { %p113_p2 = pnand %p1180_p0, %p112_p1 }
   0x5   : > { %p134_p3 = scmp.lt.s32.totalorder (!%p113_p2), %s1176_s10, 1  ;;  %v144_v0 = vld [vmem:[%s2189_s0] sm:$0xff] (!%p113_p2)  ;;  %v145_v26 = vld [vmem:[%s2189_s0 + $0x8] sm:$0xff] (!%p113_p2)  ;;  %v146_v28 = vld [vmem:[%s2189_s0 + $0x10] sm:$0xff] (!%p113_p2) }
   0x6   : > { %116 = sbr.rel (%p113_p2) target bundleno = 389 (0x185), region = 28  ;;  %v208_v1 = vld [vmem:[%s2189_s0 + $0x200] sm:$0xff] (!%p113_p2)  ;;  %1365 = vmatprep.mubr.f32.mxu0 (!%p113_p2), %v144_v0  ;;  %v209_v27 = vld [vmem:[%s2189_s0 + $0x208] sm:$0xff] (!%p113_p2)  ;;  %v210_v29 = vld [vmem:[%s2189_s0 + $0x210] sm:$0xff] (!%p113_p2) }
   0x7   : > { %1461 = vmatprep.mubr.f32.mxu1 (!%p113_p2), %v208_v1  ;;  %v147_v30 = vld [vmem:[%s2189_s0 + $0x18] sm:$0xff] (!%p113_p2)  ;;  %v148_v32 = vld [vmem:[%s2189_s0 + $0x20] sm:$0xff] (!%p113_p2)  ;;  %v149_v34 = vld [vmem:[%s2189_s0 + $0x28] sm:$0xff] (!%p113_p2) }
   0x8   : > { %v211_v31 = vld [vmem:[%s2189_s0 + $0x218] sm:$0xff] (!%p113_p2)  ;;  %v212_v33 = vld [vmem:[%s2189_s0 + $0x220] sm:$0xff] (!%p113_p2)  ;;  %v213_v35 = vld [vmem:[%s2189_s0 + $0x228] sm:$0xff] (!%p113_p2) }
   0x9   : > { %v150_v36 = vld [vmem:[%s2189_s0 + $0x30] sm:$0xff] (!%p113_p2)  ;;  %v151_v38 = vld [vmem:[%s2189_s0 + $0x38] sm:$0xff] (!%p113_p2)  ;;  %v152_v40 = vld [vmem:[%s2189_s0 + $0x40] sm:$0xff] (!%p113_p2) }
   0xa   : > { %v214_v37 = vld [vmem:[%s2189_s0 + $0x230] sm:$0xff] (!%p113_p2)  ;;  %v215_v39 = vld [vmem:[%s2189_s0 + $0x238] sm:$0xff] (!%p113_p2)  ;;  %v216_v41 = vld [vmem:[%s2189_s0 + $0x240] sm:$0xff] (!%p113_p2) }
   0xb   : > { %v153_v42 = vld [vmem:[%s2189_s0 + $0x48] sm:$0xff] (!%p113_p2)  ;;  %v154_v44 = vld [vmem:[%s2189_s0 + $0x50] sm:$0xff] (!%p113_p2)  ;;  %v155_v46 = vld [vmem:[%s2189_s0 + $0x58] sm:$0xff] (!%p113_p2) }
   0xc   : > { %v217_v43 = vld [vmem:[%s2189_s0 + $0x248] sm:$0xff] (!%p113_p2)  ;;  %v218_v45 = vld [vmem:[%s2189_s0 + $0x250] sm:$0xff] (!%p113_p2)  ;;  %v219_v47 = vld [vmem:[%s2189_s0 + $0x258] sm:$0xff] (!%p113_p2) }
   0xd   : > { %s2193_s10 = smov (!%p134_p3, %s1176_s10), 1  ;;  %v156_v48 = vld [vmem:[%s2189_s0 + $0x60] sm:$0xff]  ;;  %v157_v50 = vld [vmem:[%s2189_s0 + $0x68] sm:$0xff]  ;;  %v158_v52 = vld [vmem:[%s2189_s0 + $0x70] sm:$0xff] }
   0xe   : > { %s1187_s15 = sshll.u32 %s2193_s10, 7  ;;  %v220_v49 = vld [vmem:[%s2189_s0 + $0x260] sm:$0xff]  ;;  %v221_v51 = vld [vmem:[%s2189_s0 + $0x268] sm:$0xff]  ;;  %v222_v53 = vld [vmem:[%s2189_s0 + $0x270] sm:$0xff]  ;;  %s1188_s11 = sshll.u32 %s2193_s10, 10 }
   0xf   : > { %s1656_s18 = scalar_lea.vmem %s2190_s1, %s1187_s15  ;;  %v159_v54 = vld [vmem:[%s2189_s0 + $0x78] sm:$0xff]  ;;  %v160_v56 = vld [vmem:[%s2189_s0 + $0x80] sm:$0xff]  ;;  %v161_v58 = vld [vmem:[%s2189_s0 + $0x88] sm:$0xff]  ;;  %s2056_s14 = scalar_lea.vmem %s2191_s2, %s1188_s11 }
  0x10   : > { %v272_v2 = vld [vmem:[%s1656_s18] sm:$0xff]  ;;  %v273_v3 = vld [vmem:[%s1656_s18 + $0x8] sm:$0xff]  ;;  %v274_v4 = vld [vmem:[%s1656_s18 + $0x10] sm:$0xff] }
  0x11   : > { %v1557_v5 = vpack.c.bf16 %v273_v3, %v272_v2  ;;  %v275_v6 = vld [vmem:[%s1656_s18 + $0x18] sm:$0xff]  ;;  %v276_v8 = vld [vmem:[%s1656_s18 + $0x20] sm:$0xff]  ;;  %v277_v9 = vld [vmem:[%s1656_s18 + $0x28] sm:$0xff] }
  0x12   : > { %v1561_v7 = vpack.c.bf16 %v275_v6, %v274_v4  ;;  %v1565_v10 = vpack.c.bf16 %v277_v9, %v276_v8  ;;  %v278_v11 = vld [vmem:[%s1656_s18 + $0x30] sm:$0xff]  ;;  %v279_v12 = vld [vmem:[%s1656_s18 + $0x38] sm:$0xff]  ;;  %v280_v14 = vld [vmem:[%s1656_s18 + $0x40] sm:$0xff] }
  0x13   : > { %1558 = vmatprep.subr.bf16.mxu0 %v1557_v5  ;;  %1589 = vmatprep.subr.bf16.mxu1 %v1557_v5  ;;  %v1569_v13 = vpack.c.bf16 %v279_v12, %v278_v11  ;;  %v281_v15 = vld [vmem:[%s1656_s18 + $0x48] sm:$0xff]  ;;  %v282_v17 = vld [vmem:[%s1656_s18 + $0x50] sm:$0xff]  ;;  %v283_v18 = vld [vmem:[%s1656_s18 + $0x58] sm:$0xff] }
  0x14   : > { %1560 = vmatpush3.bf16.msra.mxu0 %v1557_v5  ;;  %1597 = vmatpush3.bf16.msra.mxu1 %v1557_v5  ;;  %v1573_v16 = vpack.c.bf16 %v281_v15, %v280_v14  ;;  %v1577_v19 = vpack.c.bf16 %v283_v18, %v282_v17  ;;  %v284_v20 = vld [vmem:[%s1656_s18 + $0x60] sm:$0xff]  ;;  %v285_v21 = vld [vmem:[%s1656_s18 + $0x68] sm:$0xff]  ;;  %v286_v23 = vld [vmem:[%s1656_s18 + $0x70] sm:$0xff] }
  0x15   : > { %1562 = vmatprep.subr.bf16.mxu0 %v1561_v7  ;;  %1590 = vmatprep.subr.bf16.mxu1 %v1561_v7  ;;  %v1581_v22 = vpack.c.bf16 %v285_v21, %v284_v20  ;;  %v287_v24 = vld [vmem:[%s1656_s18 + $0x78] sm:$0xff]  ;;  %v224_v57 = vld [vmem:[%s2189_s0 + $0x280] sm:$0xff]  ;;  %v225_v59 = vld [vmem:[%s2189_s0 + $0x288] sm:$0xff] }
  0x16   : > { %v1585_v25 = vpack.c.bf16 %v287_v24, %v286_v23  ;;  %v223_v55 = vld [vmem:[%s2189_s0 + $0x278] sm:$0xff]  ;;  %v162_v60 = vld [vmem:[%s2189_s0 + $0x90] sm:$0xff]  ;;  %v164_v0 = vld [vmem:[%s2189_s0 + $0xa0] sm:$0xff] }
  0x17   : > { %v226_v61 = vld [vmem:[%s2189_s0 + $0x290] sm:$0xff]  ;;  %v163_v62 = vld [vmem:[%s2189_s0 + $0x98] sm:$0xff]  ;;  %v228_v1 = vld [vmem:[%s2189_s0 + $0x2a0] sm:$0xff] }
  0x18   : > { %1564 = vmatpush3.bf16.msra.mxu0 %v1561_v7  ;;  %1598 = vmatpush3.bf16.msra.mxu1 %v1561_v7  ;;  %v227_v63 = vld [vmem:[%s2189_s0 + $0x298] sm:$0xff]  ;;  %v165_v2 = vld [vmem:[%s2189_s0 + $0xa8] sm:$0xff]  ;;  %v166_v4 = vld [vmem:[%s2189_s0 + $0xb0] sm:$0xff] }
  0x19   : > { %1566 = vmatprep.subr.bf16.mxu0 %v1565_v10  ;;  %1591 = vmatprep.subr.bf16.mxu1 %v1565_v10  ;;  %v229_v3 = vld [vmem:[%s2189_s0 + $0x2a8] sm:$0xff]  ;;  %v230_v5 = vld [vmem:[%s2189_s0 + $0x2b0] sm:$0xff]  ;;  %v167_v6 = vld [vmem:[%s2189_s0 + $0xb8] sm:$0xff] }
  0x1a   : > { %v231_v7 = vld [vmem:[%s2189_s0 + $0x2b8] sm:$0xff]  ;;  %v168_v8 = vld [vmem:[%s2189_s0 + $0xc0] sm:$0xff]  ;;  %v233_v11 = vld [vmem:[%s2189_s0 + $0x2c8] sm:$0xff] }
  0x1b   : > { %v232_v9 = vld [vmem:[%s2189_s0 + $0x2c0] sm:$0xff]  ;;  %v170_v12 = vld [vmem:[%s2189_s0 + $0xd0] sm:$0xff]  ;;  %v171_v14 = vld [vmem:[%s2189_s0 + $0xd8] sm:$0xff] }
  0x1c   : > { %1568 = vmatpush3.bf16.msra.mxu0 %v1565_v10  ;;  %1599 = vmatpush3.bf16.msra.mxu1 %v1565_v10  ;;  %v169_v10 = vld [vmem:[%s2189_s0 + $0xc8] sm:$0xff]  ;;  %v235_v15 = vld [vmem:[%s2189_s0 + $0x2d8] sm:$0xff]  ;;  %v236_v17 = vld [vmem:[%s2189_s0 + $0x2e0] sm:$0xff] }
  0x1d   : > { %1570 = vmatprep.subr.bf16.mxu0 %v1569_v13  ;;  %1592 = vmatprep.subr.bf16.mxu1 %v1569_v13  ;;  %v173_v18 = vld [vmem:[%s2189_s0 + $0xe8] sm:$0xff]  ;;  %v174_v20 = vld [vmem:[%s2189_s0 + $0xf0] sm:$0xff]  ;;  %v239_v23 = vld [vmem:[%s2189_s0 + $0x2f8] sm:$0xff] }
  0x1e   : > { %v238_v21 = vld [vmem:[%s2189_s0 + $0x2f0] sm:$0xff]  ;;  %v176_v24 = vld [vmem:[%s2189_s0 + $0x100] sm:$0xff] }
  0x20   : > { %1572 = vmatpush3.bf16.msra.mxu0 %v1569_v13  ;;  %1600 = vmatpush3.bf16.msra.mxu1 %v1569_v13  ;;  %v234_v13 = vld [vmem:[%s2189_s0 + $0x2d0] sm:$0xff] }
  0x21   : > { %1574 = vmatprep.subr.bf16.mxu0 %v1573_v16  ;;  %1593 = vmatprep.subr.bf16.mxu1 %v1573_v16 }
  0x24   : > { %1576 = vmatpush3.bf16.msra.mxu0 %v1573_v16  ;;  %1601 = vmatpush3.bf16.msra.mxu1 %v1573_v16  ;;  %v172_v16 = vld [vmem:[%s2189_s0 + $0xe0] sm:$0xff] }
  0x25   : > { %1578 = vmatprep.subr.bf16.mxu0 %v1577_v19  ;;  %1594 = vmatprep.subr.bf16.mxu1 %v1577_v19 }
  0x28   : > { %1580 = vmatpush3.bf16.msra.mxu0 %v1577_v19  ;;  %1602 = vmatpush3.bf16.msra.mxu1 %v1577_v19  ;;  %v237_v19 = vld [vmem:[%s2189_s0 + $0x2e8] sm:$0xff] }
  0x29   : > { %1582 = vmatprep.subr.bf16.mxu0 %v1581_v22  ;;  %1595 = vmatprep.subr.bf16.mxu1 %v1581_v22 }
  0x2c   : > { %1584 = vmatpush3.bf16.msra.mxu0 %v1581_v22  ;;  %1603 = vmatpush3.bf16.msra.mxu1 %v1581_v22  ;;  %v175_v22 = vld [vmem:[%s2189_s0 + $0xf8] sm:$0xff] }
  0x2d   : > { %1586 = vmatprep.subr.bf16.mxu0 %v1585_v25  ;;  %1596 = vmatprep.subr.bf16.mxu1 %v1585_v25 }
  0x30   : > { %1588 = vmatpush3.bf16.msra.mxu0 %v1585_v25  ;;  %1604 = vmatpush3.bf16.msra.mxu1 %v1585_v25  ;;  %v240_v25 = vld [vmem:[%s2189_s0 + $0x300] sm:$0xff] }
  0x33   : > { %1366 = vmatmul.mubr.f32.vlgmr.msra.gmra.mrb[0].mxu0 %v145_v26  ;;  %1462 = vmatmul.mubr.f32.vlgmr.msra.gmra.mrb[0].mxu1 %v209_v27  ;;  %v177_v26 = vld [vmem:[%s2189_s0 + $0x108] sm:$0xff] }
  0x34   : > { %1368 = vmatprep.mubr.f32.mxu0 %v146_v28  ;;  %1464 = vmatprep.mubr.f32.mxu1 %v210_v29  ;;  %v241_v27 = vld [vmem:[%s2189_s0 + $0x308] sm:$0xff]  ;;  %v178_v28 = vld [vmem:[%s2189_s0 + $0x110] sm:$0xff] }
  0x35   : > { %v242_v29 = vld [vmem:[%s2189_s0 + $0x310] sm:$0xff] }
  0x37   : > { %1369 = vmatmul.mubr.f32.gmra.mrb[2].mxu0 %v147_v30  ;;  %1465 = vmatmul.mubr.f32.gmra.mrb[2].mxu1 %v211_v31  ;;  %v179_v30 = vld [vmem:[%s2189_s0 + $0x118] sm:$0xff] }
  0x38   : > { %1371 = vmatprep.mubr.f32.mxu0 %v148_v32  ;;  %1467 = vmatprep.mubr.f32.mxu1 %v212_v33  ;;  %v243_v31 = vld [vmem:[%s2189_s0 + $0x318] sm:$0xff]  ;;  %v180_v32 = vld [vmem:[%s2189_s0 + $0x120] sm:$0xff] }
  0x39   : > { %v244_v33 = vld [vmem:[%s2189_s0 + $0x320] sm:$0xff] }
  0x3b   : > { %1372 = vmatmul.mubr.f32.gmra.mrb[4].mxu0 %v149_v34  ;;  %1468 = vmatmul.mubr.f32.gmra.mrb[4].mxu1 %v213_v35  ;;  %v181_v34 = vld [vmem:[%s2189_s0 + $0x128] sm:$0xff] }
  0x3c   : > { %1374 = vmatprep.mubr.f32.mxu0 %v150_v36  ;;  %1470 = vmatprep.mubr.f32.mxu1 %v214_v37  ;;  %v245_v35 = vld [vmem:[%s2189_s0 + $0x328] sm:$0xff]  ;;  %v182_v36 = vld [vmem:[%s2189_s0 + $0x130] sm:$0xff] }
  0x3d   : > { %v246_v37 = vld [vmem:[%s2189_s0 + $0x330] sm:$0xff] }
  0x3f   : > { %1375 = vmatmul.mubr.f32.gmra.mrb[6].mxu0 %v151_v38  ;;  %1471 = vmatmul.mubr.f32.gmra.mrb[6].mxu1 %v215_v39  ;;  %v183_v38 = vld [vmem:[%s2189_s0 + $0x138] sm:$0xff] }
  0x40   : > { %1377 = vmatprep.mubr.f32.mxu0 %v152_v40  ;;  %1473 = vmatprep.mubr.f32.mxu1 %v216_v41  ;;  %v247_v39 = vld [vmem:[%s2189_s0 + $0x338] sm:$0xff]  ;;  %v184_v40 = vld [vmem:[%s2189_s0 + $0x140] sm:$0xff] }
  0x41   : > { %v248_v41 = vld [vmem:[%s2189_s0 + $0x340] sm:$0xff] }
  0x43   : > { %1378 = vmatmul.mubr.f32.gmra.mrb[8].mxu0 %v153_v42  ;;  %1474 = vmatmul.mubr.f32.gmra.mrb[8].mxu1 %v217_v43  ;;  %v185_v42 = vld [vmem:[%s2189_s0 + $0x148] sm:$0xff] }
  0x44   : > { %1380 = vmatprep.mubr.f32.mxu0 %v154_v44  ;;  %1476 = vmatprep.mubr.f32.mxu1 %v218_v45  ;;  %v249_v43 = vld [vmem:[%s2189_s0 + $0x348] sm:$0xff]  ;;  %v186_v44 = vld [vmem:[%s2189_s0 + $0x150] sm:$0xff] }
  0x45   : > { %v250_v45 = vld [vmem:[%s2189_s0 + $0x350] sm:$0xff] }
  0x47   : > { %1381 = vmatmul.mubr.f32.gmra.mrb[10].mxu0 %v155_v46  ;;  %1477 = vmatmul.mubr.f32.gmra.mrb[10].mxu1 %v219_v47  ;;  %v187_v46 = vld [vmem:[%s2189_s0 + $0x158] sm:$0xff] }
  0x48   : > { %1383 = vmatprep.mubr.f32.mxu0 %v156_v48  ;;  %1479 = vmatprep.mubr.f32.mxu1 %v220_v49  ;;  %v251_v47 = vld [vmem:[%s2189_s0 + $0x358] sm:$0xff]  ;;  %v188_v48 = vld [vmem:[%s2189_s0 + $0x160] sm:$0xff] }
  0x49   : > { %v252_v49 = vld [vmem:[%s2189_s0 + $0x360] sm:$0xff] }
  0x4b   : > { %1384 = vmatmul.mubr.f32.gmra.mrb[12].mxu0 %v157_v50  ;;  %1480 = vmatmul.mubr.f32.gmra.mrb[12].mxu1 %v221_v51  ;;  %v189_v50 = vld [vmem:[%s2189_s0 + $0x168] sm:$0xff] }
  0x4c   : > { %1386 = vmatprep.mubr.f32.mxu0 %v158_v52  ;;  %1482 = vmatprep.mubr.f32.mxu1 %v222_v53  ;;  %v253_v51 = vld [vmem:[%s2189_s0 + $0x368] sm:$0xff]  ;;  %v190_v52 = vld [vmem:[%s2189_s0 + $0x170] sm:$0xff] }
  0x4d   : > { %v254_v53 = vld [vmem:[%s2189_s0 + $0x370] sm:$0xff] }
  0x4f   : > { %1387 = vmatmul.mubr.f32.gmra.mrb[14].mxu0 %v159_v54  ;;  %1483 = vmatmul.mubr.f32.gmra.mrb[14].mxu1 %v223_v55  ;;  %v191_v54 = vld [vmem:[%s2189_s0 + $0x178] sm:$0xff] }
  0x50   : > { %1389 = vmatprep.mubr.f32.mxu0 %v160_v56  ;;  %1485 = vmatprep.mubr.f32.mxu1 %v224_v57  ;;  %v255_v55 = vld [vmem:[%s2189_s0 + $0x378] sm:$0xff]  ;;  %v192_v56 = vld [vmem:[%s2189_s0 + $0x180] sm:$0xff] }
  0x51   : > { %v256_v57 = vld [vmem:[%s2189_s0 + $0x380] sm:$0xff] }
  0x53   : > { %1390 = vmatmul.mubr.f32.gmra.mrb[16].mxu0 %v161_v58  ;;  %1486 = vmatmul.mubr.f32.gmra.mrb[16].mxu1 %v225_v59  ;;  %v193_v58 = vld [vmem:[%s2189_s0 + $0x188] sm:$0xff] }
  0x54   : > { %1392 = vmatprep.mubr.f32.mxu0 %v162_v60  ;;  %1488 = vmatprep.mubr.f32.mxu1 %v226_v61  ;;  %v257_v59 = vld [vmem:[%s2189_s0 + $0x388] sm:$0xff]  ;;  %v194_v60 = vld [vmem:[%s2189_s0 + $0x190] sm:$0xff] }
  0x55   : > { %v258_v61 = vld [vmem:[%s2189_s0 + $0x390] sm:$0xff] }
  0x57   : > { %1393 = vmatmul.mubr.f32.gmra.mrb[18].mxu0 %v163_v62  ;;  %1489 = vmatmul.mubr.f32.gmra.mrb[18].mxu1 %v227_v63  ;;  %v195_v62 = vld [vmem:[%s2189_s0 + $0x198] sm:$0xff] }
  0x58   : > { %1395 = vmatprep.mubr.f32.mxu0 %v164_v0  ;;  %1491 = vmatprep.mubr.f32.mxu1 %v228_v1  ;;  %v259_v63 = vld [vmem:[%s2189_s0 + $0x398] sm:$0xff]  ;;  %v196_v0 = vld [vmem:[%s2189_s0 + $0x1a0] sm:$0xff] }
  0x59   : > { %v260_v1 = vld [vmem:[%s2189_s0 + $0x3a0] sm:$0xff] }
  0x5b   : > { %1396 = vmatmul.mubr.f32.gmra.mrb[20].mxu0 %v165_v2  ;;  %1492 = vmatmul.mubr.f32.gmra.mrb[20].mxu1 %v229_v3  ;;  %v197_v2 = vld [vmem:[%s2189_s0 + $0x1a8] sm:$0xff] }
  0x5c   : > { %1398 = vmatprep.mubr.f32.mxu0 %v166_v4  ;;  %1494 = vmatprep.mubr.f32.mxu1 %v230_v5  ;;  %v261_v3 = vld [vmem:[%s2189_s0 + $0x3a8] sm:$0xff]  ;;  %v198_v4 = vld [vmem:[%s2189_s0 + $0x1b0] sm:$0xff] }
  0x5d   : > { %v262_v5 = vld [vmem:[%s2189_s0 + $0x3b0] sm:$0xff] }
  0x5f   : > { %1399 = vmatmul.mubr.f32.gmra.mrb[22].mxu0 %v167_v6  ;;  %1495 = vmatmul.mubr.f32.gmra.mrb[22].mxu1 %v231_v7  ;;  %v199_v6 = vld [vmem:[%s2189_s0 + $0x1b8] sm:$0xff] }
  0x60   : > { %1401 = vmatprep.mubr.f32.mxu0 %v168_v8  ;;  %1497 = vmatprep.mubr.f32.mxu1 %v232_v9  ;;  %v263_v7 = vld [vmem:[%s2189_s0 + $0x3b8] sm:$0xff]  ;;  %v200_v8 = vld [vmem:[%s2189_s0 + $0x1c0] sm:$0xff] }
  0x61   : > { %v264_v9 = vld [vmem:[%s2189_s0 + $0x3c0] sm:$0xff] }
  0x63   : > { %1402 = vmatmul.mubr.f32.gmra.mrb[24].mxu0 %v169_v10  ;;  %1498 = vmatmul.mubr.f32.gmra.mrb[24].mxu1 %v233_v11  ;;  %v201_v10 = vld [vmem:[%s2189_s0 + $0x1c8] sm:$0xff] }
  0x64   : > { %1404 = vmatprep.mubr.f32.mxu0 %v170_v12  ;;  %1500 = vmatprep.mubr.f32.mxu1 %v234_v13  ;;  %v265_v11 = vld [vmem:[%s2189_s0 + $0x3c8] sm:$0xff]  ;;  %v202_v12 = vld [vmem:[%s2189_s0 + $0x1d0] sm:$0xff] }
  0x65   : > { %v266_v13 = vld [vmem:[%s2189_s0 + $0x3d0] sm:$0xff] }
  0x67   : > { %1405 = vmatmul.mubr.f32.gmra.mrb[26].mxu0 %v171_v14  ;;  %1501 = vmatmul.mubr.f32.gmra.mrb[26].mxu1 %v235_v15  ;;  %v203_v14 = vld [vmem:[%s2189_s0 + $0x1d8] sm:$0xff] }
  0x68   : > { %1407 = vmatprep.mubr.f32.mxu0 %v172_v16  ;;  %1503 = vmatprep.mubr.f32.mxu1 %v236_v17  ;;  %v267_v15 = vld [vmem:[%s2189_s0 + $0x3d8] sm:$0xff]  ;;  %v204_v16 = vld [vmem:[%s2189_s0 + $0x1e0] sm:$0xff] }
  0x69   : > { %v268_v17 = vld [vmem:[%s2189_s0 + $0x3e0] sm:$0xff] }
  0x6b   : > { %1408 = vmatmul.mubr.f32.gmra.mrb[28].mxu0 %v173_v18  ;;  %1504 = vmatmul.mubr.f32.gmra.mrb[28].mxu1 %v237_v19  ;;  %v205_v18 = vld [vmem:[%s2189_s0 + $0x1e8] sm:$0xff] }
  0x6c   : > { %1410 = vmatprep.mubr.f32.mxu0 %v174_v20  ;;  %1506 = vmatprep.mubr.f32.mxu1 %v238_v21  ;;  %v269_v19 = vld [vmem:[%s2189_s0 + $0x3e8] sm:$0xff]  ;;  %v206_v20 = vld [vmem:[%s2189_s0 + $0x1f0] sm:$0xff] }
  0x6d   : > { %v270_v21 = vld [vmem:[%s2189_s0 + $0x3f0] sm:$0xff] }
  0x6f   : > { %1411 = vmatmul.mubr.f32.gmra.mrb[30].mxu0 %v175_v22  ;;  %1507 = vmatmul.mubr.f32.gmra.mrb[30].mxu1 %v239_v23  ;;  %v207_v22 = vld [vmem:[%s2189_s0 + $0x1f8] sm:$0xff] }
  0x70   : > { %1413 = vmatprep.mubr.f32.mxu0 %v176_v24  ;;  %1509 = vmatprep.mubr.f32.mxu1 %v240_v25  ;;  %v271_v23 = vld [vmem:[%s2189_s0 + $0x3f8] sm:$0xff] }
  0x73   : > { %1414 = vmatmul.mubr.f32.gmra.mrb[32].mxu0 %v177_v26  ;;  %1510 = vmatmul.mubr.f32.gmra.mrb[32].mxu1 %v241_v27 }
  0x74   : > { %1416 = vmatprep.mubr.f32.mxu0 %v178_v28  ;;  %1512 = vmatprep.mubr.f32.mxu1 %v242_v29 }
  0x77   : > { %1417 = vmatmul.mubr.f32.gmra.mrb[34].mxu0 %v179_v30  ;;  %1513 = vmatmul.mubr.f32.gmra.mrb[34].mxu1 %v243_v31 }
  0x78   : > { %1419 = vmatprep.mubr.f32.mxu0 %v180_v32  ;;  %1515 = vmatprep.mubr.f32.mxu1 %v244_v33 }
  0x7b   : > { %1420 = vmatmul.mubr.f32.gmra.mrb[36].mxu0 %v181_v34  ;;  %1516 = vmatmul.mubr.f32.gmra.mrb[36].mxu1 %v245_v35 }
  0x7c   : > { %1422 = vmatprep.mubr.f32.mxu0 %v182_v36  ;;  %1518 = vmatprep.mubr.f32.mxu1 %v246_v37 }
  0x7f   : > { %1423 = vmatmul.mubr.f32.gmra.mrb[38].mxu0 %v183_v38  ;;  %1519 = vmatmul.mubr.f32.gmra.mrb[38].mxu1 %v247_v39 }
  0x80   : > { %1425 = vmatprep.mubr.f32.mxu0 %v184_v40  ;;  %1521 = vmatprep.mubr.f32.mxu1 %v248_v41 }
  0x83   : > { %1426 = vmatmul.mubr.f32.gmra.mrb[40].mxu0 %v185_v42  ;;  %1522 = vmatmul.mubr.f32.gmra.mrb[40].mxu1 %v249_v43 }
  0x84   : > { %1428 = vmatprep.mubr.f32.mxu0 %v186_v44  ;;  %1524 = vmatprep.mubr.f32.mxu1 %v250_v45 }
  0x87   : > { %1429 = vmatmul.mubr.f32.gmra.mrb[42].mxu0 %v187_v46  ;;  %1525 = vmatmul.mubr.f32.gmra.mrb[42].mxu1 %v251_v47 }
  0x88   : > { %1431 = vmatprep.mubr.f32.mxu0 %v188_v48  ;;  %1527 = vmatprep.mubr.f32.mxu1 %v252_v49 }
  0x8b   : > { %1432 = vmatmul.mubr.f32.gmra.mrb[44].mxu0 %v189_v50  ;;  %1528 = vmatmul.mubr.f32.gmra.mrb[44].mxu1 %v253_v51 }
  0x8c   : > { %1434 = vmatprep.mubr.f32.mxu0 %v190_v52  ;;  %1530 = vmatprep.mubr.f32.mxu1 %v254_v53 }
  0x8f   : > { %1435 = vmatmul.mubr.f32.gmra.mrb[46].mxu0 %v191_v54  ;;  %1531 = vmatmul.mubr.f32.gmra.mrb[46].mxu1 %v255_v55 }
  0x90   : > { %1437 = vmatprep.mubr.f32.mxu0 %v192_v56  ;;  %1533 = vmatprep.mubr.f32.mxu1 %v256_v57 }
  0x93   : > { %1438 = vmatmul.mubr.f32.gmra.mrb[48].mxu0 %v193_v58  ;;  %1534 = vmatmul.mubr.f32.gmra.mrb[48].mxu1 %v257_v59 }
  0x94   : > { %1440 = vmatprep.mubr.f32.mxu0 %v194_v60  ;;  %1536 = vmatprep.mubr.f32.mxu1 %v258_v61 }
  0x97   : > { %1441 = vmatmul.mubr.f32.gmra.mrb[50].mxu0 %v195_v62  ;;  %1537 = vmatmul.mubr.f32.gmra.mrb[50].mxu1 %v259_v63 }
  0x98   : > { %1443 = vmatprep.mubr.f32.mxu0 %v196_v0  ;;  %1539 = vmatprep.mubr.f32.mxu1 %v260_v1 }
  0x9b   : > { %1444 = vmatmul.mubr.f32.gmra.mrb[52].mxu0 %v197_v2  ;;  %1540 = vmatmul.mubr.f32.gmra.mrb[52].mxu1 %v261_v3 }
  0x9c   : > { %1446 = vmatprep.mubr.f32.mxu0 %v198_v4  ;;  %1542 = vmatprep.mubr.f32.mxu1 %v262_v5 }
  0x9f   : > { %1447 = vmatmul.mubr.f32.gmra.mrb[54].mxu0 %v199_v6  ;;  %1543 = vmatmul.mubr.f32.gmra.mrb[54].mxu1 %v263_v7 }
  0xa0   : > { %1449 = vmatprep.mubr.f32.mxu0 %v200_v8  ;;  %1545 = vmatprep.mubr.f32.mxu1 %v264_v9 }
  0xa3   : > { %1450 = vmatmul.mubr.f32.gmra.mrb[56].mxu0 %v201_v10  ;;  %1546 = vmatmul.mubr.f32.gmra.mrb[56].mxu1 %v265_v11 }
  0xa4   : > { %1452 = vmatprep.mubr.f32.mxu0 %v202_v12  ;;  %1548 = vmatprep.mubr.f32.mxu1 %v266_v13 }
  0xa7   : > { %1453 = vmatmul.mubr.f32.gmra.mrb[58].mxu0 %v203_v14  ;;  %1549 = vmatmul.mubr.f32.gmra.mrb[58].mxu1 %v267_v15 }
  0xa8   : > { %1455 = vmatprep.mubr.f32.mxu0 %v204_v16  ;;  %1551 = vmatprep.mubr.f32.mxu1 %v268_v17 }
  0xab   : > { %1456 = vmatmul.mubr.f32.gmra.mrb[60].mxu0 %v205_v18  ;;  %1552 = vmatmul.mubr.f32.gmra.mrb[60].mxu1 %v269_v19 }
  0xac   : > { %1458 = vmatprep.mubr.f32.mxu0 %v206_v20  ;;  %1554 = vmatprep.mubr.f32.mxu1 %v270_v21 }
  0xaf   : > { %1459 = vmatmul.mubr.f32.gmra.mrb[62].mxu0 %v207_v22  ;;  %1555 = vmatmul.mubr.f32.gmra.mrb[62].mxu1 %v271_v23 }
 0x106   : > { %v1367_v24 = vpop.f32.mrb[0].mxu0  ;;  %v1463_v25 = vpop.f32.mrb[0].mxu1 }
 0x107   : > { %994 = vst [vmem:[%s2056_s14 + $0x8] sm:$0xff] %v1367_v24  ;;  %1058 = vst [vmem:[%s2056_s14 + $0x208] sm:$0xff] %v1463_v25  ;;  %v354_v26 = vpop.f32.mrb[1].mxu0  ;;  %v674_v27 = vpop.f32.mrb[1].mxu1 }
 0x108   : > { %993 = vst [vmem:[%s2056_s14] sm:$0xff] %v354_v26  ;;  %1057 = vst [vmem:[%s2056_s14 + $0x200] sm:$0xff] %v674_v27 }
 0x10a   : > { %v1370_v28 = vpop.f32.mrb[2].mxu0  ;;  %v1466_v29 = vpop.f32.mrb[2].mxu1 }
 0x10b   : > { %996 = vst [vmem:[%s2056_s14 + $0x18] sm:$0xff] %v1370_v28  ;;  %1060 = vst [vmem:[%s2056_s14 + $0x218] sm:$0xff] %v1466_v29  ;;  %v364_v30 = vpop.f32.mrb[3].mxu0  ;;  %v684_v31 = vpop.f32.mrb[3].mxu1 }
 0x10c   : > { %995 = vst [vmem:[%s2056_s14 + $0x10] sm:$0xff] %v364_v30  ;;  %1059 = vst [vmem:[%s2056_s14 + $0x210] sm:$0xff] %v684_v31 }
 0x10e   : > { %v1373_v32 = vpop.f32.mrb[4].mxu0  ;;  %v1469_v33 = vpop.f32.mrb[4].mxu1 }
 0x10f   : > { %998 = vst [vmem:[%s2056_s14 + $0x28] sm:$0xff] %v1373_v32  ;;  %1062 = vst [vmem:[%s2056_s14 + $0x228] sm:$0xff] %v1469_v33  ;;  %v374_v34 = vpop.f32.mrb[5].mxu0  ;;  %v694_v35 = vpop.f32.mrb[5].mxu1 }
 0x110   : > { %997 = vst [vmem:[%s2056_s14 + $0x20] sm:$0xff] %v374_v34  ;;  %1061 = vst [vmem:[%s2056_s14 + $0x220] sm:$0xff] %v694_v35 }
 0x112   : > { %v1376_v36 = vpop.f32.mrb[6].mxu0  ;;  %v1472_v37 = vpop.f32.mrb[6].mxu1 }
 0x113   : > { %1000 = vst [vmem:[%s2056_s14 + $0x38] sm:$0xff] %v1376_v36  ;;  %1064 = vst [vmem:[%s2056_s14 + $0x238] sm:$0xff] %v1472_v37  ;;  %v384_v38 = vpop.f32.mrb[7].mxu0  ;;  %v704_v39 = vpop.f32.mrb[7].mxu1 }
 0x114   : > { %999 = vst [vmem:[%s2056_s14 + $0x30] sm:$0xff] %v384_v38  ;;  %1063 = vst [vmem:[%s2056_s14 + $0x230] sm:$0xff] %v704_v39 }
 0x116   : > { %v1379_v40 = vpop.f32.mrb[8].mxu0  ;;  %v1475_v41 = vpop.f32.mrb[8].mxu1 }
 0x117   : > { %1002 = vst [vmem:[%s2056_s14 + $0x48] sm:$0xff] %v1379_v40  ;;  %1066 = vst [vmem:[%s2056_s14 + $0x248] sm:$0xff] %v1475_v41  ;;  %v394_v42 = vpop.f32.mrb[9].mxu0  ;;  %v714_v43 = vpop.f32.mrb[9].mxu1 }
 0x118   : > { %1001 = vst [vmem:[%s2056_s14 + $0x40] sm:$0xff] %v394_v42  ;;  %1065 = vst [vmem:[%s2056_s14 + $0x240] sm:$0xff] %v714_v43 }
 0x11a   : > { %v1382_v44 = vpop.f32.mrb[10].mxu0  ;;  %v1478_v45 = vpop.f32.mrb[10].mxu1 }
 0x11b   : > { %1004 = vst [vmem:[%s2056_s14 + $0x58] sm:$0xff] %v1382_v44  ;;  %1068 = vst [vmem:[%s2056_s14 + $0x258] sm:$0xff] %v1478_v45  ;;  %v404_v46 = vpop.f32.mrb[11].mxu0  ;;  %v724_v47 = vpop.f32.mrb[11].mxu1 }
 0x11c   : > { %1003 = vst [vmem:[%s2056_s14 + $0x50] sm:$0xff] %v404_v46  ;;  %1067 = vst [vmem:[%s2056_s14 + $0x250] sm:$0xff] %v724_v47 }
 0x11e   : > { %v1385_v48 = vpop.f32.mrb[12].mxu0  ;;  %v1481_v49 = vpop.f32.mrb[12].mxu1 }
 0x11f   : > { %1006 = vst [vmem:[%s2056_s14 + $0x68] sm:$0xff] %v1385_v48  ;;  %1070 = vst [vmem:[%s2056_s14 + $0x268] sm:$0xff] %v1481_v49  ;;  %v414_v50 = vpop.f32.mrb[13].mxu0  ;;  %v734_v51 = vpop.f32.mrb[13].mxu1 }
 0x120   : > { %1005 = vst [vmem:[%s2056_s14 + $0x60] sm:$0xff] %v414_v50  ;;  %1069 = vst [vmem:[%s2056_s14 + $0x260] sm:$0xff] %v734_v51 }
 0x122   : > { %v1388_v52 = vpop.f32.mrb[14].mxu0  ;;  %v1484_v53 = vpop.f32.mrb[14].mxu1 }
 0x123   : > { %1008 = vst [vmem:[%s2056_s14 + $0x78] sm:$0xff] %v1388_v52  ;;  %1072 = vst [vmem:[%s2056_s14 + $0x278] sm:$0xff] %v1484_v53  ;;  %v424_v54 = vpop.f32.mrb[15].mxu0  ;;  %v744_v55 = vpop.f32.mrb[15].mxu1 }
 0x124   : > { %1007 = vst [vmem:[%s2056_s14 + $0x70] sm:$0xff] %v424_v54  ;;  %1071 = vst [vmem:[%s2056_s14 + $0x270] sm:$0xff] %v744_v55 }
 0x126   : > { %v1391_v56 = vpop.f32.mrb[16].mxu0  ;;  %v1487_v57 = vpop.f32.mrb[16].mxu1 }
 0x127   : > { %1010 = vst [vmem:[%s2056_s14 + $0x88] sm:$0xff] %v1391_v56  ;;  %1074 = vst [vmem:[%s2056_s14 + $0x288] sm:$0xff] %v1487_v57  ;;  %v434_v58 = vpop.f32.mrb[17].mxu0  ;;  %v754_v59 = vpop.f32.mrb[17].mxu1 }
 0x128   : > { %1009 = vst [vmem:[%s2056_s14 + $0x80] sm:$0xff] %v434_v58  ;;  %1073 = vst [vmem:[%s2056_s14 + $0x280] sm:$0xff] %v754_v59 }
 0x12a   : > { %v1394_v60 = vpop.f32.mrb[18].mxu0  ;;  %v1490_v61 = vpop.f32.mrb[18].mxu1 }
 0x12b   : > { %1012 = vst [vmem:[%s2056_s14 + $0x98] sm:$0xff] %v1394_v60  ;;  %1076 = vst [vmem:[%s2056_s14 + $0x298] sm:$0xff] %v1490_v61  ;;  %v444_v62 = vpop.f32.mrb[19].mxu0  ;;  %v764_v63 = vpop.f32.mrb[19].mxu1 }
 0x12c   : > { %1011 = vst [vmem:[%s2056_s14 + $0x90] sm:$0xff] %v444_v62  ;;  %1075 = vst [vmem:[%s2056_s14 + $0x290] sm:$0xff] %v764_v63 }
 0x12e   : > { %v1397_v0 = vpop.f32.mrb[20].mxu0  ;;  %v1493_v1 = vpop.f32.mrb[20].mxu1 }
 0x12f   : > { %1014 = vst [vmem:[%s2056_s14 + $0xa8] sm:$0xff] %v1397_v0  ;;  %1078 = vst [vmem:[%s2056_s14 + $0x2a8] sm:$0xff] %v1493_v1  ;;  %v454_v2 = vpop.f32.mrb[21].mxu0  ;;  %v774_v3 = vpop.f32.mrb[21].mxu1 }
 0x130   : > { %1013 = vst [vmem:[%s2056_s14 + $0xa0] sm:$0xff] %v454_v2  ;;  %1077 = vst [vmem:[%s2056_s14 + $0x2a0] sm:$0xff] %v774_v3 }
 0x132   : > { %v1400_v4 = vpop.f32.mrb[22].mxu0  ;;  %v1496_v5 = vpop.f32.mrb[22].mxu1 }
 0x133   : > { %1016 = vst [vmem:[%s2056_s14 + $0xb8] sm:$0xff] %v1400_v4  ;;  %1080 = vst [vmem:[%s2056_s14 + $0x2b8] sm:$0xff] %v1496_v5  ;;  %v464_v6 = vpop.f32.mrb[23].mxu0  ;;  %v784_v7 = vpop.f32.mrb[23].mxu1 }
 0x134   : > { %1015 = vst [vmem:[%s2056_s14 + $0xb0] sm:$0xff] %v464_v6  ;;  %1079 = vst [vmem:[%s2056_s14 + $0x2b0] sm:$0xff] %v784_v7 }
 0x136   : > { %v1403_v8 = vpop.f32.mrb[24].mxu0  ;;  %v1499_v9 = vpop.f32.mrb[24].mxu1 }
 0x137   : > { %1018 = vst [vmem:[%s2056_s14 + $0xc8] sm:$0xff] %v1403_v8  ;;  %1082 = vst [vmem:[%s2056_s14 + $0x2c8] sm:$0xff] %v1499_v9  ;;  %v474_v10 = vpop.f32.mrb[25].mxu0  ;;  %v794_v11 = vpop.f32.mrb[25].mxu1 }
 0x138   : > { %1017 = vst [vmem:[%s2056_s14 + $0xc0] sm:$0xff] %v474_v10  ;;  %1081 = vst [vmem:[%s2056_s14 + $0x2c0] sm:$0xff] %v794_v11 }
 0x13a   : > { %v1406_v12 = vpop.f32.mrb[26].mxu0  ;;  %v1502_v13 = vpop.f32.mrb[26].mxu1 }
 0x13b   : > { %1020 = vst [vmem:[%s2056_s14 + $0xd8] sm:$0xff] %v1406_v12  ;;  %1084 = vst [vmem:[%s2056_s14 + $0x2d8] sm:$0xff] %v1502_v13  ;;  %v484_v14 = vpop.f32.mrb[27].mxu0  ;;  %v804_v15 = vpop.f32.mrb[27].mxu1 }
 0x13c   : > { %1019 = vst [vmem:[%s2056_s14 + $0xd0] sm:$0xff] %v484_v14  ;;  %1083 = vst [vmem:[%s2056_s14 + $0x2d0] sm:$0xff] %v804_v15 }
 0x13e   : > { %v1409_v16 = vpop.f32.mrb[28].mxu0  ;;  %v1505_v17 = vpop.f32.mrb[28].mxu1 }
 0x13f   : > { %1022 = vst [vmem:[%s2056_s14 + $0xe8] sm:$0xff] %v1409_v16  ;;  %1086 = vst [vmem:[%s2056_s14 + $0x2e8] sm:$0xff] %v1505_v17  ;;  %v494_v18 = vpop.f32.mrb[29].mxu0  ;;  %v814_v19 = vpop.f32.mrb[29].mxu1 }
 0x140   : > { %1021 = vst [vmem:[%s2056_s14 + $0xe0] sm:$0xff] %v494_v18  ;;  %1085 = vst [vmem:[%s2056_s14 + $0x2e0] sm:$0xff] %v814_v19 }
 0x142   : > { %v1412_v20 = vpop.f32.mrb[30].mxu0  ;;  %v1508_v21 = vpop.f32.mrb[30].mxu1 }
 0x143   : > { %1024 = vst [vmem:[%s2056_s14 + $0xf8] sm:$0xff] %v1412_v20  ;;  %1088 = vst [vmem:[%s2056_s14 + $0x2f8] sm:$0xff] %v1508_v21  ;;  %v504_v22 = vpop.f32.mrb[31].mxu0  ;;  %v824_v23 = vpop.f32.mrb[31].mxu1 }
 0x144   : > { %1023 = vst [vmem:[%s2056_s14 + $0xf0] sm:$0xff] %v504_v22  ;;  %1087 = vst [vmem:[%s2056_s14 + $0x2f0] sm:$0xff] %v824_v23 }
 0x146   : > { %v1415_v24 = vpop.f32.mrb[32].mxu0  ;;  %v1511_v25 = vpop.f32.mrb[32].mxu1 }
 0x147   : > { %1026 = vst [vmem:[%s2056_s14 + $0x108] sm:$0xff] %v1415_v24  ;;  %1090 = vst [vmem:[%s2056_s14 + $0x308] sm:$0xff] %v1511_v25  ;;  %v514_v26 = vpop.f32.mrb[33].mxu0  ;;  %v834_v27 = vpop.f32.mrb[33].mxu1 }
 0x148   : > { %1025 = vst [vmem:[%s2056_s14 + $0x100] sm:$0xff] %v514_v26  ;;  %1089 = vst [vmem:[%s2056_s14 + $0x300] sm:$0xff] %v834_v27 }
 0x14a   : > { %v1418_v28 = vpop.f32.mrb[34].mxu0  ;;  %v1514_v29 = vpop.f32.mrb[34].mxu1 }
 0x14b   : > { %1028 = vst [vmem:[%s2056_s14 + $0x118] sm:$0xff] %v1418_v28  ;;  %1092 = vst [vmem:[%s2056_s14 + $0x318] sm:$0xff] %v1514_v29  ;;  %v524_v30 = vpop.f32.mrb[35].mxu0  ;;  %v844_v31 = vpop.f32.mrb[35].mxu1 }
 0x14c   : > { %1027 = vst [vmem:[%s2056_s14 + $0x110] sm:$0xff] %v524_v30  ;;  %1091 = vst [vmem:[%s2056_s14 + $0x310] sm:$0xff] %v844_v31 }
 0x14e   : > { %v1421_v32 = vpop.f32.mrb[36].mxu0  ;;  %v1517_v33 = vpop.f32.mrb[36].mxu1 }
 0x14f   : > { %1030 = vst [vmem:[%s2056_s14 + $0x128] sm:$0xff] %v1421_v32  ;;  %1094 = vst [vmem:[%s2056_s14 + $0x328] sm:$0xff] %v1517_v33  ;;  %v534_v34 = vpop.f32.mrb[37].mxu0  ;;  %v854_v35 = vpop.f32.mrb[37].mxu1 }
 0x150   : > { %1029 = vst [vmem:[%s2056_s14 + $0x120] sm:$0xff] %v534_v34  ;;  %1093 = vst [vmem:[%s2056_s14 + $0x320] sm:$0xff] %v854_v35 }
 0x152   : > { %v1424_v36 = vpop.f32.mrb[38].mxu0  ;;  %v1520_v37 = vpop.f32.mrb[38].mxu1 }
 0x153   : > { %1032 = vst [vmem:[%s2056_s14 + $0x138] sm:$0xff] %v1424_v36  ;;  %1096 = vst [vmem:[%s2056_s14 + $0x338] sm:$0xff] %v1520_v37  ;;  %v544_v38 = vpop.f32.mrb[39].mxu0  ;;  %v864_v39 = vpop.f32.mrb[39].mxu1 }
 0x154   : > { %1031 = vst [vmem:[%s2056_s14 + $0x130] sm:$0xff] %v544_v38  ;;  %1095 = vst [vmem:[%s2056_s14 + $0x330] sm:$0xff] %v864_v39 }
 0x156   : > { %v1427_v40 = vpop.f32.mrb[40].mxu0  ;;  %v1523_v41 = vpop.f32.mrb[40].mxu1 }
 0x157   : > { %1034 = vst [vmem:[%s2056_s14 + $0x148] sm:$0xff] %v1427_v40  ;;  %1098 = vst [vmem:[%s2056_s14 + $0x348] sm:$0xff] %v1523_v41  ;;  %v554_v42 = vpop.f32.mrb[41].mxu0  ;;  %v874_v43 = vpop.f32.mrb[41].mxu1 }
 0x158   : > { %1033 = vst [vmem:[%s2056_s14 + $0x140] sm:$0xff] %v554_v42  ;;  %1097 = vst [vmem:[%s2056_s14 + $0x340] sm:$0xff] %v874_v43 }
 0x15a   : > { %v1430_v44 = vpop.f32.mrb[42].mxu0  ;;  %v1526_v45 = vpop.f32.mrb[42].mxu1 }
 0x15b   : > { %1036 = vst [vmem:[%s2056_s14 + $0x158] sm:$0xff] %v1430_v44  ;;  %1100 = vst [vmem:[%s2056_s14 + $0x358] sm:$0xff] %v1526_v45  ;;  %v564_v46 = vpop.f32.mrb[43].mxu0  ;;  %v884_v47 = vpop.f32.mrb[43].mxu1 }
 0x15c   : > { %1035 = vst [vmem:[%s2056_s14 + $0x150] sm:$0xff] %v564_v46  ;;  %1099 = vst [vmem:[%s2056_s14 + $0x350] sm:$0xff] %v884_v47 }
 0x15e   : > { %v1433_v48 = vpop.f32.mrb[44].mxu0  ;;  %v1529_v49 = vpop.f32.mrb[44].mxu1 }
 0x15f   : > { %1038 = vst [vmem:[%s2056_s14 + $0x168] sm:$0xff] %v1433_v48  ;;  %1102 = vst [vmem:[%s2056_s14 + $0x368] sm:$0xff] %v1529_v49  ;;  %v574_v50 = vpop.f32.mrb[45].mxu0  ;;  %v894_v51 = vpop.f32.mrb[45].mxu1 }
 0x160   : > { %1037 = vst [vmem:[%s2056_s14 + $0x160] sm:$0xff] %v574_v50  ;;  %1101 = vst [vmem:[%s2056_s14 + $0x360] sm:$0xff] %v894_v51 }
 0x162   : > { %v1436_v52 = vpop.f32.mrb[46].mxu0  ;;  %v1532_v53 = vpop.f32.mrb[46].mxu1 }
 0x163   : > { %1040 = vst [vmem:[%s2056_s14 + $0x178] sm:$0xff] %v1436_v52  ;;  %1104 = vst [vmem:[%s2056_s14 + $0x378] sm:$0xff] %v1532_v53  ;;  %v584_v54 = vpop.f32.mrb[47].mxu0  ;;  %v904_v55 = vpop.f32.mrb[47].mxu1 }
 0x164   : > { %1039 = vst [vmem:[%s2056_s14 + $0x170] sm:$0xff] %v584_v54  ;;  %1103 = vst [vmem:[%s2056_s14 + $0x370] sm:$0xff] %v904_v55 }
 0x166   : > { %v1439_v56 = vpop.f32.mrb[48].mxu0  ;;  %v1535_v57 = vpop.f32.mrb[48].mxu1 }
 0x167   : > { %1042 = vst [vmem:[%s2056_s14 + $0x188] sm:$0xff] %v1439_v56  ;;  %1106 = vst [vmem:[%s2056_s14 + $0x388] sm:$0xff] %v1535_v57  ;;  %v594_v58 = vpop.f32.mrb[49].mxu0  ;;  %v914_v59 = vpop.f32.mrb[49].mxu1 }
 0x168   : > { %1041 = vst [vmem:[%s2056_s14 + $0x180] sm:$0xff] %v594_v58  ;;  %1105 = vst [vmem:[%s2056_s14 + $0x380] sm:$0xff] %v914_v59 }
 0x16a   : > { %v1442_v60 = vpop.f32.mrb[50].mxu0  ;;  %v1538_v61 = vpop.f32.mrb[50].mxu1 }
 0x16b   : > { %1044 = vst [vmem:[%s2056_s14 + $0x198] sm:$0xff] %v1442_v60  ;;  %1108 = vst [vmem:[%s2056_s14 + $0x398] sm:$0xff] %v1538_v61  ;;  %v604_v62 = vpop.f32.mrb[51].mxu0  ;;  %v924_v63 = vpop.f32.mrb[51].mxu1 }
 0x16c   : > { %1043 = vst [vmem:[%s2056_s14 + $0x190] sm:$0xff] %v604_v62  ;;  %1107 = vst [vmem:[%s2056_s14 + $0x390] sm:$0xff] %v924_v63 }
 0x16e   : > { %v1445_v0 = vpop.f32.mrb[52].mxu0  ;;  %v1541_v1 = vpop.f32.mrb[52].mxu1 }
 0x16f   : > { %1046 = vst [vmem:[%s2056_s14 + $0x1a8] sm:$0xff] %v1445_v0  ;;  %1110 = vst [vmem:[%s2056_s14 + $0x3a8] sm:$0xff] %v1541_v1  ;;  %v614_v2 = vpop.f32.mrb[53].mxu0  ;;  %v934_v3 = vpop.f32.mrb[53].mxu1 }
 0x170   : > { %1045 = vst [vmem:[%s2056_s14 + $0x1a0] sm:$0xff] %v614_v2  ;;  %1109 = vst [vmem:[%s2056_s14 + $0x3a0] sm:$0xff] %v934_v3 }
 0x172   : > { %v1448_v4 = vpop.f32.mrb[54].mxu0  ;;  %v1544_v5 = vpop.f32.mrb[54].mxu1 }
 0x173   : > { %1048 = vst [vmem:[%s2056_s14 + $0x1b8] sm:$0xff] %v1448_v4  ;;  %1112 = vst [vmem:[%s2056_s14 + $0x3b8] sm:$0xff] %v1544_v5  ;;  %v624_v6 = vpop.f32.mrb[55].mxu0  ;;  %v944_v7 = vpop.f32.mrb[55].mxu1 }
 0x174   : > { %1047 = vst [vmem:[%s2056_s14 + $0x1b0] sm:$0xff] %v624_v6  ;;  %1111 = vst [vmem:[%s2056_s14 + $0x3b0] sm:$0xff] %v944_v7 }
 0x176   : > { %v1451_v8 = vpop.f32.mrb[56].mxu0  ;;  %v1547_v9 = vpop.f32.mrb[56].mxu1 }
 0x177   : > { %1050 = vst [vmem:[%s2056_s14 + $0x1c8] sm:$0xff] %v1451_v8  ;;  %1114 = vst [vmem:[%s2056_s14 + $0x3c8] sm:$0xff] %v1547_v9  ;;  %v634_v10 = vpop.f32.mrb[57].mxu0  ;;  %v954_v11 = vpop.f32.mrb[57].mxu1 }
 0x178   : > { %1049 = vst [vmem:[%s2056_s14 + $0x1c0] sm:$0xff] %v634_v10  ;;  %1113 = vst [vmem:[%s2056_s14 + $0x3c0] sm:$0xff] %v954_v11 }
 0x17a   : > { %v1454_v12 = vpop.f32.mrb[58].mxu0  ;;  %v1550_v13 = vpop.f32.mrb[58].mxu1 }
 0x17b   : > { %1052 = vst [vmem:[%s2056_s14 + $0x1d8] sm:$0xff] %v1454_v12  ;;  %1116 = vst [vmem:[%s2056_s14 + $0x3d8] sm:$0xff] %v1550_v13  ;;  %v644_v14 = vpop.f32.mrb[59].mxu0  ;;  %v964_v15 = vpop.f32.mrb[59].mxu1 }
 0x17c   : > { %1051 = vst [vmem:[%s2056_s14 + $0x1d0] sm:$0xff] %v644_v14  ;;  %1115 = vst [vmem:[%s2056_s14 + $0x3d0] sm:$0xff] %v964_v15 }
 0x17e   : > { %v1457_v16 = vpop.f32.mrb[60].mxu0  ;;  %v1553_v17 = vpop.f32.mrb[60].mxu1 }
 0x17f   : > { %1054 = vst [vmem:[%s2056_s14 + $0x1e8] sm:$0xff] %v1457_v16  ;;  %1118 = vst [vmem:[%s2056_s14 + $0x3e8] sm:$0xff] %v1553_v17  ;;  %v654_v18 = vpop.f32.mrb[61].mxu0  ;;  %v974_v19 = vpop.f32.mrb[61].mxu1 }
 0x180   : > { %1053 = vst [vmem:[%s2056_s14 + $0x1e0] sm:$0xff] %v654_v18  ;;  %1117 = vst [vmem:[%s2056_s14 + $0x3e0] sm:$0xff] %v974_v19 }
 0x182   : > { %v1460_v20 = vpop.f32.mrb[62].mxu0  ;;  %v1556_v21 = vpop.f32.mrb[62].mxu1 }
 0x183   : > { %1056 = vst [vmem:[%s2056_s14 + $0x1f8] sm:$0xff] %v1460_v20  ;;  %1120 = vst [vmem:[%s2056_s14 + $0x3f8] sm:$0xff] %v1556_v21  ;;  %v664_v22 = vpop.f32.mrb[63].mxu0  ;;  %v984_v23 = vpop.f32.mrb[63].mxu1 }
 0x184   : > { %1055 = vst [vmem:[%s2056_s14 + $0x1f0] sm:$0xff] %v664_v22  ;;  %1119 = vst [vmem:[%s2056_s14 + $0x3f0] sm:$0xff] %v984_v23 }
 0x185 PF: > { %s12_s9 = sadd.s32 1, %s1619_s9  }
 0x186   : > { %p9_p4 = scmp.ge.s32.totalorder %s12_s9, 4  }
 0x188   :  { %11 = sbr.rel (!%p9_p4) target bundleno = 1 (0x1), region = 58 }

</bundles_post_ra>
